<compile_context>
chip_gen: v5e
topology: v5e:2x2
jax: 0.10.0
libtpu: 0.0.40
codegen_flags: <defaults>
</compile_context>

<pallas_src>
import functools

import jax
import jax.numpy as jnp
from jax.experimental import pallas as pl
from jax.experimental.pallas import tpu as pltpu


# Where the pooled (H, W) map sits inside the zero-padded VMEM scratch.
# Offsets are >= K//2 and tile-aligned (sublane multiple of 8, lane multiple
# of 128) so the interior store starts on a tile boundary.
_ROW0 = 8
_COL0 = 128


def _sam_kernel(w_ref, x_ref, o_ref, max_ref, sum_ref, *, H, W, K):
    """One batch element of SAM.

    w_ref   : SMEM (2*K*K,) f32 — conv weights flattened as [c, kh, kw];
              channel 1 (the 'avg' channel) is pre-scaled by 1/C.
    x_ref   : VMEM (1, C, H, W) input block.
    o_ref   : VMEM (1, C, H, W) output block.
    max_ref : VMEM (H + 2*_ROW0, W + 2*_COL0) f32 scratch, zero border.
    sum_ref : VMEM (H + 2*_ROW0, W + 2*_COL0) f32 scratch, zero border.
    """
    pad = K // 2

    # Zero the padded scratch once; only the interior is rewritten below so
    # the zero border (the conv's "same" padding) persists across the grid.
    @pl.when(pl.program_id(0) == 0)
    def _():
        max_ref[...] = jnp.zeros_like(max_ref)
        sum_ref[...] = jnp.zeros_like(sum_ref)

    # Channel squeeze in f32 (robust accumulation even for bf16 inputs).
    x = x_ref[0].astype(jnp.float32)                       # (C, H, W)
    max_ref[_ROW0:_ROW0 + H, _COL0:_COL0 + W] = jnp.max(x, axis=0)
    sum_ref[_ROW0:_ROW0 + H, _COL0:_COL0 + W] = jnp.sum(x, axis=0)

    # 7x7 "same" cross-correlation over the 2-channel [max, mean] map as a
    # shift-and-accumulate on the zero-padded scratch.
    acc = jnp.zeros((H, W), jnp.float32)
    for c, pooled in ((0, max_ref), (1, sum_ref)):
        for kh in range(K):
            row = _ROW0 - pad + kh
            for kw in range(K):
                col = _COL0 - pad + kw
                w = w_ref[c * K * K + kh * K + kw]          # SMEM scalar
                acc = acc + w * pooled[row:row + H, col:col + W]

    att = jax.nn.sigmoid(acc)                               # (H, W) f32

    # Broadcast the spatial attention map over all channels and write out.
    o_ref[0] = (x * att).astype(o_ref.dtype)


def sam_forward(x, conv_weight):
    """SAM.forward.

    x           : (B, C, H, W)
    conv_weight : (1, 2, K, K) — nn.Conv2d(2, 1, K, padding=K//2, bias=False)
    """
    B, C, H, W = x.shape
    K = conv_weight.shape[-1]
    assert conv_weight.shape == (1, 2, K, K)

    # Flatten taps to [c, kh, kw]; fold the channel-mean's 1/C into the
    # 'avg' channel so the kernel can use the channel *sum*.
    w_max = conv_weight[0, 0].astype(jnp.float32).reshape(-1)
    w_avg = (conv_weight[0, 1].astype(jnp.float32) / C).reshape(-1)
    w_flat = jnp.concatenate([w_max, w_avg])                # (2*K*K,)

    kernel = functools.partial(_sam_kernel, H=H, W=W, K=K)
    pad_h = H + 2 * _ROW0
    pad_w = W + 2 * _COL0

    # NOTE: one (1, C, H, W) block per grid step keeps HBM traffic minimal
    # (read x once, write out once). For very large C*H*W (v7x: 64 MiB VMEM)
    # this would need an extra spatial-tile grid axis / higher
    # vmem_limit_bytes; not needed at these shapes.
    return pl.pallas_call(
        kernel,
        out_shape=jax.ShapeDtypeStruct((B, C, H, W), x.dtype),
        grid_spec=pltpu.PrefetchScalarGridSpec(
            num_scalar_prefetch=0,
            grid=(B,),
            in_specs=[
                pl.BlockSpec(memory_space=pltpu.MemorySpace.SMEM),    # weights
                pl.BlockSpec((1, C, H, W), lambda b: (b, 0, 0, 0)),   # x
            ],
            out_specs=pl.BlockSpec((1, C, H, W), lambda b: (b, 0, 0, 0)),
            scratch_shapes=[
                pltpu.VMEM((pad_h, pad_w), jnp.float32),   # padded max map
                pltpu.VMEM((pad_h, pad_w), jnp.float32),   # padded sum map
            ],
        ),
        compiler_params=pltpu.CompilerParams(
            dimension_semantics=("parallel",)),
    )(w_flat, x)


def sam_ref(x, conv_weight):
    """Pure-JAX reference mirroring the PyTorch module."""
    max_pool = jnp.max(x, axis=1, keepdims=True)
    avg_pool = jnp.mean(x, axis=1, keepdims=True)
    feat = jnp.concatenate([max_pool, avg_pool], axis=1)     # (B, 2, H, W)
    K = conv_weight.shape[-1]
    att = jax.lax.conv_general_dilated(
        feat, conv_weight, window_strides=(1, 1),
        padding=[(K // 2, K // 2), (K // 2, K // 2)],
        dimension_numbers=("NCHW", "OIHW", "NCHW"))
    return jax.nn.sigmoid(att) * x


if __name__ == "__main__":
    B, C, H, W = 2, 4, 16, 16
    K = 7

    key = jax.random.PRNGKey(0)
    kx, kw = jax.random.split(key)
    x = jax.random.normal(kx, (B, C, H, W), dtype=jnp.float32)
    # nn.Conv2d(2, 1, 7, padding=3, bias=False).weight shape: (1, 2, 7, 7)
    conv_weight = jax.random.normal(kw, (1, 2, K, K), dtype=jnp.float32) * 0.1

    out = sam_forward(x, conv_weight)
    out = jax.block_until_ready(out)

    ref = sam_ref(x, conv_weight)
    assert out.shape == (B, C, H, W)
    assert jnp.allclose(out, ref, atol=1e-4, rtol=1e-4), "mismatch vs reference"

    print("KERNEL_OK")
</pallas_src>

<mosaic_0001>
module attributes {stable_mosaic.version = 11 : i64} {
  func.func @_sam_kernel(%arg0: i32, %arg1: memref<98xf32, #tpu.memory_space<smem>>, %arg2: memref<1x4x16x16xf32, #tpu.memory_space<vmem>>, %arg3: memref<1x4x16x16xf32, #tpu.memory_space<vmem>>, %arg4: memref<32x272xf32, #tpu.memory_space<vmem>>, %arg5: memref<32x272xf32, #tpu.memory_space<vmem>>) attributes {dimension_semantics = [#tpu.dimension_semantics<parallel>], iteration_bounds = array<i64: 2>, scalar_prefetch = 0 : i64, scratch_operands = 2 : i64, tpu.core_type = #tpu.core_type<tc>, window_params = [{transform_indices = @transform_0, window_bounds = array<i64: 98>}, {transform_indices = @transform_1, window_bounds = array<i64: 1, 4, 16, 16>}, {transform_indices = @transform_2, window_bounds = array<i64: 1, 4, 16, 16>}]} {
    %c0_i32 = arith.constant 0 : i32
    %0 = arith.cmpi eq, %arg0, %c0_i32 : i32
    %1 = arith.extui %0 : i1 to i32
    %c0_i32_0 = arith.constant 0 : i32
    %2 = arith.cmpi ne, %1, %c0_i32_0 : i32
    scf.if %2 {
      %cst_205 = arith.constant 0.000000e+00 : f32
      %511 = vector.broadcast %cst_205 : f32 to vector<32x272xf32>
      %c0_206 = arith.constant 0 : index
      %c0_207 = arith.constant 0 : index
      %512 = vector.load %arg4[%c0_206, %c0_207] : memref<32x272xf32, #tpu.memory_space<vmem>>, vector<32x272xf32>
      tpu.vector_store %arg4[%c0_206, %c0_207], %511 {strides = array<i32>} : memref<32x272xf32, #tpu.memory_space<vmem>>, vector<32x272xf32>,
      %cst_208 = arith.constant 0.000000e+00 : f32
      %513 = vector.broadcast %cst_208 : f32 to vector<32x272xf32>
      %c0_209 = arith.constant 0 : index
      %c0_210 = arith.constant 0 : index
      %514 = vector.load %arg5[%c0_209, %c0_210] : memref<32x272xf32, #tpu.memory_space<vmem>>, vector<32x272xf32>
      tpu.vector_store %arg5[%c0_209, %c0_210], %513 {strides = array<i32>} : memref<32x272xf32, #tpu.memory_space<vmem>>, vector<32x272xf32>,
    } else {
    }
    %c0 = arith.constant 0 : index
    %c0_1 = arith.constant 0 : index
    %c0_2 = arith.constant 0 : index
    %c0_3 = arith.constant 0 : index
    %3 = vector.load %arg2[%c0, %c0_1, %c0_2, %c0_3] : memref<1x4x16x16xf32, #tpu.memory_space<vmem>>, vector<1x4x16x16xf32>
    %4 = vector.shape_cast %3 : vector<1x4x16x16xf32> to vector<4x16x16xf32>
    %cst = arith.constant dense<0xFF800000> : vector<16x16xf32>
    %5 = vector.multi_reduction <maximumf>, %4, %cst [0] : vector<4x16x16xf32> to vector<16x16xf32>
    %c8 = arith.constant 8 : index
    %c128 = arith.constant 128 : index
    %6 = vector.load %arg4[%c8, %c128] : memref<32x272xf32, #tpu.memory_space<vmem>>, vector<16x16xf32>
    tpu.vector_store %arg4[%c8, %c128], %5 {strides = array<i32>} : memref<32x272xf32, #tpu.memory_space<vmem>>, vector<16x16xf32>,
    %cst_4 = arith.constant dense<0.000000e+00> : vector<16x16xf32>
    %7 = vector.multi_reduction <add>, %4, %cst_4 [0] : vector<4x16x16xf32> to vector<16x16xf32>
    %c8_5 = arith.constant 8 : index
    %c128_6 = arith.constant 128 : index
    %8 = vector.load %arg5[%c8_5, %c128_6] : memref<32x272xf32, #tpu.memory_space<vmem>>, vector<16x16xf32>
    tpu.vector_store %arg5[%c8_5, %c128_6], %7 {strides = array<i32>} : memref<32x272xf32, #tpu.memory_space<vmem>>, vector<16x16xf32>,
    %cst_7 = arith.constant 0.000000e+00 : f32
    %9 = vector.broadcast %cst_7 : f32 to vector<16x16xf32>
    %c0_8 = arith.constant 0 : index
    %10 = memref.load %arg1[%c0_8] : memref<98xf32, #tpu.memory_space<smem>>
    %c5 = arith.constant 5 : index
    %c125 = arith.constant 125 : index
    %11 = vector.load %arg4[%c5, %c125] : memref<32x272xf32, #tpu.memory_space<vmem>>, vector<16x16xf32>
    %12 = vector.broadcast %10 : f32 to vector<16x16xf32>
    %13 = arith.mulf %12, %11 : vector<16x16xf32>
    %14 = arith.addf %9, %13 : vector<16x16xf32>
    %c1 = arith.constant 1 : index
    %15 = memref.load %arg1[%c1] : memref<98xf32, #tpu.memory_space<smem>>
    %c5_9 = arith.constant 5 : index
    %c126 = arith.constant 126 : index
    %16 = vector.load %arg4[%c5_9, %c126] : memref<32x272xf32, #tpu.memory_space<vmem>>, vector<16x16xf32>
    %17 = vector.broadcast %15 : f32 to vector<16x16xf32>
    %18 = arith.mulf %17, %16 : vector<16x16xf32>
    %19 = arith.addf %14, %18 : vector<16x16xf32>
    %c2 = arith.constant 2 : index
    %20 = memref.load %arg1[%c2] : memref<98xf32, #tpu.memory_space<smem>>
    %c5_10 = arith.constant 5 : index
    %c127 = arith.constant 127 : index
    %21 = vector.load %arg4[%c5_10, %c127] : memref<32x272xf32, #tpu.memory_space<vmem>>, vector<16x16xf32>
    %22 = vector.broadcast %20 : f32 to vector<16x16xf32>
    %23 = arith.mulf %22, %21 : vector<16x16xf32>
    %24 = arith.addf %19, %23 : vector<16x16xf32>
    %c3 = arith.constant 3 : index
    %25 = memref.load %arg1[%c3] : memref<98xf32, #tpu.memory_space<smem>>
    %c5_11 = arith.constant 5 : index
    %c128_12 = arith.constant 128 : index
    %26 = vector.load %arg4[%c5_11, %c128_12] : memref<32x272xf32, #tpu.memory_space<vmem>>, vector<16x16xf32>
    %27 = vector.broadcast %25 : f32 to vector<16x16xf32>
    %28 = arith.mulf %27, %26 : vector<16x16xf32>
    %29 = arith.addf %24, %28 : vector<16x16xf32>
    %c4 = arith.constant 4 : index
    %30 = memref.load %arg1[%c4] : memref<98xf32, #tpu.memory_space<smem>>
    %c5_13 = arith.constant 5 : index
    %c129 = arith.constant 129 : index
    %31 = vector.load %arg4[%c5_13, %c129] : memref<32x272xf32, #tpu.memory_space<vmem>>, vector<16x16xf32>
    %32 = vector.broadcast %30 : f32 to vector<16x16xf32>
    %33 = arith.mulf %32, %31 : vector<16x16xf32>
    %34 = arith.addf %29, %33 : vector<16x16xf32>
    %c5_14 = arith.constant 5 : index
    %35 = memref.load %arg1[%c5_14] : memref<98xf32, #tpu.memory_space<smem>>
    %c5_15 = arith.constant 5 : index
    %c130 = arith.constant 130 : index
    %36 = vector.load %arg4[%c5_15, %c130] : memref<32x272xf32, #tpu.memory_space<vmem>>, vector<16x16xf32>
    %37 = vector.broadcast %35 : f32 to vector<16x16xf32>
    %38 = arith.mulf %37, %36 : vector<16x16xf32>
    %39 = arith.addf %34, %38 : vector<16x16xf32>
    %c6 = arith.constant 6 : index
    %40 = memref.load %arg1[%c6] : memref<98xf32, #tpu.memory_space<smem>>
    %c5_16 = arith.constant 5 : index
    %c131 = arith.constant 131 : index
    %41 = vector.load %arg4[%c5_16, %c131] : memref<32x272xf32, #tpu.memory_space<vmem>>, vector<16x16xf32>
    %42 = vector.broadcast %40 : f32 to vector<16x16xf32>
    %43 = arith.mulf %42, %41 : vector<16x16xf32>
    %44 = arith.addf %39, %43 : vector<16x16xf32>
    %c7 = arith.constant 7 : index
    %45 = memref.load %arg1[%c7] : memref<98xf32, #tpu.memory_space<smem>>
    %c6_17 = arith.constant 6 : index
    %c125_18 = arith.constant 125 : index
    %46 = vector.load %arg4[%c6_17, %c125_18] : memref<32x272xf32, #tpu.memory_space<vmem>>, vector<16x16xf32>
    %47 = vector.broadcast %45 : f32 to vector<16x16xf32>
    %48 = arith.mulf %47, %46 : vector<16x16xf32>
    %49 = arith.addf %44, %48 : vector<16x16xf32>
    %c8_19 = arith.constant 8 : index
    %50 = memref.load %arg1[%c8_19] : memref<98xf32, #tpu.memory_space<smem>>
    %c6_20 = arith.constant 6 : index
    %c126_21 = arith.constant 126 : index
    %51 = vector.load %arg4[%c6_20, %c126_21] : memref<32x272xf32, #tpu.memory_space<vmem>>, vector<16x16xf32>
    %52 = vector.broadcast %50 : f32 to vector<16x16xf32>
    %53 = arith.mulf %52, %51 : vector<16x16xf32>
    %54 = arith.addf %49, %53 : vector<16x16xf32>
    %c9 = arith.constant 9 : index
    %55 = memref.load %arg1[%c9] : memref<98xf32, #tpu.memory_space<smem>>
    %c6_22 = arith.constant 6 : index
    %c127_23 = arith.constant 127 : index
    %56 = vector.load %arg4[%c6_22, %c127_23] : memref<32x272xf32, #tpu.memory_space<vmem>>, vector<16x16xf32>
    %57 = vector.broadcast %55 : f32 to vector<16x16xf32>
    %58 = arith.mulf %57, %56 : vector<16x16xf32>
    %59 = arith.addf %54, %58 : vector<16x16xf32>
    %c10 = arith.constant 10 : index
    %60 = memref.load %arg1[%c10] : memref<98xf32, #tpu.memory_space<smem>>
    %c6_24 = arith.constant 6 : index
    %c128_25 = arith.constant 128 : index
    %61 = vector.load %arg4[%c6_24, %c128_25] : memref<32x272xf32, #tpu.memory_space<vmem>>, vector<16x16xf32>
    %62 = vector.broadcast %60 : f32 to vector<16x16xf32>
    %63 = arith.mulf %62, %61 : vector<16x16xf32>
    %64 = arith.addf %59, %63 : vector<16x16xf32>
    %c11 = arith.constant 11 : index
    %65 = memref.load %arg1[%c11] : memref<98xf32, #tpu.memory_space<smem>>
    %c6_26 = arith.constant 6 : index
    %c129_27 = arith.constant 129 : index
    %66 = vector.load %arg4[%c6_26, %c129_27] : memref<32x272xf32, #tpu.memory_space<vmem>>, vector<16x16xf32>
    %67 = vector.broadcast %65 : f32 to vector<16x16xf32>
    %68 = arith.mulf %67, %66 : vector<16x16xf32>
    %69 = arith.addf %64, %68 : vector<16x16xf32>
    %c12 = arith.constant 12 : index
    %70 = memref.load %arg1[%c12] : memref<98xf32, #tpu.memory_space<smem>>
    %c6_28 = arith.constant 6 : index
    %c130_29 = arith.constant 130 : index
    %71 = vector.load %arg4[%c6_28, %c130_29] : memref<32x272xf32, #tpu.memory_space<vmem>>, vector<16x16xf32>
    %72 = vector.broadcast %70 : f32 to vector<16x16xf32>
    %73 = arith.mulf %72, %71 : vector<16x16xf32>
    %74 = arith.addf %69, %73 : vector<16x16xf32>
    %c13 = arith.constant 13 : index
    %75 = memref.load %arg1[%c13] : memref<98xf32, #tpu.memory_space<smem>>
    %c6_30 = arith.constant 6 : index
    %c131_31 = arith.constant 131 : index
    %76 = vector.load %arg4[%c6_30, %c131_31] : memref<32x272xf32, #tpu.memory_space<vmem>>, vector<16x16xf32>
    %77 = vector.broadcast %75 : f32 to vector<16x16xf32>
    %78 = arith.mulf %77, %76 : vector<16x16xf32>
    %79 = arith.addf %74, %78 : vector<16x16xf32>
    %c14 = arith.constant 14 : index
    %80 = memref.load %arg1[%c14] : memref<98xf32, #tpu.memory_space<smem>>
    %c7_32 = arith.constant 7 : index
    %c125_33 = arith.constant 125 : index
    %81 = vector.load %arg4[%c7_32, %c125_33] : memref<32x272xf32, #tpu.memory_space<vmem>>, vector<16x16xf32>
    %82 = vector.broadcast %80 : f32 to vector<16x16xf32>
    %83 = arith.mulf %82, %81 : vector<16x16xf32>
    %84 = arith.addf %79, %83 : vector<16x16xf32>
    %c15 = arith.constant 15 : index
    %85 = memref.load %arg1[%c15] : memref<98xf32, #tpu.memory_space<smem>>
    %c7_34 = arith.constant 7 : index
    %c126_35 = arith.constant 126 : index
    %86 = vector.load %arg4[%c7_34, %c126_35] : memref<32x272xf32, #tpu.memory_space<vmem>>, vector<16x16xf32>
    %87 = vector.broadcast %85 : f32 to vector<16x16xf32>
    %88 = arith.mulf %87, %86 : vector<16x16xf32>
    %89 = arith.addf %84, %88 : vector<16x16xf32>
    %c16 = arith.constant 16 : index
    %90 = memref.load %arg1[%c16] : memref<98xf32, #tpu.memory_space<smem>>
    %c7_36 = arith.constant 7 : index
    %c127_37 = arith.constant 127 : index
    %91 = vector.load %arg4[%c7_36, %c127_37] : memref<32x272xf32, #tpu.memory_space<vmem>>, vector<16x16xf32>
    %92 = vector.broadcast %90 : f32 to vector<16x16xf32>
    %93 = arith.mulf %92, %91 : vector<16x16xf32>
    %94 = arith.addf %89, %93 : vector<16x16xf32>
    %c17 = arith.constant 17 : index
    %95 = memref.load %arg1[%c17] : memref<98xf32, #tpu.memory_space<smem>>
    %c7_38 = arith.constant 7 : index
    %c128_39 = arith.constant 128 : index
    %96 = vector.load %arg4[%c7_38, %c128_39] : memref<32x272xf32, #tpu.memory_space<vmem>>, vector<16x16xf32>
    %97 = vector.broadcast %95 : f32 to vector<16x16xf32>
    %98 = arith.mulf %97, %96 : vector<16x16xf32>
    %99 = arith.addf %94, %98 : vector<16x16xf32>
    %c18 = arith.constant 18 : index
    %100 = memref.load %arg1[%c18] : memref<98xf32, #tpu.memory_space<smem>>
    %c7_40 = arith.constant 7 : index
    %c129_41 = arith.constant 129 : index
    %101 = vector.load %arg4[%c7_40, %c129_41] : memref<32x272xf32, #tpu.memory_space<vmem>>, vector<16x16xf32>
    %102 = vector.broadcast %100 : f32 to vector<16x16xf32>
    %103 = arith.mulf %102, %101 : vector<16x16xf32>
    %104 = arith.addf %99, %103 : vector<16x16xf32>
    %c19 = arith.constant 19 : index
    %105 = memref.load %arg1[%c19] : memref<98xf32, #tpu.memory_space<smem>>
    %c7_42 = arith.constant 7 : index
    %c130_43 = arith.constant 130 : index
    %106 = vector.load %arg4[%c7_42, %c130_43] : memref<32x272xf32, #tpu.memory_space<vmem>>, vector<16x16xf32>
    %107 = vector.broadcast %105 : f32 to vector<16x16xf32>
    %108 = arith.mulf %107, %106 : vector<16x16xf32>
    %109 = arith.addf %104, %108 : vector<16x16xf32>
    %c20 = arith.constant 20 : index
    %110 = memref.load %arg1[%c20] : memref<98xf32, #tpu.memory_space<smem>>
    %c7_44 = arith.constant 7 : index
    %c131_45 = arith.constant 131 : index
    %111 = vector.load %arg4[%c7_44, %c131_45] : memref<32x272xf32, #tpu.memory_space<vmem>>, vector<16x16xf32>
    %112 = vector.broadcast %110 : f32 to vector<16x16xf32>
    %113 = arith.mulf %112, %111 : vector<16x16xf32>
    %114 = arith.addf %109, %113 : vector<16x16xf32>
    %c21 = arith.constant 21 : index
    %115 = memref.load %arg1[%c21] : memref<98xf32, #tpu.memory_space<smem>>
    %c8_46 = arith.constant 8 : index
    %c125_47 = arith.constant 125 : index
    %116 = vector.load %arg4[%c8_46, %c125_47] : memref<32x272xf32, #tpu.memory_space<vmem>>, vector<16x16xf32>
    %117 = vector.broadcast %115 : f32 to vector<16x16xf32>
    %118 = arith.mulf %117, %116 : vector<16x16xf32>
    %119 = arith.addf %114, %118 : vector<16x16xf32>
    %c22 = arith.constant 22 : index
    %120 = memref.load %arg1[%c22] : memref<98xf32, #tpu.memory_space<smem>>
    %c8_48 = arith.constant 8 : index
    %c126_49 = arith.constant 126 : index
    %121 = vector.load %arg4[%c8_48, %c126_49] : memref<32x272xf32, #tpu.memory_space<vmem>>, vector<16x16xf32>
    %122 = vector.broadcast %120 : f32 to vector<16x16xf32>
    %123 = arith.mulf %122, %121 : vector<16x16xf32>
    %124 = arith.addf %119, %123 : vector<16x16xf32>
    %c23 = arith.constant 23 : index
    %125 = memref.load %arg1[%c23] : memref<98xf32, #tpu.memory_space<smem>>
    %c8_50 = arith.constant 8 : index
    %c127_51 = arith.constant 127 : index
    %126 = vector.load %arg4[%c8_50, %c127_51] : memref<32x272xf32, #tpu.memory_space<vmem>>, vector<16x16xf32>
    %127 = vector.broadcast %125 : f32 to vector<16x16xf32>
    %128 = arith.mulf %127, %126 : vector<16x16xf32>
    %129 = arith.addf %124, %128 : vector<16x16xf32>
    %c24 = arith.constant 24 : index
    %130 = memref.load %arg1[%c24] : memref<98xf32, #tpu.memory_space<smem>>
    %c8_52 = arith.constant 8 : index
    %c128_53 = arith.constant 128 : index
    %131 = vector.load %arg4[%c8_52, %c128_53] : memref<32x272xf32, #tpu.memory_space<vmem>>, vector<16x16xf32>
    %132 = vector.broadcast %130 : f32 to vector<16x16xf32>
    %133 = arith.mulf %132, %131 : vector<16x16xf32>
    %134 = arith.addf %129, %133 : vector<16x16xf32>
    %c25 = arith.constant 25 : index
    %135 = memref.load %arg1[%c25] : memref<98xf32, #tpu.memory_space<smem>>
    %c8_54 = arith.constant 8 : index
    %c129_55 = arith.constant 129 : index
    %136 = vector.load %arg4[%c8_54, %c129_55] : memref<32x272xf32, #tpu.memory_space<vmem>>, vector<16x16xf32>
    %137 = vector.broadcast %135 : f32 to vector<16x16xf32>
    %138 = arith.mulf %137, %136 : vector<16x16xf32>
    %139 = arith.addf %134, %138 : vector<16x16xf32>
    %c26 = arith.constant 26 : index
    %140 = memref.load %arg1[%c26] : memref<98xf32, #tpu.memory_space<smem>>
    %c8_56 = arith.constant 8 : index
    %c130_57 = arith.constant 130 : index
    %141 = vector.load %arg4[%c8_56, %c130_57] : memref<32x272xf32, #tpu.memory_space<vmem>>, vector<16x16xf32>
    %142 = vector.broadcast %140 : f32 to vector<16x16xf32>
    %143 = arith.mulf %142, %141 : vector<16x16xf32>
    %144 = arith.addf %139, %143 : vector<16x16xf32>
    %c27 = arith.constant 27 : index
    %145 = memref.load %arg1[%c27] : memref<98xf32, #tpu.memory_space<smem>>
    %c8_58 = arith.constant 8 : index
    %c131_59 = arith.constant 131 : index
    %146 = vector.load %arg4[%c8_58, %c131_59] : memref<32x272xf32, #tpu.memory_space<vmem>>, vector<16x16xf32>
    %147 = vector.broadcast %145 : f32 to vector<16x16xf32>
    %148 = arith.mulf %147, %146 : vector<16x16xf32>
    %149 = arith.addf %144, %148 : vector<16x16xf32>
    %c28 = arith.constant 28 : index
    %150 = memref.load %arg1[%c28] : memref<98xf32, #tpu.memory_space<smem>>
    %c9_60 = arith.constant 9 : index
    %c125_61 = arith.constant 125 : index
    %151 = vector.load %arg4[%c9_60, %c125_61] : memref<32x272xf32, #tpu.memory_space<vmem>>, vector<16x16xf32>
    %152 = vector.broadcast %150 : f32 to vector<16x16xf32>
    %153 = arith.mulf %152, %151 : vector<16x16xf32>
    %154 = arith.addf %149, %153 : vector<16x16xf32>
    %c29 = arith.constant 29 : index
    %155 = memref.load %arg1[%c29] : memref<98xf32, #tpu.memory_space<smem>>
    %c9_62 = arith.constant 9 : index
    %c126_63 = arith.constant 126 : index
    %156 = vector.load %arg4[%c9_62, %c126_63] : memref<32x272xf32, #tpu.memory_space<vmem>>, vector<16x16xf32>
    %157 = vector.broadcast %155 : f32 to vector<16x16xf32>
    %158 = arith.mulf %157, %156 : vector<16x16xf32>
    %159 = arith.addf %154, %158 : vector<16x16xf32>
    %c30 = arith.constant 30 : index
    %160 = memref.load %arg1[%c30] : memref<98xf32, #tpu.memory_space<smem>>
    %c9_64 = arith.constant 9 : index
    %c127_65 = arith.constant 127 : index
    %161 = vector.load %arg4[%c9_64, %c127_65] : memref<32x272xf32, #tpu.memory_space<vmem>>, vector<16x16xf32>
    %162 = vector.broadcast %160 : f32 to vector<16x16xf32>
    %163 = arith.mulf %162, %161 : vector<16x16xf32>
    %164 = arith.addf %159, %163 : vector<16x16xf32>
    %c31 = arith.constant 31 : index
    %165 = memref.load %arg1[%c31] : memref<98xf32, #tpu.memory_space<smem>>
    %c9_66 = arith.constant 9 : index
    %c128_67 = arith.constant 128 : index
    %166 = vector.load %arg4[%c9_66, %c128_67] : memref<32x272xf32, #tpu.memory_space<vmem>>, vector<16x16xf32>
    %167 = vector.broadcast %165 : f32 to vector<16x16xf32>
    %168 = arith.mulf %167, %166 : vector<16x16xf32>
    %169 = arith.addf %164, %168 : vector<16x16xf32>
    %c32 = arith.constant 32 : index
    %170 = memref.load %arg1[%c32] : memref<98xf32, #tpu.memory_space<smem>>
    %c9_68 = arith.constant 9 : index
    %c129_69 = arith.constant 129 : index
    %171 = vector.load %arg4[%c9_68, %c129_69] : memref<32x272xf32, #tpu.memory_space<vmem>>, vector<16x16xf32>
    %172 = vector.broadcast %170 : f32 to vector<16x16xf32>
    %173 = arith.mulf %172, %171 : vector<16x16xf32>
    %174 = arith.addf %169, %173 : vector<16x16xf32>
    %c33 = arith.constant 33 : index
    %175 = memref.load %arg1[%c33] : memref<98xf32, #tpu.memory_space<smem>>
    %c9_70 = arith.constant 9 : index
    %c130_71 = arith.constant 130 : index
    %176 = vector.load %arg4[%c9_70, %c130_71] : memref<32x272xf32, #tpu.memory_space<vmem>>, vector<16x16xf32>
    %177 = vector.broadcast %175 : f32 to vector<16x16xf32>
    %178 = arith.mulf %177, %176 : vector<16x16xf32>
    %179 = arith.addf %174, %178 : vector<16x16xf32>
    %c34 = arith.constant 34 : index
    %180 = memref.load %arg1[%c34] : memref<98xf32, #tpu.memory_space<smem>>
    %c9_72 = arith.constant 9 : index
    %c131_73 = arith.constant 131 : index
    %181 = vector.load %arg4[%c9_72, %c131_73] : memref<32x272xf32, #tpu.memory_space<vmem>>, vector<16x16xf32>
    %182 = vector.broadcast %180 : f32 to vector<16x16xf32>
    %183 = arith.mulf %182, %181 : vector<16x16xf32>
    %184 = arith.addf %179, %183 : vector<16x16xf32>
    %c35 = arith.constant 35 : index
    %185 = memref.load %arg1[%c35] : memref<98xf32, #tpu.memory_space<smem>>
    %c10_74 = arith.constant 10 : index
    %c125_75 = arith.constant 125 : index
    %186 = vector.load %arg4[%c10_74, %c125_75] : memref<32x272xf32, #tpu.memory_space<vmem>>, vector<16x16xf32>
    %187 = vector.broadcast %185 : f32 to vector<16x16xf32>
    %188 = arith.mulf %187, %186 : vector<16x16xf32>
    %189 = arith.addf %184, %188 : vector<16x16xf32>
    %c36 = arith.constant 36 : index
    %190 = memref.load %arg1[%c36] : memref<98xf32, #tpu.memory_space<smem>>
    %c10_76 = arith.constant 10 : index
    %c126_77 = arith.constant 126 : index
    %191 = vector.load %arg4[%c10_76, %c126_77] : memref<32x272xf32, #tpu.memory_space<vmem>>, vector<16x16xf32>
    %192 = vector.broadcast %190 : f32 to vector<16x16xf32>
    %193 = arith.mulf %192, %191 : vector<16x16xf32>
    %194 = arith.addf %189, %193 : vector<16x16xf32>
    %c37 = arith.constant 37 : index
    %195 = memref.load %arg1[%c37] : memref<98xf32, #tpu.memory_space<smem>>
    %c10_78 = arith.constant 10 : index
    %c127_79 = arith.constant 127 : index
    %196 = vector.load %arg4[%c10_78, %c127_79] : memref<32x272xf32, #tpu.memory_space<vmem>>, vector<16x16xf32>
    %197 = vector.broadcast %195 : f32 to vector<16x16xf32>
    %198 = arith.mulf %197, %196 : vector<16x16xf32>
    %199 = arith.addf %194, %198 : vector<16x16xf32>
    %c38 = arith.constant 38 : index
    %200 = memref.load %arg1[%c38] : memref<98xf32, #tpu.memory_space<smem>>
    %c10_80 = arith.constant 10 : index
    %c128_81 = arith.constant 128 : index
    %201 = vector.load %arg4[%c10_80, %c128_81] : memref<32x272xf32, #tpu.memory_space<vmem>>, vector<16x16xf32>
    %202 = vector.broadcast %200 : f32 to vector<16x16xf32>
    %203 = arith.mulf %202, %201 : vector<16x16xf32>
    %204 = arith.addf %199, %203 : vector<16x16xf32>
    %c39 = arith.constant 39 : index
    %205 = memref.load %arg1[%c39] : memref<98xf32, #tpu.memory_space<smem>>
    %c10_82 = arith.constant 10 : index
    %c129_83 = arith.constant 129 : index
    %206 = vector.load %arg4[%c10_82, %c129_83] : memref<32x272xf32, #tpu.memory_space<vmem>>, vector<16x16xf32>
    %207 = vector.broadcast %205 : f32 to vector<16x16xf32>
    %208 = arith.mulf %207, %206 : vector<16x16xf32>
    %209 = arith.addf %204, %208 : vector<16x16xf32>
    %c40 = arith.constant 40 : index
    %210 = memref.load %arg1[%c40] : memref<98xf32, #tpu.memory_space<smem>>
    %c10_84 = arith.constant 10 : index
    %c130_85 = arith.constant 130 : index
    %211 = vector.load %arg4[%c10_84, %c130_85] : memref<32x272xf32, #tpu.memory_space<vmem>>, vector<16x16xf32>
    %212 = vector.broadcast %210 : f32 to vector<16x16xf32>
    %213 = arith.mulf %212, %211 : vector<16x16xf32>
    %214 = arith.addf %209, %213 : vector<16x16xf32>
    %c41 = arith.constant 41 : index
    %215 = memref.load %arg1[%c41] : memref<98xf32, #tpu.memory_space<smem>>
    %c10_86 = arith.constant 10 : index
    %c131_87 = arith.constant 131 : index
    %216 = vector.load %arg4[%c10_86, %c131_87] : memref<32x272xf32, #tpu.memory_space<vmem>>, vector<16x16xf32>
    %217 = vector.broadcast %215 : f32 to vector<16x16xf32>
    %218 = arith.mulf %217, %216 : vector<16x16xf32>
    %219 = arith.addf %214, %218 : vector<16x16xf32>
    %c42 = arith.constant 42 : index
    %220 = memref.load %arg1[%c42] : memref<98xf32, #tpu.memory_space<smem>>
    %c11_88 = arith.constant 11 : index
    %c125_89 = arith.constant 125 : index
    %221 = vector.load %arg4[%c11_88, %c125_89] : memref<32x272xf32, #tpu.memory_space<vmem>>, vector<16x16xf32>
    %222 = vector.broadcast %220 : f32 to vector<16x16xf32>
    %223 = arith.mulf %222, %221 : vector<16x16xf32>
    %224 = arith.addf %219, %223 : vector<16x16xf32>
    %c43 = arith.constant 43 : index
    %225 = memref.load %arg1[%c43] : memref<98xf32, #tpu.memory_space<smem>>
    %c11_90 = arith.constant 11 : index
    %c126_91 = arith.constant 126 : index
    %226 = vector.load %arg4[%c11_90, %c126_91] : memref<32x272xf32, #tpu.memory_space<vmem>>, vector<16x16xf32>
    %227 = vector.broadcast %225 : f32 to vector<16x16xf32>
    %228 = arith.mulf %227, %226 : vector<16x16xf32>
    %229 = arith.addf %224, %228 : vector<16x16xf32>
    %c44 = arith.constant 44 : index
    %230 = memref.load %arg1[%c44] : memref<98xf32, #tpu.memory_space<smem>>
    %c11_92 = arith.constant 11 : index
    %c127_93 = arith.constant 127 : index
    %231 = vector.load %arg4[%c11_92, %c127_93] : memref<32x272xf32, #tpu.memory_space<vmem>>, vector<16x16xf32>
    %232 = vector.broadcast %230 : f32 to vector<16x16xf32>
    %233 = arith.mulf %232, %231 : vector<16x16xf32>
    %234 = arith.addf %229, %233 : vector<16x16xf32>
    %c45 = arith.constant 45 : index
    %235 = memref.load %arg1[%c45] : memref<98xf32, #tpu.memory_space<smem>>
    %c11_94 = arith.constant 11 : index
    %c128_95 = arith.constant 128 : index
    %236 = vector.load %arg4[%c11_94, %c128_95] : memref<32x272xf32, #tpu.memory_space<vmem>>, vector<16x16xf32>
    %237 = vector.broadcast %235 : f32 to vector<16x16xf32>
    %238 = arith.mulf %237, %236 : vector<16x16xf32>
    %239 = arith.addf %234, %238 : vector<16x16xf32>
    %c46 = arith.constant 46 : index
    %240 = memref.load %arg1[%c46] : memref<98xf32, #tpu.memory_space<smem>>
    %c11_96 = arith.constant 11 : index
    %c129_97 = arith.constant 129 : index
    %241 = vector.load %arg4[%c11_96, %c129_97] : memref<32x272xf32, #tpu.memory_space<vmem>>, vector<16x16xf32>
    %242 = vector.broadcast %240 : f32 to vector<16x16xf32>
    %243 = arith.mulf %242, %241 : vector<16x16xf32>
    %244 = arith.addf %239, %243 : vector<16x16xf32>
    %c47 = arith.constant 47 : index
    %245 = memref.load %arg1[%c47] : memref<98xf32, #tpu.memory_space<smem>>
    %c11_98 = arith.constant 11 : index
    %c130_99 = arith.constant 130 : index
    %246 = vector.load %arg4[%c11_98, %c130_99] : memref<32x272xf32, #tpu.memory_space<vmem>>, vector<16x16xf32>
    %247 = vector.broadcast %245 : f32 to vector<16x16xf32>
    %248 = arith.mulf %247, %246 : vector<16x16xf32>
    %249 = arith.addf %244, %248 : vector<16x16xf32>
    %c48 = arith.constant 48 : index
    %250 = memref.load %arg1[%c48] : memref<98xf32, #tpu.memory_space<smem>>
    %c11_100 = arith.constant 11 : index
    %c131_101 = arith.constant 131 : index
    %251 = vector.load %arg4[%c11_100, %c131_101] : memref<32x272xf32, #tpu.memory_space<vmem>>, vector<16x16xf32>
    %252 = vector.broadcast %250 : f32 to vector<16x16xf32>
    %253 = arith.mulf %252, %251 : vector<16x16xf32>
    %254 = arith.addf %249, %253 : vector<16x16xf32>
    %c49 = arith.constant 49 : index
    %255 = memref.load %arg1[%c49] : memref<98xf32, #tpu.memory_space<smem>>
    %c5_102 = arith.constant 5 : index
    %c125_103 = arith.constant 125 : index
    %256 = vector.load %arg5[%c5_102, %c125_103] : memref<32x272xf32, #tpu.memory_space<vmem>>, vector<16x16xf32>
    %257 = vector.broadcast %255 : f32 to vector<16x16xf32>
    %258 = arith.mulf %257, %256 : vector<16x16xf32>
    %259 = arith.addf %254, %258 : vector<16x16xf32>
    %c50 = arith.constant 50 : index
    %260 = memref.load %arg1[%c50] : memref<98xf32, #tpu.memory_space<smem>>
    %c5_104 = arith.constant 5 : index
    %c126_105 = arith.constant 126 : index
    %261 = vector.load %arg5[%c5_104, %c126_105] : memref<32x272xf32, #tpu.memory_space<vmem>>, vector<16x16xf32>
    %262 = vector.broadcast %260 : f32 to vector<16x16xf32>
    %263 = arith.mulf %262, %261 : vector<16x16xf32>
    %264 = arith.addf %259, %263 : vector<16x16xf32>
    %c51 = arith.constant 51 : index
    %265 = memref.load %arg1[%c51] : memref<98xf32, #tpu.memory_space<smem>>
    %c5_106 = arith.constant 5 : index
    %c127_107 = arith.constant 127 : index
    %266 = vector.load %arg5[%c5_106, %c127_107] : memref<32x272xf32, #tpu.memory_space<vmem>>, vector<16x16xf32>
    %267 = vector.broadcast %265 : f32 to vector<16x16xf32>
    %268 = arith.mulf %267, %266 : vector<16x16xf32>
    %269 = arith.addf %264, %268 : vector<16x16xf32>
    %c52 = arith.constant 52 : index
    %270 = memref.load %arg1[%c52] : memref<98xf32, #tpu.memory_space<smem>>
    %c5_108 = arith.constant 5 : index
    %c128_109 = arith.constant 128 : index
    %271 = vector.load %arg5[%c5_108, %c128_109] : memref<32x272xf32, #tpu.memory_space<vmem>>, vector<16x16xf32>
    %272 = vector.broadcast %270 : f32 to vector<16x16xf32>
    %273 = arith.mulf %272, %271 : vector<16x16xf32>
    %274 = arith.addf %269, %273 : vector<16x16xf32>
    %c53 = arith.constant 53 : index
    %275 = memref.load %arg1[%c53] : memref<98xf32, #tpu.memory_space<smem>>
    %c5_110 = arith.constant 5 : index
    %c129_111 = arith.constant 129 : index
    %276 = vector.load %arg5[%c5_110, %c129_111] : memref<32x272xf32, #tpu.memory_space<vmem>>, vector<16x16xf32>
    %277 = vector.broadcast %275 : f32 to vector<16x16xf32>
    %278 = arith.mulf %277, %276 : vector<16x16xf32>
    %279 = arith.addf %274, %278 : vector<16x16xf32>
    %c54 = arith.constant 54 : index
    %280 = memref.load %arg1[%c54] : memref<98xf32, #tpu.memory_space<smem>>
    %c5_112 = arith.constant 5 : index
    %c130_113 = arith.constant 130 : index
    %281 = vector.load %arg5[%c5_112, %c130_113] : memref<32x272xf32, #tpu.memory_space<vmem>>, vector<16x16xf32>
    %282 = vector.broadcast %280 : f32 to vector<16x16xf32>
    %283 = arith.mulf %282, %281 : vector<16x16xf32>
    %284 = arith.addf %279, %283 : vector<16x16xf32>
    %c55 = arith.constant 55 : index
    %285 = memref.load %arg1[%c55] : memref<98xf32, #tpu.memory_space<smem>>
    %c5_114 = arith.constant 5 : index
    %c131_115 = arith.constant 131 : index
    %286 = vector.load %arg5[%c5_114, %c131_115] : memref<32x272xf32, #tpu.memory_space<vmem>>, vector<16x16xf32>
    %287 = vector.broadcast %285 : f32 to vector<16x16xf32>
    %288 = arith.mulf %287, %286 : vector<16x16xf32>
    %289 = arith.addf %284, %288 : vector<16x16xf32>
    %c56 = arith.constant 56 : index
    %290 = memref.load %arg1[%c56] : memref<98xf32, #tpu.memory_space<smem>>
    %c6_116 = arith.constant 6 : index
    %c125_117 = arith.constant 125 : index
    %291 = vector.load %arg5[%c6_116, %c125_117] : memref<32x272xf32, #tpu.memory_space<vmem>>, vector<16x16xf32>
    %292 = vector.broadcast %290 : f32 to vector<16x16xf32>
    %293 = arith.mulf %292, %291 : vector<16x16xf32>
    %294 = arith.addf %289, %293 : vector<16x16xf32>
    %c57 = arith.constant 57 : index
    %295 = memref.load %arg1[%c57] : memref<98xf32, #tpu.memory_space<smem>>
    %c6_118 = arith.constant 6 : index
    %c126_119 = arith.constant 126 : index
    %296 = vector.load %arg5[%c6_118, %c126_119] : memref<32x272xf32, #tpu.memory_space<vmem>>, vector<16x16xf32>
    %297 = vector.broadcast %295 : f32 to vector<16x16xf32>
    %298 = arith.mulf %297, %296 : vector<16x16xf32>
    %299 = arith.addf %294, %298 : vector<16x16xf32>
    %c58 = arith.constant 58 : index
    %300 = memref.load %arg1[%c58] : memref<98xf32, #tpu.memory_space<smem>>
    %c6_120 = arith.constant 6 : index
    %c127_121 = arith.constant 127 : index
    %301 = vector.load %arg5[%c6_120, %c127_121] : memref<32x272xf32, #tpu.memory_space<vmem>>, vector<16x16xf32>
    %302 = vector.broadcast %300 : f32 to vector<16x16xf32>
    %303 = arith.mulf %302, %301 : vector<16x16xf32>
    %304 = arith.addf %299, %303 : vector<16x16xf32>
    %c59 = arith.constant 59 : index
    %305 = memref.load %arg1[%c59] : memref<98xf32, #tpu.memory_space<smem>>
    %c6_122 = arith.constant 6 : index
    %c128_123 = arith.constant 128 : index
    %306 = vector.load %arg5[%c6_122, %c128_123] : memref<32x272xf32, #tpu.memory_space<vmem>>, vector<16x16xf32>
    %307 = vector.broadcast %305 : f32 to vector<16x16xf32>
    %308 = arith.mulf %307, %306 : vector<16x16xf32>
    %309 = arith.addf %304, %308 : vector<16x16xf32>
    %c60 = arith.constant 60 : index
    %310 = memref.load %arg1[%c60] : memref<98xf32, #tpu.memory_space<smem>>
    %c6_124 = arith.constant 6 : index
    %c129_125 = arith.constant 129 : index
    %311 = vector.load %arg5[%c6_124, %c129_125] : memref<32x272xf32, #tpu.memory_space<vmem>>, vector<16x16xf32>
    %312 = vector.broadcast %310 : f32 to vector<16x16xf32>
    %313 = arith.mulf %312, %311 : vector<16x16xf32>
    %314 = arith.addf %309, %313 : vector<16x16xf32>
    %c61 = arith.constant 61 : index
    %315 = memref.load %arg1[%c61] : memref<98xf32, #tpu.memory_space<smem>>
    %c6_126 = arith.constant 6 : index
    %c130_127 = arith.constant 130 : index
    %316 = vector.load %arg5[%c6_126, %c130_127] : memref<32x272xf32, #tpu.memory_space<vmem>>, vector<16x16xf32>
    %317 = vector.broadcast %315 : f32 to vector<16x16xf32>
    %318 = arith.mulf %317, %316 : vector<16x16xf32>
    %319 = arith.addf %314, %318 : vector<16x16xf32>
    %c62 = arith.constant 62 : index
    %320 = memref.load %arg1[%c62] : memref<98xf32, #tpu.memory_space<smem>>
    %c6_128 = arith.constant 6 : index
    %c131_129 = arith.constant 131 : index
    %321 = vector.load %arg5[%c6_128, %c131_129] : memref<32x272xf32, #tpu.memory_space<vmem>>, vector<16x16xf32>
    %322 = vector.broadcast %320 : f32 to vector<16x16xf32>
    %323 = arith.mulf %322, %321 : vector<16x16xf32>
    %324 = arith.addf %319, %323 : vector<16x16xf32>
    %c63 = arith.constant 63 : index
    %325 = memref.load %arg1[%c63] : memref<98xf32, #tpu.memory_space<smem>>
    %c7_130 = arith.constant 7 : index
    %c125_131 = arith.constant 125 : index
    %326 = vector.load %arg5[%c7_130, %c125_131] : memref<32x272xf32, #tpu.memory_space<vmem>>, vector<16x16xf32>
    %327 = vector.broadcast %325 : f32 to vector<16x16xf32>
    %328 = arith.mulf %327, %326 : vector<16x16xf32>
    %329 = arith.addf %324, %328 : vector<16x16xf32>
    %c64 = arith.constant 64 : index
    %330 = memref.load %arg1[%c64] : memref<98xf32, #tpu.memory_space<smem>>
    %c7_132 = arith.constant 7 : index
    %c126_133 = arith.constant 126 : index
    %331 = vector.load %arg5[%c7_132, %c126_133] : memref<32x272xf32, #tpu.memory_space<vmem>>, vector<16x16xf32>
    %332 = vector.broadcast %330 : f32 to vector<16x16xf32>
    %333 = arith.mulf %332, %331 : vector<16x16xf32>
    %334 = arith.addf %329, %333 : vector<16x16xf32>
    %c65 = arith.constant 65 : index
    %335 = memref.load %arg1[%c65] : memref<98xf32, #tpu.memory_space<smem>>
    %c7_134 = arith.constant 7 : index
    %c127_135 = arith.constant 127 : index
    %336 = vector.load %arg5[%c7_134, %c127_135] : memref<32x272xf32, #tpu.memory_space<vmem>>, vector<16x16xf32>
    %337 = vector.broadcast %335 : f32 to vector<16x16xf32>
    %338 = arith.mulf %337, %336 : vector<16x16xf32>
    %339 = arith.addf %334, %338 : vector<16x16xf32>
    %c66 = arith.constant 66 : index
    %340 = memref.load %arg1[%c66] : memref<98xf32, #tpu.memory_space<smem>>
    %c7_136 = arith.constant 7 : index
    %c128_137 = arith.constant 128 : index
    %341 = vector.load %arg5[%c7_136, %c128_137] : memref<32x272xf32, #tpu.memory_space<vmem>>, vector<16x16xf32>
    %342 = vector.broadcast %340 : f32 to vector<16x16xf32>
    %343 = arith.mulf %342, %341 : vector<16x16xf32>
    %344 = arith.addf %339, %343 : vector<16x16xf32>
    %c67 = arith.constant 67 : index
    %345 = memref.load %arg1[%c67] : memref<98xf32, #tpu.memory_space<smem>>
    %c7_138 = arith.constant 7 : index
    %c129_139 = arith.constant 129 : index
    %346 = vector.load %arg5[%c7_138, %c129_139] : memref<32x272xf32, #tpu.memory_space<vmem>>, vector<16x16xf32>
    %347 = vector.broadcast %345 : f32 to vector<16x16xf32>
    %348 = arith.mulf %347, %346 : vector<16x16xf32>
    %349 = arith.addf %344, %348 : vector<16x16xf32>
    %c68 = arith.constant 68 : index
    %350 = memref.load %arg1[%c68] : memref<98xf32, #tpu.memory_space<smem>>
    %c7_140 = arith.constant 7 : index
    %c130_141 = arith.constant 130 : index
    %351 = vector.load %arg5[%c7_140, %c130_141] : memref<32x272xf32, #tpu.memory_space<vmem>>, vector<16x16xf32>
    %352 = vector.broadcast %350 : f32 to vector<16x16xf32>
    %353 = arith.mulf %352, %351 : vector<16x16xf32>
    %354 = arith.addf %349, %353 : vector<16x16xf32>
    %c69 = arith.constant 69 : index
    %355 = memref.load %arg1[%c69] : memref<98xf32, #tpu.memory_space<smem>>
    %c7_142 = arith.constant 7 : index
    %c131_143 = arith.constant 131 : index
    %356 = vector.load %arg5[%c7_142, %c131_143] : memref<32x272xf32, #tpu.memory_space<vmem>>, vector<16x16xf32>
    %357 = vector.broadcast %355 : f32 to vector<16x16xf32>
    %358 = arith.mulf %357, %356 : vector<16x16xf32>
    %359 = arith.addf %354, %358 : vector<16x16xf32>
    %c70 = arith.constant 70 : index
    %360 = memref.load %arg1[%c70] : memref<98xf32, #tpu.memory_space<smem>>
    %c8_144 = arith.constant 8 : index
    %c125_145 = arith.constant 125 : index
    %361 = vector.load %arg5[%c8_144, %c125_145] : memref<32x272xf32, #tpu.memory_space<vmem>>, vector<16x16xf32>
    %362 = vector.broadcast %360 : f32 to vector<16x16xf32>
    %363 = arith.mulf %362, %361 : vector<16x16xf32>
    %364 = arith.addf %359, %363 : vector<16x16xf32>
    %c71 = arith.constant 71 : index
    %365 = memref.load %arg1[%c71] : memref<98xf32, #tpu.memory_space<smem>>
    %c8_146 = arith.constant 8 : index
    %c126_147 = arith.constant 126 : index
    %366 = vector.load %arg5[%c8_146, %c126_147] : memref<32x272xf32, #tpu.memory_space<vmem>>, vector<16x16xf32>
    %367 = vector.broadcast %365 : f32 to vector<16x16xf32>
    %368 = arith.mulf %367, %366 : vector<16x16xf32>
    %369 = arith.addf %364, %368 : vector<16x16xf32>
    %c72 = arith.constant 72 : index
    %370 = memref.load %arg1[%c72] : memref<98xf32, #tpu.memory_space<smem>>
    %c8_148 = arith.constant 8 : index
    %c127_149 = arith.constant 127 : index
    %371 = vector.load %arg5[%c8_148, %c127_149] : memref<32x272xf32, #tpu.memory_space<vmem>>, vector<16x16xf32>
    %372 = vector.broadcast %370 : f32 to vector<16x16xf32>
    %373 = arith.mulf %372, %371 : vector<16x16xf32>
    %374 = arith.addf %369, %373 : vector<16x16xf32>
    %c73 = arith.constant 73 : index
    %375 = memref.load %arg1[%c73] : memref<98xf32, #tpu.memory_space<smem>>
    %c8_150 = arith.constant 8 : index
    %c128_151 = arith.constant 128 : index
    %376 = vector.load %arg5[%c8_150, %c128_151] : memref<32x272xf32, #tpu.memory_space<vmem>>, vector<16x16xf32>
    %377 = vector.broadcast %375 : f32 to vector<16x16xf32>
    %378 = arith.mulf %377, %376 : vector<16x16xf32>
    %379 = arith.addf %374, %378 : vector<16x16xf32>
    %c74 = arith.constant 74 : index
    %380 = memref.load %arg1[%c74] : memref<98xf32, #tpu.memory_space<smem>>
    %c8_152 = arith.constant 8 : index
    %c129_153 = arith.constant 129 : index
    %381 = vector.load %arg5[%c8_152, %c129_153] : memref<32x272xf32, #tpu.memory_space<vmem>>, vector<16x16xf32>
    %382 = vector.broadcast %380 : f32 to vector<16x16xf32>
    %383 = arith.mulf %382, %381 : vector<16x16xf32>
    %384 = arith.addf %379, %383 : vector<16x16xf32>
    %c75 = arith.constant 75 : index
    %385 = memref.load %arg1[%c75] : memref<98xf32, #tpu.memory_space<smem>>
    %c8_154 = arith.constant 8 : index
    %c130_155 = arith.constant 130 : index
    %386 = vector.load %arg5[%c8_154, %c130_155] : memref<32x272xf32, #tpu.memory_space<vmem>>, vector<16x16xf32>
    %387 = vector.broadcast %385 : f32 to vector<16x16xf32>
    %388 = arith.mulf %387, %386 : vector<16x16xf32>
    %389 = arith.addf %384, %388 : vector<16x16xf32>
    %c76 = arith.constant 76 : index
    %390 = memref.load %arg1[%c76] : memref<98xf32, #tpu.memory_space<smem>>
    %c8_156 = arith.constant 8 : index
    %c131_157 = arith.constant 131 : index
    %391 = vector.load %arg5[%c8_156, %c131_157] : memref<32x272xf32, #tpu.memory_space<vmem>>, vector<16x16xf32>
    %392 = vector.broadcast %390 : f32 to vector<16x16xf32>
    %393 = arith.mulf %392, %391 : vector<16x16xf32>
    %394 = arith.addf %389, %393 : vector<16x16xf32>
    %c77 = arith.constant 77 : index
    %395 = memref.load %arg1[%c77] : memref<98xf32, #tpu.memory_space<smem>>
    %c9_158 = arith.constant 9 : index
    %c125_159 = arith.constant 125 : index
    %396 = vector.load %arg5[%c9_158, %c125_159] : memref<32x272xf32, #tpu.memory_space<vmem>>, vector<16x16xf32>
    %397 = vector.broadcast %395 : f32 to vector<16x16xf32>
    %398 = arith.mulf %397, %396 : vector<16x16xf32>
    %399 = arith.addf %394, %398 : vector<16x16xf32>
    %c78 = arith.constant 78 : index
    %400 = memref.load %arg1[%c78] : memref<98xf32, #tpu.memory_space<smem>>
    %c9_160 = arith.constant 9 : index
    %c126_161 = arith.constant 126 : index
    %401 = vector.load %arg5[%c9_160, %c126_161] : memref<32x272xf32, #tpu.memory_space<vmem>>, vector<16x16xf32>
    %402 = vector.broadcast %400 : f32 to vector<16x16xf32>
    %403 = arith.mulf %402, %401 : vector<16x16xf32>
    %404 = arith.addf %399, %403 : vector<16x16xf32>
    %c79 = arith.constant 79 : index
    %405 = memref.load %arg1[%c79] : memref<98xf32, #tpu.memory_space<smem>>
    %c9_162 = arith.constant 9 : index
    %c127_163 = arith.constant 127 : index
    %406 = vector.load %arg5[%c9_162, %c127_163] : memref<32x272xf32, #tpu.memory_space<vmem>>, vector<16x16xf32>
    %407 = vector.broadcast %405 : f32 to vector<16x16xf32>
    %408 = arith.mulf %407, %406 : vector<16x16xf32>
    %409 = arith.addf %404, %408 : vector<16x16xf32>
    %c80 = arith.constant 80 : index
    %410 = memref.load %arg1[%c80] : memref<98xf32, #tpu.memory_space<smem>>
    %c9_164 = arith.constant 9 : index
    %c128_165 = arith.constant 128 : index
    %411 = vector.load %arg5[%c9_164, %c128_165] : memref<32x272xf32, #tpu.memory_space<vmem>>, vector<16x16xf32>
    %412 = vector.broadcast %410 : f32 to vector<16x16xf32>
    %413 = arith.mulf %412, %411 : vector<16x16xf32>
    %414 = arith.addf %409, %413 : vector<16x16xf32>
    %c81 = arith.constant 81 : index
    %415 = memref.load %arg1[%c81] : memref<98xf32, #tpu.memory_space<smem>>
    %c9_166 = arith.constant 9 : index
    %c129_167 = arith.constant 129 : index
    %416 = vector.load %arg5[%c9_166, %c129_167] : memref<32x272xf32, #tpu.memory_space<vmem>>, vector<16x16xf32>
    %417 = vector.broadcast %415 : f32 to vector<16x16xf32>
    %418 = arith.mulf %417, %416 : vector<16x16xf32>
    %419 = arith.addf %414, %418 : vector<16x16xf32>
    %c82 = arith.constant 82 : index
    %420 = memref.load %arg1[%c82] : memref<98xf32, #tpu.memory_space<smem>>
    %c9_168 = arith.constant 9 : index
    %c130_169 = arith.constant 130 : index
    %421 = vector.load %arg5[%c9_168, %c130_169] : memref<32x272xf32, #tpu.memory_space<vmem>>, vector<16x16xf32>
    %422 = vector.broadcast %420 : f32 to vector<16x16xf32>
    %423 = arith.mulf %422, %421 : vector<16x16xf32>
    %424 = arith.addf %419, %423 : vector<16x16xf32>
    %c83 = arith.constant 83 : index
    %425 = memref.load %arg1[%c83] : memref<98xf32, #tpu.memory_space<smem>>
    %c9_170 = arith.constant 9 : index
    %c131_171 = arith.constant 131 : index
    %426 = vector.load %arg5[%c9_170, %c131_171] : memref<32x272xf32, #tpu.memory_space<vmem>>, vector<16x16xf32>
    %427 = vector.broadcast %425 : f32 to vector<16x16xf32>
    %428 = arith.mulf %427, %426 : vector<16x16xf32>
    %429 = arith.addf %424, %428 : vector<16x16xf32>
    %c84 = arith.constant 84 : index
    %430 = memref.load %arg1[%c84] : memref<98xf32, #tpu.memory_space<smem>>
    %c10_172 = arith.constant 10 : index
    %c125_173 = arith.constant 125 : index
    %431 = vector.load %arg5[%c10_172, %c125_173] : memref<32x272xf32, #tpu.memory_space<vmem>>, vector<16x16xf32>
    %432 = vector.broadcast %430 : f32 to vector<16x16xf32>
    %433 = arith.mulf %432, %431 : vector<16x16xf32>
    %434 = arith.addf %429, %433 : vector<16x16xf32>
    %c85 = arith.constant 85 : index
    %435 = memref.load %arg1[%c85] : memref<98xf32, #tpu.memory_space<smem>>
    %c10_174 = arith.constant 10 : index
    %c126_175 = arith.constant 126 : index
    %436 = vector.load %arg5[%c10_174, %c126_175] : memref<32x272xf32, #tpu.memory_space<vmem>>, vector<16x16xf32>
    %437 = vector.broadcast %435 : f32 to vector<16x16xf32>
    %438 = arith.mulf %437, %436 : vector<16x16xf32>
    %439 = arith.addf %434, %438 : vector<16x16xf32>
    %c86 = arith.constant 86 : index
    %440 = memref.load %arg1[%c86] : memref<98xf32, #tpu.memory_space<smem>>
    %c10_176 = arith.constant 10 : index
    %c127_177 = arith.constant 127 : index
    %441 = vector.load %arg5[%c10_176, %c127_177] : memref<32x272xf32, #tpu.memory_space<vmem>>, vector<16x16xf32>
    %442 = vector.broadcast %440 : f32 to vector<16x16xf32>
    %443 = arith.mulf %442, %441 : vector<16x16xf32>
    %444 = arith.addf %439, %443 : vector<16x16xf32>
    %c87 = arith.constant 87 : index
    %445 = memref.load %arg1[%c87] : memref<98xf32, #tpu.memory_space<smem>>
    %c10_178 = arith.constant 10 : index
    %c128_179 = arith.constant 128 : index
    %446 = vector.load %arg5[%c10_178, %c128_179] : memref<32x272xf32, #tpu.memory_space<vmem>>, vector<16x16xf32>
    %447 = vector.broadcast %445 : f32 to vector<16x16xf32>
    %448 = arith.mulf %447, %446 : vector<16x16xf32>
    %449 = arith.addf %444, %448 : vector<16x16xf32>
    %c88 = arith.constant 88 : index
    %450 = memref.load %arg1[%c88] : memref<98xf32, #tpu.memory_space<smem>>
    %c10_180 = arith.constant 10 : index
    %c129_181 = arith.constant 129 : index
    %451 = vector.load %arg5[%c10_180, %c129_181] : memref<32x272xf32, #tpu.memory_space<vmem>>, vector<16x16xf32>
    %452 = vector.broadcast %450 : f32 to vector<16x16xf32>
    %453 = arith.mulf %452, %451 : vector<16x16xf32>
    %454 = arith.addf %449, %453 : vector<16x16xf32>
    %c89 = arith.constant 89 : index
    %455 = memref.load %arg1[%c89] : memref<98xf32, #tpu.memory_space<smem>>
    %c10_182 = arith.constant 10 : index
    %c130_183 = arith.constant 130 : index
    %456 = vector.load %arg5[%c10_182, %c130_183] : memref<32x272xf32, #tpu.memory_space<vmem>>, vector<16x16xf32>
    %457 = vector.broadcast %455 : f32 to vector<16x16xf32>
    %458 = arith.mulf %457, %456 : vector<16x16xf32>
    %459 = arith.addf %454, %458 : vector<16x16xf32>
    %c90 = arith.constant 90 : index
    %460 = memref.load %arg1[%c90] : memref<98xf32, #tpu.memory_space<smem>>
    %c10_184 = arith.constant 10 : index
    %c131_185 = arith.constant 131 : index
    %461 = vector.load %arg5[%c10_184, %c131_185] : memref<32x272xf32, #tpu.memory_space<vmem>>, vector<16x16xf32>
    %462 = vector.broadcast %460 : f32 to vector<16x16xf32>
    %463 = arith.mulf %462, %461 : vector<16x16xf32>
    %464 = arith.addf %459, %463 : vector<16x16xf32>
    %c91 = arith.constant 91 : index
    %465 = memref.load %arg1[%c91] : memref<98xf32, #tpu.memory_space<smem>>
    %c11_186 = arith.constant 11 : index
    %c125_187 = arith.constant 125 : index
    %466 = vector.load %arg5[%c11_186, %c125_187] : memref<32x272xf32, #tpu.memory_space<vmem>>, vector<16x16xf32>
    %467 = vector.broadcast %465 : f32 to vector<16x16xf32>
    %468 = arith.mulf %467, %466 : vector<16x16xf32>
    %469 = arith.addf %464, %468 : vector<16x16xf32>
    %c92 = arith.constant 92 : index
    %470 = memref.load %arg1[%c92] : memref<98xf32, #tpu.memory_space<smem>>
    %c11_188 = arith.constant 11 : index
    %c126_189 = arith.constant 126 : index
    %471 = vector.load %arg5[%c11_188, %c126_189] : memref<32x272xf32, #tpu.memory_space<vmem>>, vector<16x16xf32>
    %472 = vector.broadcast %470 : f32 to vector<16x16xf32>
    %473 = arith.mulf %472, %471 : vector<16x16xf32>
    %474 = arith.addf %469, %473 : vector<16x16xf32>
    %c93 = arith.constant 93 : index
    %475 = memref.load %arg1[%c93] : memref<98xf32, #tpu.memory_space<smem>>
    %c11_190 = arith.constant 11 : index
    %c127_191 = arith.constant 127 : index
    %476 = vector.load %arg5[%c11_190, %c127_191] : memref<32x272xf32, #tpu.memory_space<vmem>>, vector<16x16xf32>
    %477 = vector.broadcast %475 : f32 to vector<16x16xf32>
    %478 = arith.mulf %477, %476 : vector<16x16xf32>
    %479 = arith.addf %474, %478 : vector<16x16xf32>
    %c94 = arith.constant 94 : index
    %480 = memref.load %arg1[%c94] : memref<98xf32, #tpu.memory_space<smem>>
    %c11_192 = arith.constant 11 : index
    %c128_193 = arith.constant 128 : index
    %481 = vector.load %arg5[%c11_192, %c128_193] : memref<32x272xf32, #tpu.memory_space<vmem>>, vector<16x16xf32>
    %482 = vector.broadcast %480 : f32 to vector<16x16xf32>
    %483 = arith.mulf %482, %481 : vector<16x16xf32>
    %484 = arith.addf %479, %483 : vector<16x16xf32>
    %c95 = arith.constant 95 : index
    %485 = memref.load %arg1[%c95] : memref<98xf32, #tpu.memory_space<smem>>
    %c11_194 = arith.constant 11 : index
    %c129_195 = arith.constant 129 : index
    %486 = vector.load %arg5[%c11_194, %c129_195] : memref<32x272xf32, #tpu.memory_space<vmem>>, vector<16x16xf32>
    %487 = vector.broadcast %485 : f32 to vector<16x16xf32>
    %488 = arith.mulf %487, %486 : vector<16x16xf32>
    %489 = arith.addf %484, %488 : vector<16x16xf32>
    %c96 = arith.constant 96 : index
    %490 = memref.load %arg1[%c96] : memref<98xf32, #tpu.memory_space<smem>>
    %c11_196 = arith.constant 11 : index
    %c130_197 = arith.constant 130 : index
    %491 = vector.load %arg5[%c11_196, %c130_197] : memref<32x272xf32, #tpu.memory_space<vmem>>, vector<16x16xf32>
    %492 = vector.broadcast %490 : f32 to vector<16x16xf32>
    %493 = arith.mulf %492, %491 : vector<16x16xf32>
    %494 = arith.addf %489, %493 : vector<16x16xf32>
    %c97 = arith.constant 97 : index
    %495 = memref.load %arg1[%c97] : memref<98xf32, #tpu.memory_space<smem>>
    %c11_198 = arith.constant 11 : index
    %c131_199 = arith.constant 131 : index
    %496 = vector.load %arg5[%c11_198, %c131_199] : memref<32x272xf32, #tpu.memory_space<vmem>>, vector<16x16xf32>
    %497 = vector.broadcast %495 : f32 to vector<16x16xf32>
    %498 = arith.mulf %497, %496 : vector<16x16xf32>
    %499 = arith.addf %494, %498 : vector<16x16xf32>
    %500 = arith.negf %499 : vector<16x16xf32>
    %501 = math.exp %500 : vector<16x16xf32>
    %cst_200 = arith.constant 1.000000e+00 : f32
    %502 = vector.broadcast %cst_200 : f32 to vector<16x16xf32>
    %503 = arith.addf %502, %501 : vector<16x16xf32>
    %504 = arith.divf %502, %503 : vector<16x16xf32>
    %505 = vector.shape_cast %504 : vector<16x16xf32> to vector<1x16x16xf32>
    %506 = vector.broadcast %505 : vector<1x16x16xf32> to vector<4x16x16xf32>
    %507 = arith.mulf %4, %506 : vector<4x16x16xf32>
    %c0_201 = arith.constant 0 : index
    %c0_202 = arith.constant 0 : index
    %c0_203 = arith.constant 0 : index
    %c0_204 = arith.constant 0 : index
    %508 = vector.load %arg3[%c0_201, %c0_202, %c0_203, %c0_204] : memref<1x4x16x16xf32, #tpu.memory_space<vmem>>, vector<1x4x16x16xf32>
    %509 = vector.shape_cast %508 : vector<1x4x16x16xf32> to vector<4x16x16xf32>
    %510 = vector.shape_cast %507 : vector<4x16x16xf32> to vector<1x4x16x16xf32>
    tpu.vector_store %arg3[%c0_201, %c0_202, %c0_203, %c0_204], %510 {strides = array<i32>} : memref<1x4x16x16xf32, #tpu.memory_space<vmem>>, vector<1x4x16x16xf32>,
    return
  }
  func.func @transform_0(%arg0: i32) -> i32 {
    %c0_i32 = arith.constant 0 : i32
    %c0_i32_0 = arith.constant 0 : i32
    return %c0_i32 : i32
  }
  func.func @transform_1(%arg0: i32) -> (i32, i32, i32, i32) {
    %c0_i32 = arith.constant 0 : i32
    %c0_i32_0 = arith.constant 0 : i32
    %c0_i32_1 = arith.constant 0 : i32
    %c0_i32_2 = arith.constant 0 : i32
    return %arg0, %c0_i32, %c0_i32_0, %c0_i32_1 : i32, i32, i32, i32
  }
  func.func @transform_2(%arg0: i32) -> (i32, i32, i32, i32) {
    %c0_i32 = arith.constant 0 : i32
    %c0_i32_0 = arith.constant 0 : i32
    %c0_i32_1 = arith.constant 0 : i32
    %c0_i32_2 = arith.constant 0 : i32
    return %arg0, %c0_i32, %c0_i32_0, %c0_i32_1 : i32, i32, i32, i32
  }
}

</mosaic_0001>

<bundles_post_ra>
// kernel: tpu_custom_call.1
= control target key start
LH: loop header
LB: loop body
LE: loop exit
PB: predicated region body
PF: predicated region fallthrough
CT: control target
= control target key end

     0   :  { %7 = vsyncpa [#allocation7], 0  ;;  %s6885_s0 = inlined_call_operand.hbm [shape: f32[98], index: 0, kind: input, shape index: {}]   ;;  %s6886_s1 = inlined_call_operand.hbm [shape: f32[2,4,16,16], index: 1, kind: input, shape index: {}]   ;;  %s6887_s2 = inlined_call_operand.hbm [shape: f32[2,4,16,16], index: 2, kind: output, shape index: {}]  }
   0x1   :  { %8 = vsyncpa [#allocation5], 0 }
   0x2   :  { %10 = vsyncpa [#allocation5 + $0x1], 0 }
   0x3   :  { %11 = vsyncpa [#allocation6], 0 }
   0x4   :  { %13 = vsyncpa [#allocation6 + $0x1], 0  ;;  %s4282_s9 = smov 0   ;;  %s4284_s10 = smov 0  }
   0x5   :  { %s4286_s11 = smov 0   ;;  %s4288_s12 = smov 0  }
   0x6 LB: > { %s4303_s13 = sadd.s32 4294967295, %s4252_s12   ;;  %s3872_s14 = sadd.s32 4294967294, %s4252_s12   ;;  %s4252_s12 = sphi %s4288_s12, %s7167_s12   ;;  %s4248_s11 = sphi %s4286_s11, %s7166_s11   ;;  %s4244_s10 = sphi %s4284_s10, %s7165_s10   ;;  %s4240_s9 = sphi %s4282_s9, %s7164_s9  }
   0x7   : > { %s4307_s15 = sadd.s32 1, %s4252_s12   ;;  %s47_s16 = sadd.s32 1, %s4248_s11 }
   0x8   : > { %s44_s17 = ssub.s32 %s4252_s12, %s4307_s15  ;;  %p54_p0 = scmp.ne.s32.totalorder %s4248_s11, %s4244_s10 }
   0x9   : > { %p45_p1 = scmp.eq.s32.totalorder %s44_s17, 0  ;;  %p55_p2 = scmp.eq.s32.totalorder %s4252_s12, 0 }
   0xa   : > { %p60_p3 = scmp.ne.s32.totalorder %s4244_s10, %s4240_s9  ;;  %p61_p4 = scmp.eq.s32.totalorder %s4303_s13, 0 }
   0xb   : > { %s4319_s18 = scalar_select %p45_p1, %s4248_s11, %s47_s16  }
   0xc   : > { %p4321_p5 = por %p55_p2, %p54_p0  ;;  %p4327_p6 = por %p61_p4, %p60_p3 }
   0xd   : > { %p84_p7 = scmp.eq.s32.totalorder %s4303_s13, 1  ;;  %p90_p8 = scmp.eq.s32.totalorder %s3872_s14, 1 }
   0xe   : > { %p3873_p9 = scmp.ge.s32.totalorder %s4252_s12, 1  ;;  %p97_p10 = scmp.lt.s32.totalorder %s4252_s12, 3 }
   0xf   : > { %p4334_p11 = por %p84_p7, %p54_p0  ;;  %p4338_p12 = por %p90_p8, %p60_p3 }
  0x10   : > { %p4342_p13 = pnand %p3873_p9, %p97_p10  ;;  %s109_s26 = sshll.u32 %s6885_s0, 4  ;;  %s110_s26 = int_to_ptr.hbm [resolvable:$true] %s109_s26 }
  0x11   : > { %p4015_p7 = scmp.lt.s32.totalorder %s4252_s12, 2  ;;  %s120_s27 = sand.u32 1, %s4248_s11  }
  0x12   : > { %p4002_p2 = pneg %p4342_p13  ;;  %s3876_s29 = sshll.u32 %s120_s27, 6 }
  0x13   : > { %p4359_p8 = pnand %p4015_p7, %p4321_p5  ;;  %s4254_s30 = smov [#allocation4]  }
  0x14   : > { %p4003_p3 = pnand %p4002_p2, %p61_p4  ;;  %s3992_s3 = sshll.u32 %s4252_s12, 6 }
  0x15   : > { %s124_s4 = scalar_lea.vmem [#allocation8], %s3876_s29  ;;  %s129_s8 = scalar_lea.hbm %s6886_s1, %s3992_s3 }
  0x16   : > { %4005 = dma.hbm_to_smem (!%p4003_p3), %s110_s26, 16, %s4254_s30, [#allocation7]  }
  0x17   : > { %s132_s5 = sshll.u32 %s124_s4, 4  ;;  %s130_s14 = sshll.u32 %s129_s8, 4  ;;  %s133_s5 = int_to_ptr.vmem [resolvable:$true] %s132_s5  ;;  %s131_s14 = int_to_ptr.hbm [resolvable:$true] %s130_s14 }
  0x18   : > { %s121_s16 = scalar_lea.sflag [#allocation5], %s120_s27  ;;  %s4152_s17 = sshra.s32 %s131_s14, 4  ;;  %s4153_s17 = int_to_ptr.hbm [resolvable:$true] %s4152_s17 }
  0x19   : > { %s4154_s19 = scalar_lea.hbm %s4153_s17, 64  ;;  %p4156_p9 = pneg %p4359_p8 }
  0x1a   : > { %p4155_p5 = scmp.ne.s32.totalorder %s4153_s17, %s4154_s19  ;;  %s4159_s26 = scalar_lea.hbm %s6886_s1, 128 }
  0x1b   : > { %p4160_p7 = scmp.lt.s32.totalorder %s4153_s17, %s6886_s1  ;;  %p4161_p3 = scmp.lt.s32.totalorder %s4159_s26, %s4154_s19 }
  0x1c   : > { %p4157_p10 = pnand %p4156_p9, %p4155_p5 }
  0x1d   : > { %p4162_p0 = por %p4161_p3, %p4160_p7 }
  0x1e   : > { %p4158_p2 = pneg %p4157_p10 }
  0x20   : > { %p4163_p1 = pnand %p4162_p0, %p4158_p2 }
  0x22   : > { %4166 = shalt.err (!%p4163_p1)
}
  0x23   : > { %s4255_s27 = smov 128   ;;  %s4256_s3 = smov 8  }
  0x24   : > { %4009 = dma.hbm_to_vmem [thread:$0]  (!%p4359_p8), %s131_s14, 1024, %s133_s5, %s121_s16, %s4255_s27, %s4255_s27, %s4256_s3  }
  0x25   : > { %144 = sbr.rel (%p4342_p13) target bundleno = 1252 (0x4e4), region = 28 }
  0x2a   : > { %4227 = dma.done.wait (%p61_p4), [#allocation7], 16  }
  0x2b   : > { %4229 = vsyncadd (%p61_p4), [#allocation7], 4294967280  ;;  %s4384_s4 = sand.u32 1, %s4244_s10  }
  0x2c   : > { %s3881_s6 = sshll.u32 %s4384_s4, 6  ;;  %s152_s7 = scalar_lea.sflag [#allocation5], %s4384_s4 }
  0x2d   : > { %s4388_s8 = scalar_lea.vmem [#allocation8], %s3881_s6 }
  0x2e   : > { %4231 = dma.done.wait (%p4327_p6), %s152_s7, 1024  }
  0x2f   : > { %4233 = vsyncadd (%p4327_p6), %s152_s7, 4294966272 }
  0x30   : > { %161 = sfence }
  0x31   : > { %s4394_s23 = scalar_lea.vmem [#allocation9], %s3881_s6  ;;  %p6965_p4 = scmp.ne.s32.totalorder %s4303_s13, 0 }
  0x33   : > { %181 = sbr.rel (%p6965_p4) target bundleno = 73 (0x49), region = 40 }
  0x38   : > { %v4257_v0 = vmov 0.0  }
  0x39   : > { %182 = vst [vmem:[#allocation2] sm:$0xff] %v4257_v0 }
  0x3a   : > { %183 = vst [vmem:[#allocation2 + $0x8] sm:$0xff] %v4257_v0 }
  0x3b   : > { %186 = vst [vmem:[#allocation2 + $0x18] sm:$0xff] %v4257_v0 }
  0x3c   : > { %187 = vst [vmem:[#allocation2 + $0x20] sm:$0xff] %v4257_v0 }
  0x3d   : > { %189 = vst [vmem:[#allocation2 + $0x30] sm:$0xff] %v4257_v0 }
  0x3e   : > { %190 = vst [vmem:[#allocation2 + $0x38] sm:$0xff] %v4257_v0 }
  0x3f   : > { %192 = vst [vmem:[#allocation2 + $0x48] sm:$0xff] %v4257_v0 }
  0x40   : > { %193 = vst [vmem:[#allocation2 + $0x50] sm:$0xff] %v4257_v0 }
  0x41   : > { %195 = vst [vmem:[#allocation3] sm:$0xff] %v4257_v0 }
  0x42   : > { %196 = vst [vmem:[#allocation3 + $0x8] sm:$0xff] %v4257_v0 }
  0x43   : > { %198 = vst [vmem:[#allocation3 + $0x18] sm:$0xff] %v4257_v0 }
  0x44   : > { %199 = vst [vmem:[#allocation3 + $0x20] sm:$0xff] %v4257_v0 }
  0x45   : > { %201 = vst [vmem:[#allocation3 + $0x30] sm:$0xff] %v4257_v0 }
  0x46   : > { %202 = vst [vmem:[#allocation3 + $0x38] sm:$0xff] %v4257_v0 }
  0x47   : > { %204 = vst [vmem:[#allocation3 + $0x48] sm:$0xff] %v4257_v0 }
  0x48   : > { %205 = vst [vmem:[#allocation3 + $0x50] sm:$0xff] %v4257_v0 }
  0x49 PF: > { %s3884_s20 = sld [smem:[#allocation4 + $0x1]]  ;;  %v208_v1 = vld [vmem:[%s4388_s8 + $0x8] sm:$0xff]  ;;  %v4399_v2 = vld [vmem:[#allocation2 + $0x30] sm:$0x1f]  ;;  %v249_v3 = vld [vmem:[#allocation2] sm:$0xe0] }
  0x4a   : > { %s3885_s28 = sld [smem:[#allocation4 + $0x2]]  ;;  %v210_v4 = vld [vmem:[%s4388_s8 + $0x18] sm:$0xff]  ;;  %v212_v5 = vld [vmem:[%s4388_s8 + $0x28] sm:$0xff]  ;;  %vm215_vm0 = vcmask 130048   ;;  %v207_v7 = vld [vmem:[%s4388_s8] sm:$0xff]  ;;  %s4258_s5 = smov 127  }
  0x4b   : > { %v214_v6 = vld [vmem:[%s4388_s8 + $0x38] sm:$0xff]  ;;  %v209_v8 = vld [vmem:[%s4388_s8 + $0x10] sm:$0xff]  ;;  %v223_v10 = vsel %vm215_vm0, %v208_v1, -inf  ;;  %v224_v11 = vsel %vm215_vm0, %v210_v4, -inf  ;;  %v225_v12 = vsel %vm215_vm0, %v212_v5, -inf  ;;  %v211_v14 = vld [vmem:[%s4388_s8 + $0x20] sm:$0xff] }
  0x4c   : > { %v4406_v9 = vld [vmem:[#allocation2 + $0x18] sm:$0xff]  ;;  %v227_v13 = vsel %vm215_vm0, %v214_v6, -inf  ;;  %v226_v15 = vmax.f32 %v223_v10, %v225_v12  ;;  %v213_v18 = vld [vmem:[%s4388_s8 + $0x30] sm:$0xff]  ;;  %v216_v19 = vsel %vm215_vm0, %v207_v7, -inf  ;;  %v217_v20 = vsel %vm215_vm0, %v209_v8, -inf  ;;  %s4259_s14 = smov 126  }
  0x4d   : > { %v228_v17 = vmax.f32 %v224_v11, %v227_v13  ;;  %v218_v24 = vsel %vm215_vm0, %v211_v14, -inf  ;;  %v220_v25 = vsel %vm215_vm0, %v213_v18, -inf  ;;  %v4423_v27 = vld [vmem:[#allocation2 + $0x8] sm:$0xe0]  ;;  %s3886_s16 = sld [smem:[#allocation4 + $0x3]]  ;;  %s4260_s19 = smov 125  }
  0x4e   : > { %v219_v29 = vmax.f32 %v216_v19, %v218_v24  ;;  %v221_v30 = vmax.f32 %v217_v20, %v220_v25  ;;  %s3887_s17 = sld [smem:[#allocation4 + $0x4]]  ;;  %s4261_s25 = smov 124   ;;  %v4466_v56 = vld [vmem:[#allocation2 + $0x30] sm:$0x3f]  ;;  %v4468_v58 = vld [vmem:[#allocation2 + $0x8] sm:$0xc0] }
  0x4f   : > { %v269_v16 = vstv %s3884_s20  ;;  %v229_v28 = vmax.f32 %v226_v15, %v228_v17  ;;  %s3888_s24 = sld [smem:[#allocation4 + $0x5]]  ;;  %s4262_s30 = smov 123   ;;  %v445_v59 = vld [vmem:[#allocation2] sm:$0xc0]  ;;  %vm462_vm1 = vcmask 1046528   ;;  %vm717_vm2 = vcmask 1045504  }
  0x50   : > { %v274_v21 = vmul.f32 %v269_v16, %v4399_v2  ;;  %v272_v22 = vmul.f32 %v269_v16, %v4406_v9  ;;  %v270_v23 = vmul.f32 %v269_v16, %v249_v3  ;;  %v311_v26 = vstv %s3885_s28  ;;  %s3889_s26 = sld [smem:[#allocation4 + $0x6]]  ;;  %s4263_s27 = smov 122  }
  0x51   : > { %231 = vst.msk [vmem:[#allocation2 + $0x38] sm:$0xff] %vm215_vm0, %v229_v28  ;;  %v222_v31 = vmax.f32 %v219_v29, %v221_v30  ;;  %v314_v32 = vmul.f32 %v311_v26, %v4406_v9  ;;  %v313_v33 = vmul.f32 %v311_v26, %v4423_v27  ;;  %v271_v34 = vmul.f32 %v269_v16, %v4423_v27  ;;  %s3891_s29 = sld [smem:[#allocation4 + $0x8]] }
  0x52   : > { %290 = vrot.lane.b32.xlu2 %v274_v21, %s4258_s5  ;;  %286 = vrot.lane.b32.xlu1 %v272_v22, %s4258_s5  ;;  %v312_v38 = vmul.f32 %v311_v26, %v249_v3  ;;  %v316_v41 = vmul.f32 %v311_v26, %v4399_v2  ;;  %s3892_s3 = sld [smem:[#allocation4 + $0x9]]  ;;  %vm294_vm3 = vcmask 1039360   ;;  %vm336_vm4 = vcmask 1031168  }
  0x53   : > { %282 = vrot.lane.b32.xlu0 %v270_v23, %s4258_s5  ;;  %230 = vst.msk [vmem:[#allocation2 + $0x20] sm:$0xff] %vm215_vm0, %v222_v31  ;;  %v353_v43 = vstv %s3886_s16  ;;  %s3893_s6 = sld [smem:[#allocation4 + $0xa]]  ;;  %vm966_vm5 = vcmask 1044480   ;;  %vm1187_vm6 = vcmask 1043456   ;;  %vm1442_vm7 = vcmask 1042432  }
  0x54   : > { %v354_v46 = vmul.f32 %v353_v43, %v4423_v27  ;;  %v376_v47 = vstv %s3887_s17  ;;  %s3894_s7 = sld [smem:[#allocation4 + $0xb]]  ;;  %vm1697_vm8 = vcmask 1041408  }
  0x55   : > { %v377_v50 = vmul.f32 %v376_v47, %v4423_v27  ;;  %v399_v51 = vstv %s3888_s24  ;;  %s3895_s20 = sld [smem:[#allocation4 + $0xc]] }
  0x56   : > { %v400_v54 = vmul.f32 %v399_v51, %v4423_v27  ;;  %v422_v55 = vstv %s3889_s26  ;;  %s3896_s28 = sld [smem:[#allocation4 + $0xd]] }
  0x57   : > { %v486_v57 = vstv %s3891_s29  ;;  %v423_v61 = vmul.f32 %v422_v55, %v4423_v27  ;;  %s3898_s16 = sld [smem:[#allocation4 + $0xf]] }
  0x58   : > { %v4433_v35 = vld [vmem:[#allocation2 + $0x38] sm:$0x1f]  ;;  %v489_v63 = vmul.f32 %v486_v57, %v4406_v9  ;;  %v491_v0 = vmul.f32 %v486_v57, %v4466_v56  ;;  %v488_v1 = vmul.f32 %v486_v57, %v4468_v58  ;;  %v487_v4 = vmul.f32 %v486_v57, %v445_v59  ;;  %s248_s17 = sld [smem:[#allocation4]] }
  0x59   : > { %v275_v36 = vmul.f32 %v269_v16, %v4433_v35  ;;  %v317_v40 = vmul.f32 %v311_v26, %v4433_v35  ;;  %v356_v44 = vmul.f32 %v353_v43, %v4433_v35  ;;  %v379_v48 = vmul.f32 %v376_v47, %v4433_v35  ;;  %v4480_v11 = vld [vmem:[#allocation2 + $0x38] sm:$0x3f]  ;;  %s3899_s24 = sld [smem:[#allocation4 + $0x10]] }
  0x5a   : > { %328 = vrot.lane.b32.xlu2 %v314_v32, %s4259_s14  ;;  %326 = vrot.lane.b32.xlu1 %v313_v33, %s4259_s14  ;;  %v4436_v37 = vld [vmem:[#allocation2 + $0x20] sm:$0xff]  ;;  %v402_v52 = vmul.f32 %v399_v51, %v4433_v35  ;;  %v425_v60 = vmul.f32 %v422_v55, %v4433_v35  ;;  %v500_v5 = vrot.slane %v489_v63, 1  ;;  %v505_v6 = vrot.slane %v491_v0, 1  ;;  %s3890_s26 = sld [smem:[#allocation4 + $0x7]] }
  0x5b   : > { %284 = vrot.lane.b32.xlu0 %v271_v34, %s4258_s5  ;;  %v273_v39 = vmul.f32 %v269_v16, %v4436_v37  ;;  %v315_v42 = vmul.f32 %v311_v26, %v4436_v37  ;;  %v355_v45 = vmul.f32 %v353_v43, %v4436_v37  ;;  %v378_v49 = vmul.f32 %v376_v47, %v4436_v37  ;;  %s3900_s29 = sld [smem:[#allocation4 + $0x11]] }
  0x5c   : > { %v401_v53 = vmul.f32 %v399_v51, %v4436_v37  ;;  %v424_v62 = vmul.f32 %v422_v55, %v4436_v37  ;;  %v490_v3 = vmul.f32 %v486_v57, %v4436_v37  ;;  %v502_v7 = vrot.slane %v488_v1, 1 }
  0x5d   : > { %v499_v10 = vrot.slane %v487_v4, 1  ;;  %v506_v12 = vsel %vm462_vm1, %v500_v5, %v505_v6  ;;  %v492_v15 = vmul.f32 %v486_v57, %v4480_v11  ;;  %v537_v17 = vstv %s3892_s3  ;;  %s3901_s3 = sld [smem:[#allocation4 + $0x12]] }
  0x5e   : > { %v503_v8 = vrot.slane %v490_v3, 1  ;;  %v540_v18 = vmul.f32 %v537_v17, %v4406_v9  ;;  %v542_v19 = vmul.f32 %v537_v17, %v4466_v56  ;;  %v539_v20 = vmul.f32 %v537_v17, %v4468_v58 }
  0x5f   : > { %v501_v14 = vsel %vm462_vm1, %v499_v10, %v500_v5  ;;  %v507_v16 = vrot.slane %v492_v15, 1  ;;  %v541_v21 = vmul.f32 %v537_v17, %v4436_v37  ;;  %v538_v23 = vmul.f32 %v537_v17, %v445_v59 }
  0x60   : > { %v504_v13 = vsel %vm462_vm1, %v502_v7, %v503_v8  ;;  %v551_v24 = vrot.slane %v540_v18, 1  ;;  %v556_v25 = vrot.slane %v542_v19, 1  ;;  %v553_v26 = vrot.slane %v539_v20, 1  ;;  %v4547_v19 = vld [vmem:[#allocation2 + $0x8] sm:$0x80] }
  0x61   : > { %v508_v22 = vsel %vm462_vm1, %v503_v8, %v507_v16  ;;  %v554_v27 = vrot.slane %v541_v21, 1  ;;  %v550_v28 = vrot.slane %v538_v23, 1  ;;  %v543_v32 = vmul.f32 %v537_v17, %v4480_v11  ;;  %v4545_v17 = vld [vmem:[#allocation2 + $0x30] sm:$0x7f]  ;;  %v700_v20 = vld [vmem:[#allocation2] sm:$0x80] }
  0x62   : > { %292 = vrot.lane.b32.xlu2 %v275_v36, %s4258_s5  ;;  %288 = vrot.lane.b32.xlu1 %v273_v39, %s4258_s5  ;;  %v557_v29 = vsel %vm462_vm1, %v551_v24, %v556_v25  ;;  %v588_v34 = vstv %s3893_s6  ;;  %v644_v55 = vstv %s3895_s20  ;;  %s3902_s6 = sld [smem:[#allocation4 + $0x13]] }
  0x63   : > { %324 = vrot.lane.b32.xlu0 %v312_v38, %s4259_s14  ;;  %v555_v30 = vsel %vm462_vm1, %v553_v26, %v554_v27  ;;  %v552_v31 = vsel %vm462_vm1, %v550_v28, %v551_v24  ;;  %v558_v33 = vrot.slane %v543_v32, 1  ;;  %v591_v36 = vmul.f32 %v588_v34, %v4480_v11  ;;  %s3905_s20 = sld [smem:[#allocation4 + $0x16]] }
  0x64   : > { %v590_v38 = vmul.f32 %v588_v34, %v4436_v37  ;;  %v647_v59 = vmul.f32 %v644_v55, %v4480_v11  ;;  %v672_v1 = vstv %s3896_s28  ;;  %v741_v18 = vstv %s3898_s16  ;;  %s3906_s28 = sld [smem:[#allocation4 + $0x17]] }
  0x65   : > { %v559_v39 = vsel %vm462_vm1, %v554_v27, %v558_v33  ;;  %v675_v5 = vmul.f32 %v672_v1, %v4480_v11  ;;  %v673_v10 = vmul.f32 %v672_v1, %v4468_v58  ;;  %v746_v23 = vmul.f32 %v741_v18, %v4545_v17  ;;  %s3897_s16 = sld [smem:[#allocation4 + $0xe]] }
  0x66   : > { %v654_v63 = vrot.slane %v647_v59, 1  ;;  %v743_v24 = vmul.f32 %v741_v18, %v4547_v19  ;;  %v742_v27 = vmul.f32 %v741_v18, %v700_v20  ;;  %v4560_v32 = vstv %s248_s17  ;;  %s4724_s17 = sld [smem:[#allocation4 + $0x18]] }
  0x67   : > { %v260_v59 = vmul.f32 %v4560_v32, %v4399_v2 }
  0x6a   : > { %334 = vrot.lane.b32.xlu2 %v317_v40, %s4259_s14  ;;  %332 = vrot.lane.b32.xlu1 %v316_v41, %s4259_s14  ;;  %v589_v40 = vmul.f32 %v588_v34, %v4468_v58  ;;  %v598_v41 = vrot.slane %v591_v36, 1  ;;  %v754_v36 = vrot.slane %v742_v27, 2 }
  0x6b   : > { %330 = vrot.lane.b32.xlu0 %v315_v42, %s4259_s14  ;;  %v596_v42 = vrot.slane %v590_v38, 1  ;;  %v261_v38 = vmul.f32 %v4560_v32, %v4433_v35 }
  0x72   : > { %364 = vrot.lane.b32.xlu2 %v356_v44, %s4260_s19  ;;  %362 = vrot.lane.b32.xlu1 %v355_v45, %s4260_s19  ;;  %v595_v44 = vrot.slane %v589_v40, 1  ;;  %v616_v45 = vstv %s3894_s7  ;;  %v4568_v40 = vld [vmem:[#allocation2 + $0x38] sm:$0x7f]  ;;  %s3903_s7 = sld [smem:[#allocation4 + $0x14]] }
  0x73   : > { %360 = vrot.lane.b32.xlu0 %v354_v46, %s4260_s19  ;;  %v599_v46 = vsel %vm462_vm1, %v596_v42, %v598_v41  ;;  %v619_v47 = vmul.f32 %v616_v45, %v4480_v11 }
  0x75   : > { %v626_v51 = vrot.slane %v619_v47, 1 }
  0x7a   : > { %387 = vrot.lane.b32.xlu2 %v379_v48, %s4261_s25  ;;  %385 = vrot.lane.b32.xlu1 %v378_v49, %s4261_s25  ;;  %v618_v48 = vmul.f32 %v616_v45, %v4436_v37  ;;  %v597_v49 = vsel %vm462_vm1, %v595_v44, %v596_v42 }
  0x7b   : > { %383 = vrot.lane.b32.xlu0 %v377_v50, %s4261_s25  ;;  %v617_v50 = vmul.f32 %v616_v45, %v4468_v58  ;;  %v747_v45 = vmul.f32 %v741_v18, %v4568_v40 }
  0x82   : > { %410 = vrot.lane.b32.xlu2 %v402_v52, %s4262_s30  ;;  %408 = vrot.lane.b32.xlu1 %v401_v53, %s4262_s30  ;;  %v624_v52 = vrot.slane %v618_v48, 1  ;;  %v762_v48 = vrot.slane %v747_v45, 2 }
  0x83   : > { %406 = vrot.lane.b32.xlu0 %v400_v54, %s4262_s30  ;;  %v623_v54 = vrot.slane %v617_v50, 1 }
  0x84   : > { %v627_v57 = vsel %vm462_vm1, %v624_v52, %v626_v51 }
  0x8a   : > { %433 = vrot.lane.b32.xlu2 %v425_v60, %s4263_s27  ;;  %431 = vrot.lane.b32.xlu1 %v424_v62, %s4263_s27  ;;  %v646_v60 = vmul.f32 %v644_v55, %v4436_v37  ;;  %v645_v62 = vmul.f32 %v644_v55, %v4468_v58 }
  0x8b   : > { %429 = vrot.lane.b32.xlu0 %v423_v61, %s4263_s27  ;;  %v625_v61 = vsel %vm462_vm1, %v623_v54, %v624_v52 }
  0x8c   : > { %v652_v0 = vrot.slane %v646_v60, 1  ;;  %v651_v4 = vrot.slane %v645_v62, 1 }
  0x8e   : > { %v655_v7 = vsel %vm462_vm1, %v652_v0, %v654_v63  ;;  %v653_v8 = vsel %vm462_vm1, %v651_v4, %v652_v0 }
  0x92   : > { %513 = vrot.lane.b32.xlu2 %v506_v12, %s4258_s5  ;;  %511 = vrot.lane.b32.xlu1 %v504_v13, %s4258_s5  ;;  %v682_v12 = vrot.slane %v675_v5, 1 }
  0x93   : > { %509 = vrot.lane.b32.xlu0 %v501_v14, %s4258_s5 }
  0x9a   : > { %519 = vrot.lane.b32.xlu2 %v507_v16, %s4258_s5  ;;  %517 = vrot.lane.b32.xlu1 %v505_v6, %s4258_s5  ;;  %v674_v6 = vmul.f32 %v672_v1, %v4436_v37  ;;  %v679_v16 = vrot.slane %v673_v10, 1 }
  0x9b   : > { %515 = vrot.lane.b32.xlu0 %v508_v22, %s4258_s5  ;;  %v744_v22 = vmul.f32 %v741_v18, %v4406_v9 }
  0x9c   : > { %v680_v13 = vrot.slane %v674_v6, 1  ;;  %v4596_v6 = vstv %s3890_s26  ;;  %s4793_s26 = sld [smem:[#allocation4 + $0x1a]] }
  0x9d   : > { %v755_v28 = vrot.slane %v744_v22, 2 }
  0x9e   : > { %v683_v21 = vsel %vm462_vm1, %v680_v13, %v682_v12  ;;  %v681_v26 = vsel %vm462_vm1, %v679_v16, %v680_v13  ;;  %v4604_v16 = vmul.f32 %v4596_v6, %v4480_v11 }
  0x9f   : > { %v756_v44 = vsel %vm717_vm2, %v754_v36, %v755_v28 }
  0xa0   : > { %v471_v11 = vrot.slane %v4604_v16, 1 }
  0xa2   : > { %564 = vrot.lane.b32.xlu2 %v557_v29, %s4259_s14  ;;  %562 = vrot.lane.b32.xlu1 %v555_v30, %s4259_s14  ;;  %v760_v29 = vrot.slane %v746_v23, 2  ;;  %v757_v30 = vrot.slane %v743_v24, 2 }
  0xa3   : > { %560 = vrot.lane.b32.xlu0 %v552_v31, %s4259_s14 }
  0xaa   : > { %570 = vrot.lane.b32.xlu2 %v558_v33, %s4259_s14  ;;  %568 = vrot.lane.b32.xlu1 %v556_v25, %s4259_s14  ;;  %v745_v25 = vmul.f32 %v741_v18, %v4436_v37 }
  0xab   : > { %566 = vrot.lane.b32.xlu0 %v559_v39, %s4259_s14 }
  0xac   : > { %v4511_v43 = vpop.permute.xlu2 %290  ;;  %v758_v31 = vrot.slane %v745_v25, 2 }
  0xae   : > { %v759_v42 = vsel %vm717_vm2, %v757_v30, %v758_v31  ;;  %v763_v60 = vsel %vm717_vm2, %v758_v31, %v762_v48 }
  0xb2   : > { %604 = vrot.lane.b32.xlu2 %v598_v41, %s4260_s19  ;;  %602 = vrot.lane.b32.xlu1 %v599_v46, %s4260_s19  ;;  %v761_v41 = vsel %vm717_vm2, %v755_v28, %v760_v29 }
  0xb3   : > { %600 = vrot.lane.b32.xlu0 %v597_v49, %s4260_s19  ;;  %v792_v49 = vstv %s3899_s24  ;;  %s4758_s24 = sld [smem:[#allocation4 + $0x19]] }
  0xb4   : > { %v4521_v53 = vpop.permute.xlu2 %328  ;;  %v795_v52 = vmul.f32 %v792_v49, %v4406_v9  ;;  %v797_v54 = vmul.f32 %v792_v49, %v4545_v17  ;;  %v794_v55 = vmul.f32 %v792_v49, %v4547_v19  ;;  %v798_v24 = vmul.f32 %v792_v49, %v4568_v40 }
  0xb6   : > { %v806_v0 = vrot.slane %v795_v52, 2  ;;  %v811_v1 = vrot.slane %v797_v54, 2  ;;  %v808_v4 = vrot.slane %v794_v55, 2  ;;  %v871_v54 = vstv %s3901_s3  ;;  %s3912_s3 = sld [smem:[#allocation4 + $0x1d]] }
  0xb8   : > { %v812_v18 = vsel %vm717_vm2, %v806_v0, %v811_v1 }
  0xba   : > { %632 = vrot.lane.b32.xlu2 %v626_v51, %s4261_s25  ;;  %630 = vrot.lane.b32.xlu1 %v627_v57, %s4261_s25  ;;  %v796_v57 = vmul.f32 %v792_v49, %v4436_v37 }
  0xbb   : > { %628 = vrot.lane.b32.xlu0 %v625_v61, %s4261_s25  ;;  %v793_v61 = vmul.f32 %v792_v49, %v700_v20 }
  0xbc   : > { %v4531_v3 = vpop.permute.xlu2 %292  ;;  %v809_v5 = vrot.slane %v796_v57, 2 }
  0xbd   : > { %v309_v46 = vadd.f32 %v4531_v3, %v261_v38  ;;  %v297_v62 = vsel %vm294_vm3, %v4511_v43, %v4531_v3  ;;  %v805_v10 = vrot.slane %v793_v61, 2 }
  0xbe   : > { %v308_v2 = vadd.f32 %v297_v62, %v260_v59  ;;  %v810_v20 = vsel %vm717_vm2, %v808_v4, %v809_v5  ;;  %v874_v59 = vmul.f32 %v871_v54, %v4568_v40  ;;  %v872_v62 = vmul.f32 %v871_v54, %v4547_v19 }
  0xbf   : > { %v807_v23 = vsel %vm717_vm2, %v805_v10, %v806_v0 }
  0xc2   : > { %660 = vrot.lane.b32.xlu2 %v654_v63, %s4262_s30  ;;  %658 = vrot.lane.b32.xlu1 %v655_v7, %s4262_s30 }
  0xc3   : > { %656 = vrot.lane.b32.xlu0 %v653_v8, %s4262_s30 }
  0xc4   : > { %v4541_v14 = vpop.permute.xlu1 %286  ;;  %v4543_v15 = vpop.permute.xlu2 %334 }
  0xc5   : > { %v4549_v58 = vpop.permute.xlu0 %282  ;;  %v351_v50 = vadd.f32 %v4543_v15, %v309_v46 }
  0xca   : > { %688 = vrot.lane.b32.xlu2 %v682_v12, %s4263_s27  ;;  %686 = vrot.lane.b32.xlu1 %v683_v21, %s4263_s27  ;;  %v4610_v21 = vmul.f32 %v4596_v6, %v4466_v56  ;;  %v813_v56 = vrot.slane %v798_v24, 2 }
  0xcb   : > { %684 = vrot.lane.b32.xlu0 %v681_v26, %s4263_s27 }
  0xcc   : > { %v4562_v33 = vpop.permute.xlu1 %326  ;;  %v365_v34 = vpop.permute.xlu2 %364  ;;  %v469_v30 = vrot.slane %v4610_v21, 1 }
  0xcd   : > { %v4566_v39 = vpop.permute.xlu0 %284  ;;  %v374_v63 = vadd.f32 %v365_v34, %v351_v50 }
  0xd2   : > { %768 = vrot.lane.b32.xlu2 %v761_v41, %s4258_s5  ;;  %766 = vrot.lane.b32.xlu1 %v759_v42, %s4258_s5 }
  0xd3   : > { %764 = vrot.lane.b32.xlu0 %v756_v44, %s4258_s5  ;;  %v814_v44 = vsel %vm717_vm2, %v809_v5, %v813_v56  ;;  %v878_v5 = vrot.slane %v872_v62, 2 }
  0xd4   : > { %v388_v35 = vpop.permute.xlu2 %387  ;;  %v4578_v47 = vpop.permute.xlu1 %288 }
  0xd5   : > { %v4581_v51 = vpop.permute.xlu0 %324  ;;  %v397_v43 = vadd.f32 %v388_v35, %v374_v63  ;;  %v881_v63 = vrot.slane %v874_v59, 2 }
  0xda   : > { %774 = vrot.lane.b32.xlu2 %v762_v48, %s4258_s5  ;;  %772 = vrot.lane.b32.xlu1 %v760_v29, %s4258_s5  ;;  %v843_v29 = vstv %s3900_s29  ;;  %s4836_s29 = sld [smem:[#allocation4 + $0x1b]] }
  0xdb   : > { %770 = vrot.lane.b32.xlu0 %v763_v60, %s4258_s5  ;;  %v846_v41 = vmul.f32 %v843_v29, %v4568_v40  ;;  %v845_v42 = vmul.f32 %v843_v29, %v4436_v37  ;;  %v844_v45 = vmul.f32 %v843_v29, %v4547_v19  ;;  %v873_v60 = vmul.f32 %v871_v54, %v4436_v37 }
  0xdc   : > { %v411_v7 = vpop.permute.xlu2 %410  ;;  %v333_v8 = vpop.permute.xlu1 %332 }
  0xdd   : > { %v4598_v3 = vpop.permute.xlu0 %330  ;;  %v339_v12 = vsel %vm336_vm4, %v333_v8, %v4543_v15  ;;  %v420_v25 = vadd.f32 %v411_v7, %v397_v43  ;;  %v851_v48 = vrot.slane %v845_v42, 2  ;;  %v850_v52 = vrot.slane %v844_v45, 2 }
  0xde   : > { %v350_v13 = vadd.f32 %v339_v12, %v308_v2  ;;  %v879_v0 = vrot.slane %v873_v60, 2  ;;  %v899_v2 = vstv %s3902_s6  ;;  %s3913_s6 = sld [smem:[#allocation4 + $0x1e]] }
  0xdf   : > { %v852_v61 = vsel %vm717_vm2, %v850_v52, %v851_v48  ;;  %v902_v10 = vmul.f32 %v899_v2, %v4568_v40  ;;  %v901_v43 = vmul.f32 %v899_v2, %v4436_v37 }
  0xe0   : > { %v373_v22 = vadd.f32 %v365_v34, %v350_v13  ;;  %v882_v8 = vsel %vm717_vm2, %v879_v0, %v881_v63  ;;  %v880_v12 = vsel %vm717_vm2, %v878_v5, %v879_v0  ;;  %v900_v13 = vmul.f32 %v899_v2, %v4547_v19  ;;  %v4694_v5 = vld [vmem:[#allocation2 + $0x38] sm:$0xff] }
  0xe2   : > { %v396_v15 = vadd.f32 %v388_v35, %v373_v22  ;;  %819 = vrot.lane.b32.xlu2 %v812_v18, %s4259_s14  ;;  %817 = vrot.lane.b32.xlu1 %v810_v20, %s4259_s14  ;;  %v853_v35 = vrot.slane %v846_v41, 2  ;;  %v909_v18 = vrot.slane %v902_v10, 2  ;;  %v907_v20 = vrot.slane %v901_v43, 2 }
  0xe3   : > { %815 = vrot.lane.b32.xlu0 %v807_v23, %s4259_s14  ;;  %v906_v24 = vrot.slane %v900_v13, 2 }
  0xe4   : > { %v434_v26 = vpop.permute.xlu2 %433  ;;  %v419_v27 = vadd.f32 %v411_v7, %v396_v15  ;;  %v4618_v28 = vpop.permute.xlu1 %362  ;;  %v854_v57 = vsel %vm717_vm2, %v851_v48, %v853_v35  ;;  %v986_v48 = vstv %s3905_s20  ;;  %s3915_s20 = sld [smem:[#allocation4 + $0x20]] }
  0xe5   : > { %v443_v31 = vadd.f32 %v434_v26, %v420_v25  ;;  %v4621_v34 = vpop.permute.xlu0 %360  ;;  %v927_v25 = vstv %s3903_s7  ;;  %v908_v29 = vsel %vm717_vm2, %v906_v24, %v907_v20  ;;  %v988_v60 = vmul.f32 %v986_v48, %v4436_v37  ;;  %s3914_s7 = sld [smem:[#allocation4 + $0x1f]] }
  0xe6   : > { %v442_v36 = vadd.f32 %v434_v26, %v419_v27  ;;  %v910_v26 = vsel %vm717_vm2, %v907_v20, %v909_v18  ;;  %v930_v27 = vmul.f32 %v927_v25, %v4568_v40  ;;  %v990_v43 = vmul.f32 %v4694_v5, %v986_v48 }
  0xe7   : > { %v4625_v38 = vadd.f32 %v471_v11, %v443_v31  ;;  %v928_v31 = vmul.f32 %v927_v25, %v4547_v19  ;;  %v987_v19 = vmul.f32 %v986_v48, %v4406_v9  ;;  %v1029_v20 = vstv %s3906_s28  ;;  %s3916_s28 = sld [smem:[#allocation4 + $0x21]] }
  0xe8   : > { %v4633_v46 = vadd.f32 %v469_v30, %v442_v36  ;;  %v937_v36 = vrot.slane %v930_v27, 2 }
  0xe9   : > { %v934_v45 = vrot.slane %v928_v31, 2 }
  0xea   : > { %825 = vrot.lane.b32.xlu2 %v813_v56, %s4259_s14  ;;  %823 = vrot.lane.b32.xlu1 %v811_v1, %s4259_s14  ;;  %v929_v56 = vmul.f32 %v927_v25, %v4436_v37  ;;  %v1030_v25 = vmul.f32 %v1029_v20, %v4406_v9 }
  0xeb   : > { %821 = vrot.lane.b32.xlu0 %v814_v44, %s4259_s14 }
  0xec   : > { %v4638_v49 = vpop.permute.xlu2 %513  ;;  %v4640_v50 = vpop.permute.xlu1 %385  ;;  %v935_v41 = vrot.slane %v929_v56, 2 }
  0xed   : > { %v4642_v55 = vpop.permute.xlu0 %383 }
  0xee   : > { %v938_v54 = vsel %vm717_vm2, %v935_v41, %v937_v36  ;;  %v936_v59 = vsel %vm717_vm2, %v934_v45, %v935_v41  ;;  %v4721_v45 = vstv %s3897_s16  ;;  %s3917_s16 = sld [smem:[#allocation4 + $0x22]] }
  0xf2   : > { %859 = vrot.lane.b32.xlu2 %v853_v35, %s4260_s19  ;;  %857 = vrot.lane.b32.xlu1 %v854_v57, %s4260_s19  ;;  %v4682_v35 = vld [vmem:[#allocation2 + $0x30] sm:$0xff] }
  0xf3   : > { %855 = vrot.lane.b32.xlu0 %v852_v61, %s4260_s19  ;;  %v989_v57 = vmul.f32 %v986_v48, %v4682_v35  ;;  %v995_v61 = vrot.slane %v987_v19, 3 }
  0xf4   : > { %v4652_v1 = vpop.permute.xlu2 %519  ;;  %v4654_v4 = vpop.permute.xlu1 %408 }
  0xf5   : > { %v4656_v7 = vpop.permute.xlu0 %406  ;;  %v997_v62 = vrot.slane %v989_v57, 3  ;;  %v535_v31 = vadd.f32 %v4652_v1, %v4625_v38  ;;  %v259_v57 = vmul.f32 %v4560_v32, %v4436_v37 }
  0xf7   : > { %v998_v10 = vsel %vm966_vm5, %v995_v61, %v997_v62 }
  0xfa   : > { %887 = vrot.lane.b32.xlu2 %v881_v63, %s4261_s25  ;;  %885 = vrot.lane.b32.xlu1 %v882_v8, %s4261_s25  ;;  %v996_v8 = vrot.slane %v988_v60, 3 }
  0xfb   : > { %883 = vrot.lane.b32.xlu0 %v880_v12, %s4261_s25 }
  0xfc   : > { %v4666_v22 = vpop.permute.xlu2 %564  ;;  %v4668_v23 = vpop.permute.xlu1 %431 }
  0xfd   : > { %v4670_v15 = vpop.permute.xlu0 %429 }
 0x102   : > { %915 = vrot.lane.b32.xlu2 %v909_v18, %s4262_s30  ;;  %913 = vrot.lane.b32.xlu1 %v910_v26, %s4262_s30  ;;  %v999_v18 = vrot.slane %v990_v43, 3  ;;  %v4709_v26 = vmul.f32 %v1029_v20, %v4682_v35 }
 0x103   : > { %911 = vrot.lane.b32.xlu0 %v908_v29, %s4262_s30  ;;  %v1031_v29 = vmul.f32 %v1029_v20, %v4436_v37 }
 0x104   : > { %v571_v42 = vpop.permute.xlu2 %570  ;;  %v4680_v44 = vpop.permute.xlu1 %511  ;;  %v1000_v27 = vsel %vm966_vm5, %v996_v8, %v999_v18  ;;  %v1040_v41 = vrot.slane %v4709_v26, 3 }
 0x105   : > { %v4684_v52 = vpop.permute.xlu0 %509 }
 0x10a   : > { %943 = vrot.lane.b32.xlu2 %v937_v36, %s4263_s27  ;;  %941 = vrot.lane.b32.xlu1 %v938_v54, %s4263_s27  ;;  %v1038_v36 = vrot.slane %v1030_v25, 3  ;;  %v307_v25 = vadd.f32 %v4578_v47, %v259_v57 }
 0x10b   : > { %939 = vrot.lane.b32.xlu0 %v936_v59, %s4263_s27  ;;  %v586_v59 = vadd.f32 %v571_v42, %v535_v31 }
 0x10c   : > { %v605_v63 = vpop.permute.xlu2 %604  ;;  %v518_v0 = vpop.permute.xlu1 %517 }
 0x10d   : > { %v4696_v2 = vpop.permute.xlu0 %515  ;;  %v523_v56 = vsel %vm294_vm3, %v518_v0, %v4652_v1  ;;  %v614_v0 = vadd.f32 %v605_v63, %v586_v59 }
 0x10e   : > { %v534_v48 = vadd.f32 %v523_v56, %v4633_v46  ;;  %v4735_v46 = vmul.f32 %v4721_v45, %v4568_v40  ;;  %v338_v40 = vsel %vm336_vm4, %v4521_v53, %v4598_v3  ;;  %v349_v56 = vadd.f32 %v4598_v3, %v307_v25 }
 0x112   : > { %1005 = vrot.lane.b32.xlu2 %v998_v10, %s4258_s5  ;;  %1003 = vrot.lane.b32.xlu1 %v996_v8, %s4258_s5  ;;  %v1041_v8 = vsel %vm966_vm5, %v1038_v36, %v1040_v41  ;;  %v4740_v10 = vmul.f32 %v4721_v45, %v4545_v17 }
 0x113   : > { %1001 = vrot.lane.b32.xlu0 %v995_v61, %s4258_s5  ;;  %v1039_v61 = vrot.slane %v1031_v29, 3 }
 0x114   : > { %v633_v12 = vpop.permute.xlu2 %632  ;;  %v4703_v13 = vpop.permute.xlu1 %562  ;;  %v724_v53 = vrot.slane %v4740_v10, 2 }
 0x115   : > { %v4705_v24 = vpop.permute.xlu0 %560  ;;  %v642_v26 = vadd.f32 %v633_v12, %v614_v0 }
 0x11a   : > { %1011 = vrot.lane.b32.xlu2 %v999_v18, %s4258_s5  ;;  %1009 = vrot.lane.b32.xlu1 %v997_v62, %s4258_s5  ;;  %v258_v62 = vmul.f32 %v4560_v32, %v4406_v9  ;;  %v1033_v18 = vmul.f32 %v4694_v5, %v1029_v20 }
 0x11b   : > { %1007 = vrot.lane.b32.xlu0 %v1000_v27, %s4258_s5 }
 0x11c   : > { %v661_v54 = vpop.permute.xlu2 %660  ;;  %v569_v19 = vpop.permute.xlu1 %568  ;;  %v1042_v31 = vrot.slane %v1033_v18, 3 }
 0x11d   : > { %v4728_v60 = vpop.permute.xlu0 %566  ;;  %v574_v38 = vsel %vm336_vm4, %v569_v19, %v571_v42  ;;  %v296_v42 = vsel %vm294_vm3, %v4541_v14, %v4578_v47  ;;  %v670_v14 = vadd.f32 %v661_v54, %v642_v26  ;;  %v4763_v19 = vmul.f32 %v4596_v6, %v4436_v37 }
 0x11e   : > { %v585_v1 = vadd.f32 %v574_v38, %v534_v48  ;;  %v306_v17 = vadd.f32 %v296_v42, %v258_v62  ;;  %v1072_v48 = vstv %s4724_s17  ;;  %v1043_v42 = vsel %vm966_vm5, %v1039_v61, %v1042_v31  ;;  %s3919_s17 = sld [smem:[#allocation4 + $0x24]] }
 0x11f   : > { %v1074_v62 = vmul.f32 %v4694_v5, %v1072_v48  ;;  %v1073_v0 = vmul.f32 %v1072_v48, %v4436_v37  ;;  %v573_v21 = vsel %vm336_vm4, %v4666_v22, %v4728_v60  ;;  %v4834_v22 = vmul.f32 %v4721_v45, %v4436_v37 }
 0x120   : > { %v613_v43 = vadd.f32 %v605_v63, %v585_v1  ;;  %v726_v63 = vrot.slane %v4735_v46, 2 }
 0x122   : > { %v641_v27 = vadd.f32 %v633_v12, %v613_v43  ;;  %1048 = vrot.lane.b32.xlu2 %v1041_v8, %s4259_s14  ;;  %1046 = vrot.lane.b32.xlu1 %v1039_v61, %s4259_s14  ;;  %v348_v12 = vadd.f32 %v338_v40, %v306_v17  ;;  %v1078_v61 = vrot.slane %v1074_v62, 3 }
 0x123   : > { %1044 = vrot.lane.b32.xlu0 %v1038_v36, %s4259_s14  ;;  %v372_v36 = vadd.f32 %v4618_v28, %v349_v56 }
 0x124   : > { %v689_v20 = vpop.permute.xlu2 %688  ;;  %v669_v47 = vadd.f32 %v661_v54, %v641_v27  ;;  %v4755_v29 = vpop.permute.xlu1 %602  ;;  %v4770_v54 = vmul.f32 %v4596_v6, %v4406_v9  ;;  %v371_v38 = vadd.f32 %v4618_v28, %v348_v12  ;;  %v6891_v28 = vrot.slane %v4763_v19, 1 }
 0x125   : > { %v698_v3 = vadd.f32 %v689_v20, %v670_v14  ;;  %v4765_v57 = vpop.permute.xlu0 %600  ;;  %v395_v8 = vadd.f32 %v4640_v50, %v372_v36  ;;  %v1077_v27 = vrot.slane %v1073_v0, 3  ;;  %v1096_v14 = vstv %s4758_s24  ;;  %s3920_s24 = sld [smem:[#allocation4 + $0x25]] }
 0x126   : > { %v697_v59 = vadd.f32 %v689_v20, %v669_v47  ;;  %v394_v18 = vadd.f32 %v4640_v50, %v371_v38  ;;  %v6890_v26 = vrot.slane %v4770_v54, 1  ;;  %v1098_v48 = vmul.f32 %v4694_v5, %v1096_v14 }
 0x127   : > { %v4775_v1 = vadd.f32 %v726_v63, %v698_v3  ;;  %v418_v25 = vadd.f32 %v4654_v4, %v395_v8  ;;  %v1097_v16 = vmul.f32 %v1096_v14, %v4436_v37  ;;  %v1120_v38 = vstv %s4793_s26  ;;  %s3921_s26 = sld [smem:[#allocation4 + $0x26]] }
 0x128   : > { %v4783_v43 = vadd.f32 %v724_v53, %v697_v59  ;;  %v417_v40 = vadd.f32 %v4654_v4, %v394_v18  ;;  %v470_v47 = vsel %vm462_vm1, %v6890_v26, %v469_v30  ;;  %v1102_v36 = vrot.slane %v1098_v48, 3 }
 0x129   : > { %v441_v50 = vadd.f32 %v4668_v23, %v418_v25  ;;  %v1101_v59 = vrot.slane %v1097_v16, 3  ;;  %v1122_v18 = vmul.f32 %v4694_v5, %v1120_v38  ;;  %v1121_v25 = vmul.f32 %v1120_v38, %v4436_v37 }
 0x12a   : > { %1054 = vrot.lane.b32.xlu2 %v1042_v31, %s4259_s14  ;;  %1052 = vrot.lane.b32.xlu1 %v1040_v41, %s4259_s14  ;;  %v472_v41 = vsel %vm462_vm1, %v6891_v28, %v471_v11  ;;  %v440_v4 = vadd.f32 %v4668_v23, %v417_v40  ;;  %v1079_v31 = vsel %vm966_vm5, %v1077_v27, %v1078_v61 }
 0x12b   : > { %1050 = vrot.lane.b32.xlu0 %v1043_v42, %s4259_s14  ;;  %v482_v12 = vadd.f32 %v472_v41, %v441_v50  ;;  %v522_v11 = vsel %vm294_vm3, %v4638_v49, %v4696_v2  ;;  %v6889_v50 = vrot.slane %v4834_v22, 2 }
 0x12c   : > { %v4796_v17 = vpop.permute.xlu2 %768  ;;  %v631_v56 = vpop.permute.xlu1 %630  ;;  %v481_v23 = vadd.f32 %v470_v47, %v440_v4  ;;  %v1125_v4 = vrot.slane %v1121_v25, 3 }
 0x12d   : > { %6966 = vst [vmem:[#allocation13_spill] sm:$0xff] %v4796_v17  ;;  %v4805_v20 = vpop.permute.xlu0 %628  ;;  %v533_v3 = vadd.f32 %v4696_v2, %v482_v12  ;;  %v4830_v2 = vmul.f32 %v4721_v45, %v4406_v9  ;;  %v1144_v12 = vstv %s4836_s29  ;;  %s3922_s29 = sld [smem:[#allocation4 + $0x27]] }
 0x12e   : > { %v532_v30 = vadd.f32 %v522_v11, %v481_v23  ;;  %v1145_v46 = vmul.f32 %v1144_v12, %v4436_v37 }
 0x12f   : > { %v584_v8 = vadd.f32 %v4728_v60, %v533_v3  ;;  %v1126_v60 = vrot.slane %v1122_v18, 3 }
 0x130   : > { %v583_v0 = vadd.f32 %v573_v21, %v532_v30 }
 0x131   : > { %v612_v9 = vadd.f32 %v4755_v29, %v584_v8  ;;  %v1127_v21 = vsel %vm966_vm5, %v1125_v4, %v1126_v60 }
 0x132   : > { %1084 = vrot.lane.b32.xlu2 %v1078_v61, %s4260_s19  ;;  %1082 = vrot.lane.b32.xlu1 %v1079_v31, %s4260_s19  ;;  %v611_v40 = vadd.f32 %v4755_v29, %v583_v0  ;;  %v1103_v61 = vsel %vm966_vm5, %v1101_v59, %v1102_v36  ;;  %v1211_v0 = vstv %s3912_s3  ;;  %s3923_s3 = sld [smem:[#allocation4 + $0x28]] }
 0x133   : > { %1080 = vrot.lane.b32.xlu0 %v1077_v27, %s4260_s19  ;;  %v6888_v27 = vrot.slane %v4830_v2, 2  ;;  %v640_v41 = vadd.f32 %v631_v56, %v612_v9  ;;  %v1214_v37 = vmul.f32 %v1211_v0, %v4682_v35 }
 0x134   : > { %v4826_v62 = vpop.permute.xlu2 %774  ;;  %v659_v49 = vpop.permute.xlu1 %658  ;;  %v639_v14 = vadd.f32 %v631_v56, %v611_v40  ;;  %v727_v56 = vsel %vm717_vm2, %v6889_v50, %v726_v63  ;;  %v4884_v40 = vld [vmem:[#allocation2 + $0x20] sm:$0xfe] }
 0x135   : > { %v4839_v42 = vpop.permute.xlu0 %656  ;;  %v668_v31 = vadd.f32 %v659_v49, %v640_v41  ;;  %v725_v48 = vsel %vm717_vm2, %v6888_v27, %v724_v53  ;;  %v1146_v53 = vmul.f32 %v4694_v5, %v1144_v12  ;;  %v1213_v9 = vmul.f32 %v1211_v0, %v4884_v40 }
 0x136   : > { %v667_v47 = vadd.f32 %v659_v49, %v639_v14  ;;  %v1168_v49 = vld [vmem:[#allocation2 + $0x18] sm:$0xfe]  ;;  %v1226_v14 = vrot.slane %v1214_v37, 4 }
 0x137   : > { %v1150_v63 = vrot.slane %v1146_v53, 3  ;;  %v1212_v25 = vmul.f32 %v1211_v0, %v1168_v49 }
 0x13a   : > { %1108 = vrot.lane.b32.xlu2 %v1102_v36, %s4261_s25  ;;  %1106 = vrot.lane.b32.xlu1 %v1103_v61, %s4261_s25  ;;  %v1149_v36 = vrot.slane %v1145_v46, 3  ;;  %v1224_v61 = vrot.slane %v1212_v25, 4 }
 0x13b   : > { %1104 = vrot.lane.b32.xlu0 %v1101_v59, %s4261_s25 }
 0x13c   : > { %v4851_v29 = vpop.permute.xlu2 %819  ;;  %v687_v16 = vpop.permute.xlu1 %686  ;;  %v1151_v18 = vsel %vm966_vm5, %v1149_v36, %v1150_v63 }
 0x13d   : > { %6967 = vst [vmem:[#allocation14_spill] sm:$0xff] %v4851_v29  ;;  %v4864_v11 = vpop.permute.xlu0 %684  ;;  %v695_v23 = vadd.f32 %v687_v16, %v667_v47  ;;  %v696_v3 = vadd.f32 %v687_v16, %v668_v31  ;;  %v1172_v47 = vld [vmem:[#allocation2 + $0x48] sm:$0x1]  ;;  %v1215_v16 = vmul.f32 %v1211_v0, %v4694_v5 }
 0x13f   : > { %v4867_v10 = vadd.f32 %v725_v48, %v695_v23  ;;  %v4869_v30 = vadd.f32 %v727_v56, %v696_v3  ;;  %v1225_v48 = vrot.slane %v1213_v9, 4  ;;  %v1227_v56 = vsel %vm1187_vm6, %v1224_v61, %v1226_v14 }
 0x140   : > { %v1216_v23 = vmul.f32 %v1211_v0, %v1172_v47  ;;  %v1228_v3 = vrot.slane %v1215_v16, 4 }
 0x141   : > { %6968 = vst [vmem:[#allocation15_spill] sm:$0xff] %v4867_v10 }
 0x142   : > { %6969 = vst [vmem:[#allocation16_spill] sm:$0xff] %v4869_v30  ;;  %1132 = vrot.lane.b32.xlu2 %v1126_v60, %s4262_s30  ;;  %1130 = vrot.lane.b32.xlu1 %v1127_v21, %s4262_s30  ;;  %v1230_v53 = vrot.slane %v1216_v23, 4 }
 0x143   : > { %1128 = vrot.lane.b32.xlu0 %v1125_v4, %s4262_s30  ;;  %v4894_v4 = vld [vmem:[#allocation2 + $0x50] sm:$0x1] }
 0x144   : > { %v4876_v59 = vpop.permute.xlu2 %825  ;;  %v4878_v38 = vpop.permute.xlu1 %766  ;;  %v1217_v12 = vmul.f32 %v1211_v0, %v4894_v4  ;;  %v1231_v0 = vsel %vm1187_vm6, %v1226_v14, %v1230_v53 }
 0x145   : > { %v4880_v8 = vpop.permute.xlu0 %764 }
 0x146   : > { %v1232_v21 = vrot.slane %v1217_v12, 4 }
 0x148   : > { %v1233_v25 = vsel %vm1187_vm6, %v1228_v3, %v1232_v21 }
 0x14a   : > { %1156 = vrot.lane.b32.xlu2 %v1150_v63, %s4263_s27  ;;  %1154 = vrot.lane.b32.xlu1 %v1151_v18, %s4263_s27 }
 0x14b   : > { %1152 = vrot.lane.b32.xlu0 %v1149_v36, %s4263_s27  ;;  %v1262_v36 = vstv %s3913_s6  ;;  %s3924_s6 = sld [smem:[#allocation4 + $0x29]] }
 0x14c   : > { %v4890_v41 = vpop.permute.xlu2 %859  ;;  %v4892_v60 = vpop.permute.xlu1 %772  ;;  %v1263_v37 = vmul.f32 %v1262_v36, %v1168_v49  ;;  %v1265_v9 = vmul.f32 %v1262_v36, %v4682_v35  ;;  %v1268_v53 = vmul.f32 %v1262_v36, %v4894_v4 }
 0x14d   : > { %v4896_v31 = vpop.permute.xlu0 %770 }
 0x14e   : > { %6970 = vst [vmem:[#allocation17_spill] sm:$0xff] %v4896_v31  ;;  %v1275_v16 = vrot.slane %v1263_v37, 4  ;;  %v1277_v12 = vrot.slane %v1265_v9, 4  ;;  %v1283_v37 = vrot.slane %v1268_v53, 4 }
 0x152   : > { %1238 = vrot.lane.b32.xlu2 %v1227_v56, %s4258_s5  ;;  %1236 = vrot.lane.b32.xlu1 %v1225_v48, %s4258_s5  ;;  %v1229_v56 = vsel %vm1187_vm6, %v1225_v48, %v1228_v3  ;;  %v1278_v48 = vsel %vm1187_vm6, %v1275_v16, %v1277_v12  ;;  %v1266_v3 = vmul.f32 %v1262_v36, %v4694_v5 }
 0x153   : > { %1234 = vrot.lane.b32.xlu0 %v1224_v61, %s4258_s5  ;;  %v1264_v61 = vmul.f32 %v1262_v36, %v4884_v40 }
 0x154   : > { %v4904_v46 = vpop.permute.xlu2 %887  ;;  %v4906_v63 = vpop.permute.xlu1 %817 }
 0x155   : > { %6971 = vst [vmem:[#allocation18_spill] sm:$0xff] %v4906_v63  ;;  %v4908_v18 = vpop.permute.xlu0 %815  ;;  %v1276_v14 = vrot.slane %v1264_v61, 4 }
 0x156   : > { %6972 = vst [vmem:[#allocation19_spill] sm:$0xff] %v4908_v18 }
 0x15a   : > { %1244 = vrot.lane.b32.xlu2 %v1233_v25, %s4258_s5  ;;  %1242 = vrot.lane.b32.xlu1 %v1231_v0, %s4258_s5  ;;  %v1267_v25 = vmul.f32 %v1262_v36, %v1172_v47  ;;  %v1279_v0 = vrot.slane %v1266_v3, 4 }
 0x15b   : > { %1240 = vrot.lane.b32.xlu0 %v1229_v56, %s4258_s5  ;;  %v1313_v56 = vstv %s3914_s7  ;;  %s3926_s7 = sld [smem:[#allocation4 + $0x2b]] }
 0x15c   : > { %v4918_v23 = vpop.permute.xlu2 %915  ;;  %v4920_v21 = vpop.permute.xlu1 %823  ;;  %v1281_v9 = vrot.slane %v1267_v25, 4  ;;  %v1315_v26 = vmul.f32 %v1313_v56, %v4694_v5  ;;  %v1316_v47 = vmul.f32 %v1313_v56, %v4894_v4  ;;  %v1284_v36 = vsel %vm1187_vm6, %v1279_v0, %v1283_v37 }
 0x15d   : > { %v4922_v49 = vpop.permute.xlu0 %821  ;;  %v1280_v3 = vsel %vm1187_vm6, %v1276_v14, %v1279_v0  ;;  %v1341_v37 = vstv %s3915_s20  ;;  %s3927_s20 = sld [smem:[#allocation4 + $0x2c]] }
 0x15e   : > { %6973 = vst [vmem:[#allocation20_spill] sm:$0xff] %v4922_v49  ;;  %v1321_v53 = vrot.slane %v1315_v26, 4  ;;  %v1323_v25 = vrot.slane %v1316_v47, 4  ;;  %v1343_v0 = vmul.f32 %v1341_v37, %v4694_v5  ;;  %v1344_v26 = vmul.f32 %v1341_v37, %v4894_v4 }
 0x160   : > { %v1349_v47 = vrot.slane %v1343_v0, 4 }
 0x162   : > { %1289 = vrot.lane.b32.xlu2 %v1278_v48, %s4259_s14  ;;  %1287 = vrot.lane.b32.xlu1 %v1276_v14, %s4259_s14  ;;  %v1282_v48 = vsel %vm1187_vm6, %v1277_v12, %v1281_v9  ;;  %v1324_v9 = vsel %vm1187_vm6, %v1321_v53, %v1323_v25 }
 0x163   : > { %1285 = vrot.lane.b32.xlu0 %v1275_v16, %s4259_s14  ;;  %v1314_v16 = vmul.f32 %v1313_v56, %v4884_v40  ;;  %v1342_v56 = vmul.f32 %v1341_v37, %v4884_v40 }
 0x164   : > { %v4930_v27 = vpop.permute.xlu2 %943  ;;  %v4932_v61 = vpop.permute.xlu1 %857 }
 0x165   : > { %6974 = vst [vmem:[#allocation21_spill] sm:$0xff] %v4932_v61  ;;  %v4934_v50 = vpop.permute.xlu0 %855  ;;  %v1320_v28 = vrot.slane %v1314_v16, 4  ;;  %v1369_v16 = vstv %s3916_s28  ;;  %s3928_s28 = sld [smem:[#allocation4 + $0x2d]] }
 0x166   : > { %6975 = vst [vmem:[#allocation22_spill] sm:$0xff] %v4934_v50  ;;  %v1372_v37 = vmul.f32 %v1369_v16, %v4894_v4 }
 0x167   : > { %v1322_v14 = vsel %vm1187_vm6, %v1320_v28, %v1321_v53 }
 0x16a   : > { %1295 = vrot.lane.b32.xlu2 %v1284_v36, %s4259_s14  ;;  %1293 = vrot.lane.b32.xlu1 %v1282_v48, %s4259_s14  ;;  %v1351_v36 = vrot.slane %v1344_v26, 4  ;;  %v1348_v48 = vrot.slane %v1342_v56, 4  ;;  %v1379_v26 = vrot.slane %v1372_v37, 4 }
 0x16b   : > { %1291 = vrot.lane.b32.xlu0 %v1280_v3, %s4259_s14 }
 0x16c   : > { %v4945_v50 = vpop.permute.xlu2 %1005  ;;  %v4947_v61 = vpop.permute.xlu1 %885 }
 0x16d   : > { %6976 = vst [vmem:[#allocation23_spill] sm:$0xff] %v4945_v50  ;;  %v4949_v12 = vpop.permute.xlu0 %883  ;;  %v1371_v50 = vmul.f32 %v1369_v16, %v4694_v5 }
 0x16e   : > { %6977 = vst [vmem:[#allocation24_spill] sm:$0xff] %v4947_v61 }
 0x16f   : > { %6978 = vst [vmem:[#allocation25_spill] sm:$0xff] %v4949_v12  ;;  %v1377_v0 = vrot.slane %v1371_v50, 4  ;;  %v1397_v12 = vstv %s3917_s16  ;;  %s3929_s16 = sld [smem:[#allocation4 + $0x2e]] }
 0x170   : > { %v1400_v50 = vmul.f32 %v1397_v12, %v4894_v4  ;;  %v1398_v37 = vmul.f32 %v1397_v12, %v4884_v40 }
 0x172   : > { %1329 = vrot.lane.b32.xlu2 %v1324_v9, %s4260_s19  ;;  %1327 = vrot.lane.b32.xlu1 %v1322_v14, %s4260_s19  ;;  %v1352_v9 = vsel %vm1187_vm6, %v1349_v47, %v1351_v36  ;;  %v1350_v14 = vsel %vm1187_vm6, %v1348_v48, %v1349_v47  ;;  %v1380_v47 = vsel %vm1187_vm6, %v1377_v0, %v1379_v26 }
 0x173   : > { %1325 = vrot.lane.b32.xlu0 %v1320_v28, %s4260_s19  ;;  %v1370_v28 = vmul.f32 %v1369_v16, %v4884_v40 }
 0x174   : > { %v4959_v3 = vpop.permute.xlu2 %1011  ;;  %v4961_v25 = vpop.permute.xlu1 %913 }
 0x175   : > { %6979 = vst [vmem:[#allocation26_spill] sm:$0xff] %v4961_v25  ;;  %v4963_v53 = vpop.permute.xlu0 %911  ;;  %v1376_v56 = vrot.slane %v1370_v28, 4  ;;  %v1404_v28 = vrot.slane %v1398_v37, 4 }
 0x176   : > { %6980 = vst [vmem:[#allocation27_spill] sm:$0xff] %v4963_v53 }
 0x177   : > { %v1378_v16 = vsel %vm1187_vm6, %v1376_v56, %v1377_v0  ;;  %v1425_v0 = vld [vmem:[#allocation2 + $0x18] sm:$0xfc] }
 0x17a   : > { %1357 = vrot.lane.b32.xlu2 %v1352_v9, %s4261_s25  ;;  %1355 = vrot.lane.b32.xlu1 %v1350_v14, %s4261_s25  ;;  %v1399_v9 = vmul.f32 %v1397_v12, %v4694_v5  ;;  %v1407_v14 = vrot.slane %v1400_v50, 4 }
 0x17b   : > { %1353 = vrot.lane.b32.xlu0 %v1348_v48, %s4261_s25 }
 0x17c   : > { %v4973_v53 = vpop.permute.xlu2 %1048  ;;  %v4975_v25 = vpop.permute.xlu1 %941  ;;  %v1405_v48 = vrot.slane %v1399_v9, 4 }
 0x17d   : > { %6981 = vst [vmem:[#allocation28_spill] sm:$0xff] %v4973_v53  ;;  %v4977_v36 = vpop.permute.xlu0 %939 }
 0x17e   : > { %6982 = vst [vmem:[#allocation29_spill] sm:$0xff] %v4975_v25  ;;  %v1408_v4 = vsel %vm1187_vm6, %v1405_v48, %v1407_v14  ;;  %v1406_v40 = vsel %vm1187_vm6, %v1404_v28, %v1405_v48  ;;  %v5006_v48 = vld [vmem:[#allocation2 + $0x50] sm:$0x3] }
 0x17f   : > { %6983 = vst [vmem:[#allocation30_spill] sm:$0xff] %v4977_v36  ;;  %v1466_v36 = vstv %s3919_s17  ;;  %s5177_s17 = sld [smem:[#allocation4 + $0x2f]] }
 0x180   : > { %v1467_v12 = vmul.f32 %v1466_v36, %v1425_v0  ;;  %v1470_v61 = vmul.f32 %v1466_v36, %v4694_v5 }
 0x182   : > { %1385 = vrot.lane.b32.xlu2 %v1380_v47, %s4262_s30  ;;  %1383 = vrot.lane.b32.xlu1 %v1378_v16, %s4262_s30  ;;  %v1469_v47 = vmul.f32 %v1466_v36, %v4682_v35  ;;  %v4996_v16 = vld [vmem:[#allocation2 + $0x20] sm:$0xfc]  ;;  %v1479_v9 = vrot.slane %v1467_v12, 5 }
 0x183   : > { %1381 = vrot.lane.b32.xlu0 %v1376_v56, %s4262_s30  ;;  %v1468_v56 = vmul.f32 %v1466_v36, %v4996_v16 }
 0x184   : > { %v4987_v53 = vpop.permute.xlu2 %1054  ;;  %v4989_v26 = vpop.permute.xlu1 %1003  ;;  %v1481_v50 = vrot.slane %v1469_v47, 5  ;;  %v1483_v47 = vrot.slane %v1470_v61, 5 }
 0x185   : > { %6984 = vst [vmem:[#allocation31_spill] sm:$0xff] %v4989_v26  ;;  %v4991_v25 = vpop.permute.xlu0 %1001 }
 0x186   : > { %6985 = vst [vmem:[#allocation32_spill] sm:$0xff] %v4991_v25  ;;  %v1427_v25 = vld [vmem:[#allocation2 + $0x48] sm:$0x3] }
 0x187   : > { %v1471_v12 = vmul.f32 %v1466_v36, %v1427_v25 }
 0x189   : > { %v1485_v63 = vrot.slane %v1471_v12, 5 }
 0x18a   : > { %1413 = vrot.lane.b32.xlu2 %v1408_v4, %s4263_s27  ;;  %1411 = vrot.lane.b32.xlu1 %v1406_v40, %s4263_s27  ;;  %v1480_v4 = vrot.slane %v1468_v56, 5  ;;  %v1482_v40 = vsel %vm1442_vm7, %v1479_v9, %v1481_v50  ;;  %v1517_v56 = vstv %s3920_s24  ;;  %s3931_s24 = sld [smem:[#allocation4 + $0x30]] }
 0x18b   : > { %1409 = vrot.lane.b32.xlu0 %v1404_v28, %s4263_s27  ;;  %v1472_v28 = vmul.f32 %v1466_v36, %v5006_v48  ;;  %v1486_v36 = vsel %vm1442_vm7, %v1481_v50, %v1485_v63  ;;  %v1518_v49 = vmul.f32 %v1517_v56, %v1425_v0  ;;  %v1519_v61 = vmul.f32 %v1517_v56, %v4996_v16 }
 0x18c   : > { %v5002_v37 = vpop.permute.xlu2 %1084  ;;  %v5004_v14 = vpop.permute.xlu1 %1009  ;;  %v1484_v17 = vsel %vm1442_vm7, %v1480_v4, %v1483_v47 }
 0x18d   : > { %v5008_v26 = vpop.permute.xlu0 %1007  ;;  %v1487_v18 = vrot.slane %v1472_v28, 5  ;;  %v1531_v0 = vrot.slane %v1519_v61, 5 }
 0x18e   : > { %6986 = vst [vmem:[#allocation33_spill] sm:$0xff] %v5008_v26 }
 0x18f   : > { %v1488_v29 = vsel %vm1442_vm7, %v1483_v47, %v1487_v18  ;;  %v1522_v47 = vmul.f32 %v1517_v56, %v1427_v25 }
 0x192   : > { %1493 = vrot.lane.b32.xlu2 %v1482_v40, %s4258_s5  ;;  %1491 = vrot.lane.b32.xlu1 %v1480_v4, %s4258_s5  ;;  %v1520_v40 = vmul.f32 %v1517_v56, %v4682_v35  ;;  %v1523_v4 = vmul.f32 %v1517_v56, %v5006_v48 }
 0x193   : > { %1489 = vrot.lane.b32.xlu0 %v1479_v9, %s4258_s5  ;;  %v1530_v9 = vrot.slane %v1518_v49, 5 }
 0x194   : > { %v5016_v30 = vpop.permute.xlu2 %1108  ;;  %v5018_v26 = vpop.permute.xlu1 %1046  ;;  %v1532_v28 = vrot.slane %v1520_v40, 5  ;;  %v1538_v49 = vrot.slane %v1523_v4, 5  ;;  %v1568_v40 = vstv %s3921_s26  ;;  %s3933_s26 = sld [smem:[#allocation4 + $0x32]] }
 0x195   : > { %6987 = vst [vmem:[#allocation34_spill] sm:$0xff] %v5016_v30  ;;  %v5020_v10 = vpop.permute.xlu0 %1044  ;;  %v1571_v25 = vmul.f32 %v1568_v40, %v5006_v48 }
 0x196   : > { %6988 = vst [vmem:[#allocation35_spill] sm:$0xff] %v5018_v26  ;;  %v1533_v50 = vsel %vm1442_vm7, %v1530_v9, %v1532_v28 }
 0x197   : > { %6989 = vst [vmem:[#allocation36_spill] sm:$0xff] %v5020_v10 }
 0x19a   : > { %1499 = vrot.lane.b32.xlu2 %v1488_v29, %s4258_s5  ;;  %1497 = vrot.lane.b32.xlu1 %v1486_v36, %s4258_s5  ;;  %v1521_v29 = vmul.f32 %v1517_v56, %v4694_v5  ;;  %v1536_v36 = vrot.slane %v1522_v47, 5  ;;  %v1578_v47 = vrot.slane %v1571_v25, 5 }
 0x19b   : > { %1495 = vrot.lane.b32.xlu0 %v1484_v17, %s4258_s5 }
 0x19c   : > { %v5030_v12 = vpop.permute.xlu2 %1132  ;;  %v5032_v18 = vpop.permute.xlu1 %1052  ;;  %v1534_v17 = vrot.slane %v1521_v29, 5 }
 0x19d   : > { %6990 = vst [vmem:[#allocation37_spill] sm:$0xff] %v5030_v12  ;;  %v5034_v63 = vpop.permute.xlu0 %1050 }
 0x19e   : > { %6991 = vst [vmem:[#allocation38_spill] sm:$0xff] %v5034_v63  ;;  %v1570_v63 = vmul.f32 %v1568_v40, %v4694_v5  ;;  %v1539_v56 = vsel %vm1442_vm7, %v1534_v17, %v1538_v49  ;;  %v1535_v29 = vsel %vm1442_vm7, %v1531_v0, %v1534_v17  ;;  %v1596_v49 = vstv %s3922_s29  ;;  %s3934_s29 = sld [smem:[#allocation4 + $0x33]] }
 0x19f   : > { %v1598_v17 = vmul.f32 %v1596_v49, %v4694_v5 }
 0x1a0   : > { %v1576_v4 = vrot.slane %v1570_v63, 5  ;;  %v1599_v63 = vmul.f32 %v1596_v49, %v5006_v48 }
 0x1a1   : > { %v1604_v25 = vrot.slane %v1598_v17, 5 }
 0x1a2   : > { %1544 = vrot.lane.b32.xlu2 %v1533_v50, %s4259_s14  ;;  %1542 = vrot.lane.b32.xlu1 %v1531_v0, %s4259_s14  ;;  %v1537_v50 = vsel %vm1442_vm7, %v1532_v28, %v1536_v36  ;;  %v1579_v36 = vsel %vm1442_vm7, %v1576_v4, %v1578_v47 }
 0x1a3   : > { %1540 = vrot.lane.b32.xlu0 %v1530_v9, %s4259_s14  ;;  %v1569_v9 = vmul.f32 %v1568_v40, %v4996_v16  ;;  %v1597_v40 = vmul.f32 %v1596_v49, %v4996_v16 }
 0x1a4   : > { %v5042_v10 = vpop.permute.xlu2 %1156  ;;  %v5044_v61 = vpop.permute.xlu1 %1082 }
 0x1a5   : > { %6992 = vst [vmem:[#allocation39_spill] sm:$0xff] %v5042_v10  ;;  %v5046_v26 = vpop.permute.xlu0 %1080 }
 0x1a6   : > { %6993 = vst [vmem:[#allocation40_spill] sm:$0xff] %v5044_v61 }
 0x1a7   : > { %6994 = vst [vmem:[#allocation41_spill] sm:$0xff] %v5046_v26  ;;  %v1575_v26 = vrot.slane %v1569_v9, 5  ;;  %v1624_v9 = vstv %s3923_s3  ;;  %s3935_s3 = sld [smem:[#allocation4 + $0x34]] }
 0x1a8   : > { %v1627_v49 = vmul.f32 %v1624_v9, %v5006_v48 }
 0x1a9   : > { %v1577_v0 = vsel %vm1442_vm7, %v1575_v26, %v1576_v4 }
 0x1aa   : > { %1550 = vrot.lane.b32.xlu2 %v1539_v56, %s4259_s14  ;;  %1548 = vrot.lane.b32.xlu1 %v1537_v50, %s4259_s14  ;;  %v1606_v56 = vrot.slane %v1599_v63, 5  ;;  %v1603_v50 = vrot.slane %v1597_v40, 5  ;;  %v1634_v63 = vrot.slane %v1627_v49, 5 }
 0x1ab   : > { %1546 = vrot.lane.b32.xlu0 %v1535_v29, %s4259_s14 }
 0x1ac   : > { %v5057_v61 = vpop.permute.xlu2 %1238  ;;  %v5059_v10 = vpop.permute.xlu1 %1106 }
 0x1ad   : > { %6995 = vst [vmem:[#allocation42_spill] sm:$0xff] %v5057_v61  ;;  %v5061_v28 = vpop.permute.xlu0 %1104  ;;  %v1626_v61 = vmul.f32 %v1624_v9, %v4694_v5 }
 0x1ae   : > { %6996 = vst [vmem:[#allocation43_spill] sm:$0xff] %v5059_v10 }
 0x1af   : > { %6997 = vst [vmem:[#allocation44_spill] sm:$0xff] %v5061_v28  ;;  %v1632_v17 = vrot.slane %v1626_v61, 5  ;;  %v1652_v28 = vstv %s3924_s6  ;;  %s3904_s6 = sld [smem:[#allocation4 + $0x15]] }
 0x1b0   : > { %v1655_v61 = vmul.f32 %v1652_v28, %v5006_v48  ;;  %v1653_v49 = vmul.f32 %v1652_v28, %v4996_v16 }
 0x1b2   : > { %1584 = vrot.lane.b32.xlu2 %v1579_v36, %s4260_s19  ;;  %1582 = vrot.lane.b32.xlu1 %v1577_v0, %s4260_s19  ;;  %v1607_v36 = vsel %vm1442_vm7, %v1604_v25, %v1606_v56  ;;  %v1605_v0 = vsel %vm1442_vm7, %v1603_v50, %v1604_v25  ;;  %v1635_v25 = vsel %vm1442_vm7, %v1632_v17, %v1634_v63 }
 0x1b3   : > { %1580 = vrot.lane.b32.xlu0 %v1575_v26, %s4260_s19  ;;  %v1625_v26 = vmul.f32 %v1624_v9, %v4996_v16 }
 0x1b4   : > { %v5071_v29 = vpop.permute.xlu2 %1244  ;;  %v5073_v47 = vpop.permute.xlu1 %1130 }
 0x1b5   : > { %6998 = vst [vmem:[#allocation45_spill] sm:$0xff] %v5071_v29  ;;  %v5075_v4 = vpop.permute.xlu0 %1128  ;;  %v1631_v40 = vrot.slane %v1625_v26, 5  ;;  %v1659_v26 = vrot.slane %v1653_v49, 5 }
 0x1b6   : > { %6999 = vst [vmem:[#allocation46_spill] sm:$0xff] %v5073_v47 }
 0x1b7   : > { %7000 = vst [vmem:[#allocation47_spill] sm:$0xff] %v5075_v4  ;;  %v1633_v9 = vsel %vm1442_vm7, %v1631_v40, %v1632_v17  ;;  %v1680_v17 = vld [vmem:[#allocation2 + $0x18] sm:$0xf8] }
 0x1ba   : > { %1612 = vrot.lane.b32.xlu2 %v1607_v36, %s4261_s25  ;;  %1610 = vrot.lane.b32.xlu1 %v1605_v0, %s4261_s25  ;;  %v1654_v36 = vmul.f32 %v1652_v28, %v4694_v5  ;;  %v1662_v0 = vrot.slane %v1655_v61, 5 }
 0x1bb   : > { %1608 = vrot.lane.b32.xlu0 %v1603_v50, %s4261_s25 }
 0x1bc   : > { %v5085_v4 = vpop.permute.xlu2 %1289  ;;  %v5087_v47 = vpop.permute.xlu1 %1154  ;;  %v1660_v50 = vrot.slane %v1654_v36, 5 }
 0x1bd   : > { %7001 = vst [vmem:[#allocation48_spill] sm:$0xff] %v5085_v4  ;;  %v5089_v56 = vpop.permute.xlu0 %1152 }
 0x1be   : > { %7002 = vst [vmem:[#allocation49_spill] sm:$0xff] %v5087_v47  ;;  %v1663_v48 = vsel %vm1442_vm7, %v1660_v50, %v1662_v0  ;;  %v1661_v16 = vsel %vm1442_vm7, %v1659_v26, %v1660_v50  ;;  %v5118_v50 = vld [vmem:[#allocation2 + $0x50] sm:$0x7] }
 0x1bf   : > { %7003 = vst [vmem:[#allocation50_spill] sm:$0xff] %v5089_v56  ;;  %v1721_v56 = vstv %s3926_s7  ;;  %s3936_s7 = sld [smem:[#allocation4 + $0x35]] }
 0x1c0   : > { %v1722_v28 = vmul.f32 %v1721_v56, %v1680_v17  ;;  %v1725_v10 = vmul.f32 %v1721_v56, %v4694_v5 }
 0x1c2   : > { %1640 = vrot.lane.b32.xlu2 %v1635_v25, %s4262_s30  ;;  %1638 = vrot.lane.b32.xlu1 %v1633_v9, %s4262_s30  ;;  %v1724_v25 = vmul.f32 %v1721_v56, %v4682_v35  ;;  %v5108_v9 = vld [vmem:[#allocation2 + $0x20] sm:$0xf8]  ;;  %v1734_v36 = vrot.slane %v1722_v28, 6 }
 0x1c3   : > { %1636 = vrot.lane.b32.xlu0 %v1631_v40, %s4262_s30  ;;  %v1723_v40 = vmul.f32 %v1721_v56, %v5108_v9 }
 0x1c4   : > { %v5099_v4 = vpop.permute.xlu2 %1295  ;;  %v5101_v63 = vpop.permute.xlu1 %1236  ;;  %v1736_v61 = vrot.slane %v1724_v25, 6  ;;  %v1738_v25 = vrot.slane %v1725_v10, 6 }
 0x1c5   : > { %7004 = vst [vmem:[#allocation51_spill] sm:$0xff] %v5099_v4  ;;  %v5103_v47 = vpop.permute.xlu0 %1234 }
 0x1c6   : > { %7005 = vst [vmem:[#allocation52_spill] sm:$0xff] %v5101_v63 }
 0x1c7   : > { %7006 = vst [vmem:[#allocation53_spill] sm:$0xff] %v5103_v47  ;;  %v1682_v47 = vld [vmem:[#allocation2 + $0x48] sm:$0x7] }
 0x1c8   : > { %v1726_v28 = vmul.f32 %v1721_v56, %v1682_v47 }
 0x1ca   : > { %1668 = vrot.lane.b32.xlu2 %v1663_v48, %s4263_s27  ;;  %1666 = vrot.lane.b32.xlu1 %v1661_v16, %s4263_s27  ;;  %v1735_v48 = vrot.slane %v1723_v40, 6  ;;  %v1737_v16 = vsel %vm1697_vm8, %v1734_v36, %v1736_v61  ;;  %v1740_v4 = vrot.slane %v1726_v28, 6  ;;  %v1772_v40 = vstv %s3927_s20  ;;  %s3937_s20 = sld [smem:[#allocation4 + $0x36]] }
 0x1cb   : > { %1664 = vrot.lane.b32.xlu0 %v1659_v26, %s4263_s27  ;;  %v1727_v26 = vmul.f32 %v1721_v56, %v5118_v50  ;;  %v1773_v30 = vmul.f32 %v1772_v40, %v1680_v17  ;;  %v1774_v10 = vmul.f32 %v1772_v40, %v5108_v9 }
 0x1cc   : > { %v5114_v49 = vpop.permute.xlu2 %1329  ;;  %v5116_v0 = vpop.permute.xlu1 %1242  ;;  %v1741_v56 = vsel %vm1697_vm8, %v1736_v61, %v1740_v4  ;;  %v1739_v31 = vsel %vm1697_vm8, %v1735_v48, %v1738_v25  ;;  %v1778_v61 = vmul.f32 %v1772_v40, %v5118_v50 }
 0x1cd   : > { %7007 = vst [vmem:[#allocation54_spill] sm:$0xff] %v5114_v49  ;;  %v5120_v63 = vpop.permute.xlu0 %1240  ;;  %v1742_v49 = vrot.slane %v1727_v26, 6 }
 0x1ce   : > { %7008 = vst [vmem:[#allocation55_spill] sm:$0xff] %v5116_v0 }
 0x1cf   : > { %7009 = vst [vmem:[#allocation56_spill] sm:$0xff] %v5120_v63  ;;  %v1743_v12 = vsel %vm1697_vm8, %v1738_v25, %v1742_v49  ;;  %v1793_v25 = vrot.slane %v1778_v61, 6 }
 0x1d2   : > { %1748 = vrot.lane.b32.xlu2 %v1737_v16, %s4258_s5  ;;  %1746 = vrot.lane.b32.xlu1 %v1735_v48, %s4258_s5  ;;  %v1775_v16 = vmul.f32 %v1772_v40, %v4682_v35  ;;  %v1786_v35 = vrot.slane %v1774_v10, 6  ;;  %v1777_v48 = vmul.f32 %v1772_v40, %v1682_v47 }
 0x1d3   : > { %1744 = vrot.lane.b32.xlu0 %v1734_v36, %s4258_s5  ;;  %v1785_v36 = vrot.slane %v1773_v30, 6  ;;  %v1823_v30 = vstv %s3928_s28  ;;  %s5374_s28 = sld [smem:[#allocation4 + $0x1c]] }
 0x1d4   : > { %v5128_v0 = vpop.permute.xlu2 %1357  ;;  %v5130_v63 = vpop.permute.xlu1 %1287  ;;  %v1787_v26 = vrot.slane %v1775_v16, 6  ;;  %v1825_v47 = vmul.f32 %v1823_v30, %v4694_v5 }
 0x1d5   : > { %7010 = vst [vmem:[#allocation57_spill] sm:$0xff] %v5128_v0  ;;  %v5132_v29 = vpop.permute.xlu0 %1285 }
 0x1d6   : > { %7011 = vst [vmem:[#allocation58_spill] sm:$0xff] %v5130_v63  ;;  %v1788_v17 = vsel %vm1697_vm8, %v1785_v36, %v1787_v26  ;;  %v1831_v0 = vrot.slane %v1825_v47, 6  ;;  %v4092_v47 = vld [vmem:[%s4388_s8 + $0x20] sm:$0xff] }
 0x1d7   : > { %7012 = vst [vmem:[#allocation59_spill] sm:$0xff] %v5132_v29  ;;  %v4087_v29 = vld [vmem:[%s4388_s8 + $0x8] sm:$0xff] }
 0x1da   : > { %1754 = vrot.lane.b32.xlu2 %v1743_v12, %s4258_s5  ;;  %1752 = vrot.lane.b32.xlu1 %v1741_v56, %s4258_s5  ;;  %v1776_v12 = vmul.f32 %v1772_v40, %v4694_v5  ;;  %v1791_v56 = vrot.slane %v1777_v48, 6  ;;  %v1826_v40 = vmul.f32 %v1823_v30, %v5118_v50  ;;  %v4088_v48 = vld [vmem:[%s4388_s8 + $0x18] sm:$0xff] }
 0x1db   : > { %1750 = vrot.lane.b32.xlu0 %v1739_v31, %s4258_s5  ;;  %v240_v63 = vsel %vm215_vm0, %v4088_v48, 0.0 }
 0x1dc   : > { %v5142_v28 = vpop.permute.xlu2 %1385  ;;  %v5144_v49 = vpop.permute.xlu1 %1293  ;;  %v1789_v31 = vrot.slane %v1776_v12, 6  ;;  %v1792_v61 = vsel %vm1697_vm8, %v1787_v26, %v1791_v56  ;;  %v1851_v26 = vstv %s3929_s16  ;;  %s3938_s16 = sld [smem:[#allocation4 + $0x37]] }
 0x1dd   : > { %7013 = vst [vmem:[#allocation60_spill] sm:$0xff] %v5142_v28  ;;  %v5146_v4 = vpop.permute.xlu0 %1291 }
 0x1de   : > { %7014 = vst [vmem:[#allocation61_spill] sm:$0xff] %v5144_v49  ;;  %v1794_v12 = vsel %vm1697_vm8, %v1789_v31, %v1793_v25  ;;  %v1833_v49 = vrot.slane %v1826_v40, 6  ;;  %v235_v40 = vsel %vm215_vm0, %v4092_v47, 0.0  ;;  %v1852_v47 = vmul.f32 %v1851_v26, %v5108_v9 }
 0x1df   : > { %7015 = vst [vmem:[#allocation62_spill] sm:$0xff] %v5146_v4 }
 0x1e2   : > { %1799 = vrot.lane.b32.xlu2 %v1788_v17, %s4259_s14  ;;  %1797 = vrot.lane.b32.xlu1 %v1786_v35, %s4259_s14  ;;  %v1824_v17 = vmul.f32 %v1823_v30, %v5108_v9  ;;  %v1790_v30 = vsel %vm1697_vm8, %v1786_v35, %v1789_v31  ;;  %v4091_v35 = vld [vmem:[%s4388_s8 + $0x28] sm:$0xff] }
 0x1e3   : > { %1795 = vrot.lane.b32.xlu0 %v1785_v36, %s4259_s14  ;;  %v239_v36 = vsel %vm215_vm0, %v4087_v29, 0.0  ;;  %v242_v31 = vsel %vm215_vm0, %v4091_v35, 0.0 }
 0x1e4   : > { %v5154_v16 = vpop.permute.xlu2 %1413  ;;  %v5156_v10 = vpop.permute.xlu1 %1327  ;;  %v1830_v29 = vrot.slane %v1824_v17, 6  ;;  %v241_v25 = vadd.f32 %v240_v63, %v239_v36 }
 0x1e5   : > { %7016 = vst [vmem:[#allocation63_spill] sm:$0xff] %v5154_v16  ;;  %v5158_v4 = vpop.permute.xlu0 %1325  ;;  %v4089_v16 = vld [vmem:[%s4388_s8] sm:$0xff] }
 0x1e6   : > { %7017 = vst [vmem:[#allocation64_spill] sm:$0xff] %v5156_v10  ;;  %v232_v10 = vsel %vm215_vm0, %v4089_v16, 0.0  ;;  %v1832_v63 = vsel %vm1697_vm8, %v1830_v29, %v1831_v0 }
 0x1e7   : > { %7018 = vst [vmem:[#allocation65_spill] sm:$0xff] %v5158_v4  ;;  %v4090_v4 = vld [vmem:[%s4388_s8 + $0x10] sm:$0xff] }
 0x1e8   : > { %v233_v28 = vsel %vm215_vm0, %v4090_v4, 0.0 }
 0x1e9   : > { %v234_v56 = vadd.f32 %v233_v28, %v232_v10  ;;  %v1853_v28 = vmul.f32 %v1851_v26, %v4694_v5  ;;  %v4093_v10 = vld [vmem:[%s4388_s8 + $0x38] sm:$0xff] }
 0x1ea   : > { %1805 = vrot.lane.b32.xlu2 %v1794_v12, %s4259_s14  ;;  %1803 = vrot.lane.b32.xlu1 %v1792_v61, %s4259_s14  ;;  %v1834_v12 = vsel %vm1697_vm8, %v1831_v0, %v1833_v49  ;;  %v243_v61 = vadd.f32 %v242_v31, %v241_v25  ;;  %v244_v36 = vsel %vm215_vm0, %v4093_v10, 0.0  ;;  %v1858_v49 = vrot.slane %v1852_v47, 6 }
 0x1eb   : > { %1801 = vrot.lane.b32.xlu0 %v1790_v30, %s4259_s14  ;;  %v236_v48 = vadd.f32 %v235_v40, %v234_v56  ;;  %v4094_v30 = vld [vmem:[%s4388_s8 + $0x30] sm:$0xff]  ;;  %v1859_v5 = vrot.slane %v1853_v28, 6  ;;  %v1879_v25 = vstv %s5177_s17  ;;  %v5210_v40 = vld [vmem:[#allocation2 + $0x38] sm:$0xff]  ;;  %s5396_s17 = sld [smem:[#allocation4 + $0x39]] }
 0x1ec   : > { %v5179_v4 = vpop.permute.xlu2 %1493  ;;  %v5181_v16 = vpop.permute.xlu1 %1355  ;;  %v237_v35 = vsel %vm215_vm0, %v4094_v30, 0.0 }
 0x1ed   : > { %7019 = vst [vmem:[#allocation66_spill] sm:$0xff] %v5179_v4  ;;  %v5187_v17 = vpop.permute.xlu0 %1353  ;;  %v1854_v4 = vmul.f32 %v1851_v26, %v5118_v50 }
 0x1ee   : > { %7020 = vst [vmem:[#allocation67_spill] sm:$0xff] %v5181_v16  ;;  %v238_v16 = vadd.f32 %v237_v35, %v236_v48 }
 0x1ef   : > { %7021 = vst [vmem:[#allocation68_spill] sm:$0xff] %v5187_v17  ;;  %v245_v17 = vadd.f32 %v244_v36, %v243_v61  ;;  %v1861_v0 = vrot.slane %v1854_v4, 6  ;;  %v1880_v4 = vmul.f32 %v1879_v25, %v5108_v9  ;;  %v1907_v36 = vstv %s3931_s24  ;;  %s5414_s24 = sld [smem:[#allocation4 + $0x23]] }
 0x1f0   : > { %246 = vst.msk [vmem:[#allocation3 + $0x20] sm:$0xff] %vm215_vm0, %v238_v16 }
 0x1f1   : > { %247 = vst.msk [vmem:[#allocation3 + $0x38] sm:$0xff] %vm215_vm0, %v245_v17  ;;  %v1881_v17 = vmul.f32 %v5210_v40, %v1879_v25  ;;  %v1862_v16 = vsel %vm1697_vm8, %v1859_v5, %v1861_v0  ;;  %v1910_v0 = vmul.f32 %v1907_v36, %v5118_v50 }
 0x1f2   : > { %1839 = vrot.lane.b32.xlu2 %v1834_v12, %s4260_s19  ;;  %1837 = vrot.lane.b32.xlu1 %v1832_v63, %s4260_s19  ;;  %v1882_v12 = vmul.f32 %v1879_v25, %v5118_v50  ;;  %v1886_v63 = vrot.slane %v1880_v4, 6  ;;  %v1908_v25 = vmul.f32 %v1907_v36, %v5108_v9 }
 0x1f3   : > { %1835 = vrot.lane.b32.xlu0 %v1830_v29, %s4260_s19  ;;  %v1860_v29 = vsel %vm1697_vm8, %v1858_v49, %v1859_v5  ;;  %v1887_v61 = vrot.slane %v1881_v17, 6  ;;  %v1909_v5 = vmul.f32 %v5210_v40, %v1907_v36  ;;  %v1917_v17 = vrot.slane %v1910_v0, 6 }
 0x1f4   : > { %v5204_v56 = vpop.permute.xlu2 %1499  ;;  %v5206_v31 = vpop.permute.xlu1 %1383  ;;  %v1889_v48 = vrot.slane %v1882_v12, 6  ;;  %v1914_v12 = vrot.slane %v1908_v25, 6 }
 0x1f5   : > { %7022 = vst [vmem:[#allocation69_spill] sm:$0xff] %v5206_v31  ;;  %v5208_v26 = vpop.permute.xlu0 %1381  ;;  %v1888_v47 = vsel %vm1697_vm8, %v1886_v63, %v1887_v61 }
 0x1f6   : > { %7023 = vst [vmem:[#allocation70_spill] sm:$0xff] %v5208_v26  ;;  %v1890_v35 = vsel %vm1697_vm8, %v1887_v61, %v1889_v48  ;;  %v5245_v61 = vld [vmem:[#allocation3 + $0x18] sm:$0xff]  ;;  %v1955_v48 = vstv %s3933_s26  ;;  %s5502_s26 = sld [smem:[#allocation4 + $0x3a]] }
 0x1f7   : > { %v1958_v0 = vmul.f32 %v1955_v48, %v5245_v61 }
 0x1fa   : > { %1867 = vrot.lane.b32.xlu2 %v1862_v16, %s4261_s25  ;;  %1865 = vrot.lane.b32.xlu1 %v1860_v29, %s4261_s25 }
 0x1fb   : > { %1863 = vrot.lane.b32.xlu0 %v1858_v49, %s4261_s25  ;;  %v1915_v49 = vrot.slane %v1909_v5, 6 }
 0x1fc   : > { %v5220_v28 = vpop.permute.xlu2 %1544  ;;  %v5222_v10 = vpop.permute.xlu1 %1411 }
 0x1fd   : > { %7024 = vst [vmem:[#allocation71_spill] sm:$0xff] %v5220_v28  ;;  %v5224_v30 = vpop.permute.xlu0 %1409  ;;  %v1918_v50 = vsel %vm1697_vm8, %v1915_v49, %v1917_v17  ;;  %v1916_v9 = vsel %vm1697_vm8, %v1914_v12, %v1915_v49  ;;  %v5260_v17 = vld [vmem:[#allocation3 + $0x38] sm:$0x1f]  ;;  %v5266_v28 = vld [vmem:[#allocation3 + $0x20] sm:$0xff] }
 0x1fe   : > { %7025 = vst [vmem:[#allocation72_spill] sm:$0xff] %v5222_v10 }
 0x1ff   : > { %7026 = vst [vmem:[#allocation73_spill] sm:$0xff] %v5224_v30 }
 0x202   : > { %1895 = vrot.lane.b32.xlu2 %v1890_v35, %s4262_s30  ;;  %1893 = vrot.lane.b32.xlu1 %v1888_v47, %s4262_s30  ;;  %v1935_v47 = vld [vmem:[#allocation3] sm:$0xe0] }
 0x203   : > { %1891 = vrot.lane.b32.xlu0 %v1886_v63, %s4262_s30  ;;  %v5247_v63 = vld [vmem:[#allocation3 + $0x8] sm:$0xe0]  ;;  %v1956_v49 = vmul.f32 %v1955_v48, %v1935_v47 }
 0x204   : > { %v5234_v16 = vpop.permute.xlu2 %1550  ;;  %v5236_v29 = vpop.permute.xlu1 %1491  ;;  %v1957_v25 = vmul.f32 %v1955_v48, %v5247_v63 }
 0x205   : > { %7027 = vst [vmem:[#allocation74_spill] sm:$0xff] %v5236_v29  ;;  %v5238_v4 = vpop.permute.xlu0 %1489 }
 0x206   : > { %7028 = vst [vmem:[#allocation75_spill] sm:$0xff] %v5238_v4  ;;  %v1961_v4 = vmul.f32 %v1955_v48, %v5260_v17 }
 0x20a   : > { %1923 = vrot.lane.b32.xlu2 %v1918_v50, %s4263_s27  ;;  %1921 = vrot.lane.b32.xlu1 %v1916_v9, %s4263_s27 }
 0x20b   : > { %1919 = vrot.lane.b32.xlu0 %v1914_v12, %s4263_s27  ;;  %v1939_v12 = vld [vmem:[#allocation3 + $0x30] sm:$0x1f] }
 0x20c   : > { %v5249_v36 = vpop.permute.xlu2 %1584  ;;  %v5251_v35 = vpop.permute.xlu1 %1497  ;;  %v1960_v29 = vmul.f32 %v1955_v48, %v1939_v12 }
 0x20d   : > { %7029 = vst [vmem:[#allocation76_spill] sm:$0xff] %v5249_v36  ;;  %v5253_v5 = vpop.permute.xlu0 %1495 }
 0x20e   : > { %7030 = vst [vmem:[#allocation77_spill] sm:$0xff] %v5253_v5 }
 0x212   : > { %1972 = vrot.lane.b32.xlu2 %v1958_v0, %s4258_s5  ;;  %1970 = vrot.lane.b32.xlu1 %v1957_v25, %s4258_s5  ;;  %v1959_v0 = vmul.f32 %v1955_v48, %v5266_v28  ;;  %v1996_v25 = vstv %s3934_s29  ;;  %s5603_s29 = sld [smem:[#allocation4 + $0x3b]] }
 0x213   : > { %1968 = vrot.lane.b32.xlu0 %v1956_v49, %s4258_s5  ;;  %v1999_v31 = vmul.f32 %v1996_v25, %v5245_v61  ;;  %v1998_v48 = vmul.f32 %v1996_v25, %v5247_v63  ;;  %v1997_v26 = vmul.f32 %v1996_v25, %v1935_v47  ;;  %v829_v47 = vsel %vm336_vm4, %v4920_v21, %v4876_v59 }
 0x214   : > { %v5262_v50 = vpop.permute.xlu2 %1612  ;;  %v5264_v9 = vpop.permute.xlu1 %1542 }
 0x215   : > { %7031 = vst [vmem:[#allocation78_spill] sm:$0xff] %v5262_v50  ;;  %v5268_v5 = vpop.permute.xlu0 %1540  ;;  %v2001_v50 = vmul.f32 %v1996_v25, %v1939_v12 }
 0x216   : > { %7032 = vst [vmem:[#allocation79_spill] sm:$0xff] %v5264_v9  ;;  %v4096_v9 = vld [vmem:[#allocation2 + $0x8] sm:$0xe0] }
 0x217   : > { %7033 = vst [vmem:[#allocation80_spill] sm:$0xff] %v5268_v5  ;;  %v257_v30 = vmul.f32 %v4096_v9, %v4560_v32  ;;  %v295_v9 = vsel %vm294_vm3, %v4549_v58, %v4566_v39 }
 0x21a   : > { %1978 = vrot.lane.b32.xlu2 %v1961_v4, %s4258_s5  ;;  %1976 = vrot.lane.b32.xlu1 %v1960_v29, %s4258_s5  ;;  %v4097_v4 = vld [vmem:[#allocation2] sm:$0xe0] }
 0x21b   : > { %1974 = vrot.lane.b32.xlu0 %v1959_v0, %s4258_s5  ;;  %v256_v29 = vmul.f32 %v4097_v4, %v4560_v32  ;;  %v305_v0 = vadd.f32 %v4566_v39, %v257_v30  ;;  %v337_v32 = vsel %vm336_vm4, %v4581_v51, %v4562_v33  ;;  %v4098_v4 = vld [vmem:[#allocation2 + $0x8] sm:$0xc0] }
 0x21c   : > { %v5275_v49 = vpop.permute.xlu2 %1640  ;;  %v5277_v10 = vpop.permute.xlu1 %1548  ;;  %v451_v21 = vmul.f32 %v4098_v4, %v4596_v6 }
 0x21d   : > { %7034 = vst [vmem:[#allocation81_spill] sm:$0xff] %v5275_v49  ;;  %v5280_v5 = vpop.permute.xlu0 %1546  ;;  %v778_v49 = vsel %vm294_vm3, %v4892_v60, %v4826_v62  ;;  %v304_v39 = vadd.f32 %v295_v9, %v256_v29 }
 0x21e   : > { %7035 = vst [vmem:[#allocation82_spill] sm:$0xff] %v5280_v5  ;;  %v789_v60 = vadd.f32 %v778_v49, %v4783_v43  ;;  %v2002_v5 = vmul.f32 %v1996_v25, %v5260_v17  ;;  %v2000_v43 = vmul.f32 %v1996_v25, %v5266_v28  ;;  %v4099_v49 = vld [vmem:[#allocation2] sm:$0xc0]  ;;  %v466_v9 = vrot.slane %v451_v21, 1 }
 0x21f   : > { %v346_v36 = vadd.f32 %v337_v32, %v304_v39  ;;  %v450_v29 = vmul.f32 %v4099_v49, %v4596_v6  ;;  %v2037_v25 = vstv %s3935_s3  ;;  %s5638_s3 = sld [smem:[#allocation4 + $0x2a]] }
 0x220   : > { %v2039_v21 = vmul.f32 %v2037_v25, %v5266_v28 }
 0x221   : > { %v463_v6 = vrot.slane %v450_v29, 1 }
 0x222   : > { %2013 = vrot.lane.b32.xlu2 %v1999_v31, %s4259_s14  ;;  %2011 = vrot.lane.b32.xlu1 %v1998_v48, %s4259_s14  ;;  %v347_v31 = vadd.f32 %v4562_v33, %v305_v0  ;;  %v369_v33 = vadd.f32 %v4621_v34, %v346_v36 }
 0x223   : > { %2009 = vrot.lane.b32.xlu0 %v1997_v26, %s4259_s14  ;;  %v840_v26 = vadd.f32 %v829_v47, %v789_v60 }
 0x224   : > { %v5302_v30 = vpop.permute.xlu2 %1668  ;;  %v5304_v58 = vpop.permute.xlu1 %1582  ;;  %v370_v51 = vadd.f32 %v4621_v34, %v347_v31  ;;  %v392_v12 = vadd.f32 %v4642_v55, %v369_v33  ;;  %v2040_v31 = vmul.f32 %v2037_v25, %v5260_v17  ;;  %v5346_v33 = vld [vmem:[#allocation2 + $0x30] sm:$0xff] }
 0x225   : > { %v5307_v48 = vpop.permute.xlu0 %1580  ;;  %v868_v4 = vadd.f32 %v4890_v41, %v840_v26 }
 0x226   : > { %v393_v0 = vadd.f32 %v4642_v55, %v370_v51  ;;  %v415_v36 = vadd.f32 %v4656_v7, %v392_v12  ;;  %v5337_v51 = vstv %s3904_s6  ;;  %s5654_s6 = sld [smem:[#allocation4 + $0x3c]] }
 0x227   : > { %v896_v39 = vadd.f32 %v4904_v46, %v868_v4  ;;  %v2060_v4 = vstv %s3936_s7  ;;  %s5707_s7 = sld [smem:[#allocation4 + $0x3d]] }
 0x228   : > { %v416_v47 = vadd.f32 %v4656_v7, %v393_v0  ;;  %v438_v26 = vadd.f32 %v4670_v15, %v415_v36  ;;  %v2038_v7 = vmul.f32 %v2037_v25, %v5247_v63  ;;  %v5350_v0 = vmul.f32 %v5346_v33, %v5337_v51 }
 0x22a   : > { %2019 = vrot.lane.b32.xlu2 %v2002_v5, %s4259_s14  ;;  %2017 = vrot.lane.b32.xlu1 %v2001_v50, %s4259_s14  ;;  %v439_v60 = vadd.f32 %v4670_v15, %v416_v47  ;;  %v7037_v50 = vrot.slane %v4763_v19, 1  ;;  %v521_v19 = vsel %vm294_vm3, %v4684_v52, %v4680_v44  ;;  %v924_v15 = vadd.f32 %v4918_v23, %v896_v39 }
 0x22b   : > { %2015 = vrot.lane.b32.xlu0 %v2000_v43, %s4259_s14  ;;  %v7038_v43 = vrot.slane %v4770_v54, 1  ;;  %v572_v52 = vsel %vm336_vm4, %v4705_v24, %v4703_v13 }
 0x22c   : > { %v5322_v32 = vpop.permute.xlu2 %1748  ;;  %v5324_v34 = vpop.permute.xlu1 %1610  ;;  %v468_v55 = vsel %vm462_vm1, %v466_v9, %v7037_v50  ;;  %v2063_v50 = vmul.f32 %v2060_v4, %v5260_v17 }
 0x22d   : > { %7036 = vst [vmem:[#allocation83_spill] sm:$0xff] %v5322_v32  ;;  %v5328_v5 = vpop.permute.xlu0 %1608  ;;  %v465_v49 = vsel %vm462_vm1, %v463_v6, %v7038_v43  ;;  %v480_v29 = vadd.f32 %v468_v55, %v439_v60  ;;  %v952_v60 = vadd.f32 %v4930_v27, %v924_v15  ;;  %v2062_v55 = vmul.f32 %v2060_v4, %v5266_v28 }
 0x22e   : > { %v479_v54 = vadd.f32 %v465_v49, %v438_v26  ;;  %v1015_v49 = vsel %vm294_vm3, %v5004_v14, %v4959_v3 }
 0x22f   : > { %v531_v9 = vadd.f32 %v4680_v44, %v480_v29  ;;  %v6943_v44 = vrot.slane %v5350_v0, 3 }
 0x230   : > { %v530_v25 = vadd.f32 %v521_v19, %v479_v54 }
 0x231   : > { %v582_v6 = vadd.f32 %v4703_v13, %v531_v9  ;;  %v983_v19 = vadd.f32 %v6943_v44, %v952_v60  ;;  %v7057_v44 = vld [vmem:[#allocation19_spill] sm:$0xff] }
 0x232   : > { %2048 = vrot.lane.b32.xlu2 %v2040_v31, %s4260_s19  ;;  %2046 = vrot.lane.b32.xlu1 %v2039_v21, %s4260_s19  ;;  %v581_v39 = vadd.f32 %v572_v52, %v530_v25  ;;  %v4101_v31 = vld [vmem:[#allocation2 + $0x8] sm:$0x80]  ;;  %v2061_v21 = vmul.f32 %v2060_v4, %v5247_v63 }
 0x233   : > { %2044 = vrot.lane.b32.xlu0 %v2038_v7, %s4260_s19  ;;  %v706_v24 = vmul.f32 %v4101_v31, %v4721_v45  ;;  %v610_v26 = vadd.f32 %v4765_v57, %v582_v6  ;;  %v4102_v7 = vld [vmem:[#allocation2] sm:$0x80]  ;;  %v1026_v9 = vadd.f32 %v1015_v49, %v983_v19  ;;  %v7044_v31 = vrot.slane %v4834_v22, 2 }
 0x234   : > { %v5360_v12 = vpop.permute.xlu2 %1754  ;;  %v5362_v47 = vpop.permute.xlu1 %1638  ;;  %v609_v13 = vadd.f32 %v4765_v57, %v581_v39  ;;  %v705_v43 = vmul.f32 %v4102_v7, %v4721_v45  ;;  %v1058_v45 = vsel %vm336_vm4, %v5032_v18, %v4987_v53  ;;  %v2083_v57 = vstv %s3937_s20  ;;  %s5747_s20 = sld [smem:[#allocation4 + $0x3e]] }
 0x235   : > { %7039 = vst [vmem:[#allocation84_spill] sm:$0xff] %v5362_v47  ;;  %v5365_v36 = vpop.permute.xlu0 %1636  ;;  %v638_v29 = vadd.f32 %v4805_v20, %v610_v26  ;;  %v721_v54 = vrot.slane %v706_v24, 2  ;;  %v1069_v60 = vadd.f32 %v1058_v45, %v1026_v9  ;;  %v790_v39 = vadd.f32 %v4826_v62, %v4775_v1  ;;  %v5441_v45 = vld [vmem:[#allocation3 + $0x30] sm:$0x3f]  ;;  %v7049_v9 = vld [vmem:[#allocation13_spill] sm:$0xff] }
 0x236   : > { %7040 = vst [vmem:[#allocation85_spill] sm:$0xff] %v5365_v36  ;;  %v637_v15 = vadd.f32 %v4805_v20, %v609_v13  ;;  %v718_v25 = vrot.slane %v705_v43, 2  ;;  %v5412_v26 = vstv %s5374_s28  ;;  %v7045_v13 = vrot.slane %v4830_v2, 2  ;;  %s5798_s28 = sld [smem:[#allocation4 + $0x40]] }
 0x237   : > { %v666_v14 = vadd.f32 %v4839_v42, %v638_v29  ;;  %v723_v24 = vsel %vm717_vm2, %v721_v54, %v7044_v31  ;;  %v841_v43 = vadd.f32 %v4876_v59, %v790_v39  ;;  %v1093_v62 = vadd.f32 %v5002_v37, %v1069_v60  ;;  %7047 = vst [vmem:[#allocation90_spill] sm:$0xff] %v5441_v45  ;;  %v4103_v60 = vld [vmem:[#allocation2 + $0x48] sm:$0x1]  ;;  %v5458_v39 = vld [vmem:[#allocation3] sm:$0xc0] }
 0x238   : > { %v665_v20 = vadd.f32 %v4839_v42, %v637_v15  ;;  %v720_v7 = vsel %vm717_vm2, %v718_v25, %v7045_v13  ;;  %v5425_v22 = vmul.f32 %v5210_v40, %v5337_v51  ;;  %v5430_v2 = vmul.f32 %v5346_v33, %v5412_v26  ;;  %v7053_v31 = vld [vmem:[#allocation34_spill] sm:$0xff] }
 0x239   : > { %v694_v18 = vadd.f32 %v4864_v11, %v666_v14  ;;  %v2106_v59 = vstv %s3938_s16  ;;  %v776_v29 = vsel %vm294_vm3, %v4880_v8, %v4878_v38  ;;  %v7048_v14 = vld [vmem:[#allocation17_spill] sm:$0xff]  ;;  %v7051_v8 = vld [vmem:[#allocation14_spill] sm:$0xff]  ;;  %s5885_s16 = sld [smem:[#allocation4 + $0x31]] }
 0x23a   : > { %2071 = vrot.lane.b32.xlu2 %v2063_v50, %s4261_s25  ;;  %2069 = vrot.lane.b32.xlu1 %v2062_v55, %s4261_s25  ;;  %v2086_v50 = vmul.f32 %v2083_v57, %v5260_v17  ;;  %v2085_v55 = vmul.f32 %v2083_v57, %v5266_v28  ;;  %v693_v42 = vadd.f32 %v4864_v11, %v665_v20 }
 0x23b   : > { %2067 = vrot.lane.b32.xlu0 %v2061_v21, %s4261_s25  ;;  %v2084_v21 = vmul.f32 %v2083_v57, %v5247_v63  ;;  %v735_v1 = vadd.f32 %v723_v24, %v694_v18  ;;  %v869_v11 = vadd.f32 %v4890_v41, %v841_v43  ;;  %v5444_v41 = vstv %s5396_s17  ;;  %v5446_v57 = vld [vmem:[#allocation3 + $0x8] sm:$0xc0]  ;;  %v7050_v18 = vld [vmem:[#allocation20_spill] sm:$0xff]  ;;  %s5908_s17 = sld [smem:[#allocation4 + $0x41]] }
 0x23c   : > { %v5392_v4 = vpop.permute.xlu2 %1799  ;;  %v5394_v52 = vpop.permute.xlu1 %1666  ;;  %v734_v49 = vadd.f32 %v720_v7, %v693_v42  ;;  %v777_v20 = vsel %vm294_vm3, %v7049_v9, %v7048_v14  ;;  %v1117_v24 = vadd.f32 %v7053_v31, %v1093_v62  ;;  %v2107_v42 = vmul.f32 %v2106_v59, %v5247_v63  ;;  %v7055_v9 = vld [vmem:[#allocation16_spill] sm:$0xff] }
 0x23d   : > { %7041 = vst [vmem:[#allocation86_spill] sm:$0xff] %v5392_v4  ;;  %v5399_v6 = vpop.permute.xlu0 %1664  ;;  %v786_v19 = vadd.f32 %v4878_v38, %v735_v1  ;;  %v897_v25 = vadd.f32 %v4904_v46, %v869_v11  ;;  %v828_v38 = vsel %vm336_vm4, %v7051_v8, %v7050_v18  ;;  %v2108_v46 = vmul.f32 %v2106_v59, %v5266_v28 }
 0x23e   : > { %7042 = vst [vmem:[#allocation87_spill] sm:$0xff] %v5394_v52  ;;  %v2172_v13 = vmul.f32 %v5444_v41, %v5245_v61  ;;  %v5468_v7 = vmul.f32 %v5444_v41, %v5441_v45  ;;  %v2171_v43 = vmul.f32 %v5444_v41, %v5446_v57  ;;  %v5474_v1 = vmul.f32 %v5444_v41, %v5266_v28  ;;  %v7069_v52 = vld [vmem:[#allocation45_spill] sm:$0xff] }
 0x23f   : > { %7043 = vst [vmem:[#allocation88_spill] sm:$0xff] %v5399_v6  ;;  %v785_v62 = vadd.f32 %v776_v29, %v734_v49  ;;  %v5478_v63 = vstv %s5414_s24  ;;  %v788_v8 = vadd.f32 %v7048_v14, %v7055_v9  ;;  %v7058_v49 = vld [vmem:[#allocation37_spill] sm:$0xff]  ;;  %v7062_v9 = vld [vmem:[#allocation39_spill] sm:$0xff]  ;;  %s5941_s24 = sld [smem:[#allocation4 + $0x38]] }
 0x240   : > { %v1141_v29 = vadd.f32 %v7058_v49, %v1117_v24  ;;  %v2183_v14 = vrot.slane %v2172_v13, 1  ;;  %v7059_v13 = vld [vmem:[#allocation21_spill] sm:$0xff] }
 0x242   : > { %2094 = vrot.lane.b32.xlu2 %v2086_v50, %s4262_s30  ;;  %2092 = vrot.lane.b32.xlu1 %v2085_v55, %s4262_s30  ;;  %v1179_v50 = vmul.f32 %v4103_v60, %v5412_v26  ;;  %v7056_v60 = vld [vmem:[#allocation18_spill] sm:$0xff] }
 0x243   : > { %2090 = vrot.lane.b32.xlu0 %v2084_v21, %s4262_s30  ;;  %v2109_v21 = vmul.f32 %v2106_v59, %v5260_v17  ;;  %v7054_v17 = vld [vmem:[#allocation15_spill] sm:$0xff]  ;;  %v2170_v59 = vmul.f32 %v5444_v41, %v5458_v39  ;;  %v827_v4 = vsel %vm336_vm4, %v7057_v44, %v7056_v60  ;;  %v2185_v44 = vrot.slane %v2171_v43, 1 }
 0x244   : > { %v5437_v15 = vpop.permute.xlu2 %1805  ;;  %v5439_v54 = vpop.permute.xlu1 %1746  ;;  %v787_v11 = vadd.f32 %v777_v20, %v7054_v17  ;;  %v1194_v17 = vrot.slane %v1179_v50, 4  ;;  %v1165_v20 = vadd.f32 %v7062_v9, %v1141_v29 }
 0x245   : > { %7046 = vst [vmem:[#allocation89_spill] sm:$0xff] %v5439_v54  ;;  %v5456_v55 = vpop.permute.xlu0 %1744  ;;  %v925_v54 = vadd.f32 %v4918_v23, %v897_v25  ;;  %v839_v23 = vadd.f32 %v7050_v18, %v788_v8  ;;  %v4104_v25 = vld [vmem:[#allocation2 + $0x18] sm:$0xff]  ;;  %v7061_v8 = vld [vmem:[#allocation22_spill] sm:$0xff] }
 0x246   : > { %7052 = vst [vmem:[#allocation17_spill] sm:$0xff] %v5456_v55  ;;  %v837_v55 = vadd.f32 %v7056_v60, %v786_v19  ;;  %v838_v32 = vadd.f32 %v828_v38, %v787_v11  ;;  %v836_v60 = vadd.f32 %v827_v4, %v785_v62  ;;  %v958_v38 = vmul.f32 %v4104_v25, %v5337_v51  ;;  %v4105_v11 = vld [vmem:[#allocation2 + $0x20] sm:$0xff]  ;;  %v5510_v62 = vld [vmem:[#allocation3 + $0x38] sm:$0x3f] }
 0x247   : > { %v959_v4 = vmul.f32 %v4105_v11, %v5337_v51  ;;  %v7065_v51 = vrot.slane %v5468_v7, 1  ;;  %v7066_v11 = vrot.slane %v5474_v1, 1  ;;  %v2175_v29 = vmul.f32 %v5444_v41, %v5510_v62 }
 0x248   : > { %v866_v43 = vadd.f32 %v7059_v13, %v838_v32  ;;  %v864_v25 = vadd.f32 %v7061_v8, %v836_v60  ;;  %v865_v19 = vadd.f32 %v7061_v8, %v837_v55  ;;  %v967_v8 = vrot.slane %v958_v38, 3 }
 0x249   : > { %v2187_v60 = vsel %vm462_vm1, %v2185_v44, %v7066_v11  ;;  %v7071_v44 = vld [vmem:[#allocation27_spill] sm:$0xff]  ;;  %v968_v38 = vrot.slane %v959_v4, 3 }
 0x24a   : > { %2117 = vrot.lane.b32.xlu2 %v2109_v21, %s4263_s27  ;;  %2115 = vrot.lane.b32.xlu1 %v2108_v46, %s4263_s27  ;;  %v2182_v21 = vrot.slane %v2170_v59, 1  ;;  %v953_v46 = vadd.f32 %v4930_v27, %v925_v54  ;;  %v867_v59 = vadd.f32 %v7059_v13, %v839_v23  ;;  %v7064_v27 = vrot.slane %v5430_v2, 4 }
 0x24b   : > { %2113 = vrot.lane.b32.xlu0 %v2107_v42, %s4263_s27  ;;  %v971_v42 = vrot.slane %v5425_v22, 3  ;;  %v7063_v22 = vld [vmem:[#allocation24_spill] sm:$0xff]  ;;  %v2189_v54 = vsel %vm462_vm1, %v2183_v14, %v7065_v51  ;;  %v7070_v51 = vld [vmem:[#allocation55_spill] sm:$0xff] }
 0x24c   : > { %v5498_v24 = vpop.permute.xlu2 %1839  ;;  %v5500_v50 = vpop.permute.xlu1 %1752  ;;  %v894_v6 = vadd.f32 %v7063_v22, %v866_v43  ;;  %v1195_v32 = vsel %vm1187_vm6, %v7064_v27, %v1194_v17  ;;  %v2184_v23 = vsel %vm462_vm1, %v2182_v21, %v2183_v14  ;;  %v895_v17 = vadd.f32 %v7063_v22, %v867_v59  ;;  %v7068_v43 = vld [vmem:[#allocation26_spill] sm:$0xff]  ;;  %v7073_v21 = vld [vmem:[#allocation51_spill] sm:$0xff] }
 0x24d   : > { %v5508_v18 = vpop.permute.xlu0 %1750  ;;  %v1248_v36 = vsel %vm294_vm3, %v7070_v51, %v7069_v52  ;;  %v984_v47 = vadd.f32 %v971_v42, %v953_v46  ;;  %v1208_v11 = vadd.f32 %v1195_v32, %v1165_v20  ;;  %v7075_v46 = vld [vmem:[#allocation30_spill] sm:$0xff] }
 0x24e   : > { %7060 = vst [vmem:[#allocation13_spill] sm:$0xff] %v5508_v18  ;;  %v7067_v18 = vld [vmem:[#allocation25_spill] sm:$0xff]  ;;  %v922_v27 = vadd.f32 %v7068_v43, %v894_v6  ;;  %v923_v14 = vadd.f32 %v7068_v43, %v895_v17  ;;  %v7077_v17 = vrot.slane %v5350_v0, 3 }
 0x24f   : > { %v892_v55 = vadd.f32 %v7067_v18, %v864_v25  ;;  %v893_v13 = vadd.f32 %v7067_v18, %v865_v19  ;;  %v7072_v19 = vld [vmem:[#allocation29_spill] sm:$0xff]  ;;  %v1259_v4 = vadd.f32 %v1248_v36, %v1208_v11  ;;  %v1027_v36 = vadd.f32 %v4959_v3, %v984_v47 }
 0x250   : > { %v950_v6 = vadd.f32 %v7072_v19, %v922_v27  ;;  %v7074_v18 = vld [vmem:[#allocation61_spill] sm:$0xff]  ;;  %v970_v43 = vsel %vm966_vm5, %v967_v8, %v7077_v17  ;;  %v972_v27 = vsel %vm966_vm5, %v968_v38, %v971_v42  ;;  %v951_v51 = vadd.f32 %v7072_v19, %v923_v14  ;;  %v7080_v17 = vld [vmem:[#allocation31_spill] sm:$0xff] }
 0x251   : > { %v920_v25 = vadd.f32 %v7071_v44, %v892_v55  ;;  %v921_v41 = vadd.f32 %v7071_v44, %v893_v13  ;;  %v1299_v59 = vsel %vm336_vm4, %v7074_v18, %v7073_v21  ;;  %v5554_v55 = vmul.f32 %v5346_v33, %v5478_v63 }
 0x252   : > { %2196 = vrot.lane.b32.xlu2 %v2189_v54, %s4258_s5  ;;  %2194 = vrot.lane.b32.xlu1 %v2187_v60, %s4258_s5  ;;  %v2190_v54 = vrot.slane %v2175_v29, 1  ;;  %v2220_v60 = vstv %s5502_s26  ;;  %v1310_v29 = vadd.f32 %v1299_v59, %v1259_v4  ;;  %v981_v18 = vadd.f32 %v970_v43, %v950_v6  ;;  %v4106_v59 = vld [vmem:[#allocation2 + $0x50] sm:$0x1]  ;;  %v7082_v6 = vld [vmem:[#allocation33_spill] sm:$0xff]  ;;  %v7084_v43 = vld [vmem:[#allocation54_spill] sm:$0xff]  ;;  %s6014_s26 = sld [smem:[#allocation4 + $0x42]] }
 0x253   : > { %2192 = vrot.lane.b32.xlu0 %v2184_v23, %s4258_s5  ;;  %v948_v22 = vadd.f32 %v7075_v46, %v920_v25  ;;  %v949_v13 = vadd.f32 %v7075_v46, %v921_v41  ;;  %v2223_v44 = vmul.f32 %v2220_v60, %v5245_v61  ;;  %v5567_v25 = vmul.f32 %v2220_v60, %v5441_v45 }
 0x254   : > { %v5547_v20 = vpop.permute.xlu2 %1867  ;;  %v5549_v32 = vpop.permute.xlu1 %1797  ;;  %v2222_v11 = vmul.f32 %v2220_v60, %v5446_v57  ;;  %v5571_v0 = vmul.f32 %v2220_v60, %v5266_v28  ;;  %v7079_v46 = vrot.slane %v5474_v1, 1  ;;  %v2221_v47 = vmul.f32 %v2220_v60, %v5458_v39  ;;  %v7083_v1 = vld [vmem:[#allocation23_spill] sm:$0xff] }
 0x255   : > { %7076 = vst [vmem:[#allocation20_spill] sm:$0xff] %v5549_v32  ;;  %v5560_v23 = vpop.permute.xlu0 %1795  ;;  %v979_v41 = vadd.f32 %v967_v8, %v948_v22  ;;  %v980_v42 = vadd.f32 %v968_v38, %v949_v13  ;;  %v1070_v14 = vadd.f32 %v4987_v53, %v1027_v36  ;;  %v5580_v19 = vmul.f32 %v5210_v40, %v5412_v26 }
 0x256   : > { %7078 = vst [vmem:[#allocation14_spill] sm:$0xff] %v5560_v23  ;;  %v2191_v3 = vsel %vm462_vm1, %v7079_v46, %v2190_v54  ;;  %v1180_v4 = vmul.f32 %v4106_v59, %v5412_v26  ;;  %v7081_v23 = vld [vmem:[#allocation32_spill] sm:$0xff]  ;;  %v1014_v22 = vsel %vm294_vm3, %v7083_v1, %v7082_v6  ;;  %v1338_v39 = vadd.f32 %v7084_v43, %v1310_v29 }
 0x257   : > { %v1013_v8 = vsel %vm294_vm3, %v7081_v23, %v7080_v17  ;;  %v7085_v53 = vrot.slane %v5468_v7, 1  ;;  %v2234_v38 = vrot.slane %v2223_v44, 1  ;;  %v6951_v13 = vrot.slane %v5567_v25, 1  ;;  %v7089_v23 = vld [vmem:[#allocation28_spill] sm:$0xff] }
 0x258   : > { %v2236_v36 = vrot.slane %v2222_v11, 1  ;;  %v982_v46 = vadd.f32 %v972_v27, %v951_v51  ;;  %v1023_v59 = vadd.f32 %v7080_v17, %v980_v42  ;;  %v1094_v1 = vadd.f32 %v5002_v37, %v1070_v14  ;;  %v7087_v14 = vld [vmem:[#allocation57_spill] sm:$0xff] }
 0x259   : > { %v2233_v32 = vrot.slane %v2221_v47, 1  ;;  %v1022_v7 = vadd.f32 %v1013_v8, %v979_v41  ;;  %v1024_v51 = vadd.f32 %v1014_v22, %v981_v18  ;;  %v1366_v17 = vadd.f32 %v7087_v14, %v1338_v39  ;;  %v7088_v47 = vld [vmem:[#allocation38_spill] sm:$0xff]  ;;  %v7092_v22 = vld [vmem:[#allocation36_spill] sm:$0xff] }
 0x25a   : > { %2202 = vrot.lane.b32.xlu2 %v2190_v54, %s4258_s5  ;;  %2200 = vrot.lane.b32.xlu1 %v7085_v53, %s4258_s5  ;;  %v4107_v53 = vld [vmem:[#allocation2 + $0x18] sm:$0xfe]  ;;  %v1025_v37 = vadd.f32 %v7082_v6, %v982_v46  ;;  %v1118_v42 = vadd.f32 %v7053_v31, %v1094_v1  ;;  %v1057_v41 = vsel %vm336_vm4, %v7089_v23, %v7088_v47  ;;  %v4108_v8 = vld [vmem:[#allocation2 + $0x48] sm:$0x3]  ;;  %v7090_v44 = vrot.slane %v5571_v0, 1  ;;  %v7091_v6 = vld [vmem:[#allocation35_spill] sm:$0xff] }
 0x25b   : > { %2198 = vrot.lane.b32.xlu0 %v2191_v3, %s4258_s5  ;;  %v1196_v3 = vrot.slane %v1180_v4, 4  ;;  %v5607_v11 = vmul.f32 %v4107_v53, %v5412_v26  ;;  %v1434_v4 = vmul.f32 %v4108_v8, %v5478_v63  ;;  %v2240_v53 = vsel %vm462_vm1, %v2234_v38, %v6951_v13 }
 0x25c   : > { %v5599_v29 = vpop.permute.xlu2 %1895  ;;  %v5601_v54 = vpop.permute.xlu1 %1803  ;;  %v2238_v18 = vsel %vm462_vm1, %v2236_v36, %v7090_v44  ;;  %v1056_v31 = vsel %vm336_vm4, %v7092_v22, %v7091_v6  ;;  %v1142_v39 = vadd.f32 %v7058_v49, %v1118_v42  ;;  %v2235_v46 = vsel %vm462_vm1, %v2233_v32, %v2234_v38  ;;  %v7094_v38 = vld [vmem:[#allocation60_spill] sm:$0xff] }
 0x25d   : > { %v5609_v27 = vpop.permute.xlu0 %1801  ;;  %v2226_v23 = vmul.f32 %v2220_v60, %v5510_v62  ;;  %v1068_v1 = vadd.f32 %v7088_v47, %v1025_v37  ;;  %v7093_v8 = vrot.slane %v5580_v19, 4  ;;  %v6955_v36 = vrot.slane %v5607_v11, 4  ;;  %v7095_v37 = vld [vmem:[#allocation40_spill] sm:$0xff] }
 0x25e   : > { %7086 = vst [vmem:[#allocation34_spill] sm:$0xff] %v5609_v27  ;;  %v4109_v27 = vld [vmem:[#allocation2 + $0x20] sm:$0xfe]  ;;  %v1067_v49 = vadd.f32 %v1057_v41, %v1024_v51  ;;  %v1166_v32 = vadd.f32 %v7062_v9, %v1142_v39  ;;  %v1394_v60 = vadd.f32 %v7094_v38, %v1366_v17  ;;  %v1065_v44 = vadd.f32 %v1056_v31, %v1022_v7  ;;  %v7098_v39 = vld [vmem:[#allocation43_spill] sm:$0xff] }
 0x25f   : > { %v1197_v13 = vsel %vm1187_vm6, %v7093_v8, %v1196_v3  ;;  %v5635_v45 = vmul.f32 %v4109_v27, %v5412_v26  ;;  %v1066_v3 = vadd.f32 %v7091_v6, %v1023_v59  ;;  %v6954_v26 = vrot.slane %v5554_v55, 5  ;;  %v7096_v7 = vld [vmem:[#allocation41_spill] sm:$0xff] }
 0x260   : > { %v1449_v27 = vrot.slane %v1434_v4, 5  ;;  %v1091_v42 = vadd.f32 %v7095_v37, %v1067_v49  ;;  %v1092_v51 = vadd.f32 %v7095_v37, %v1068_v1  ;;  %v2241_v17 = vrot.slane %v2226_v23, 1  ;;  %v7099_v1 = vld [vmem:[#allocation63_spill] sm:$0xff]  ;;  %v7100_v49 = vld [vmem:[#allocation44_spill] sm:$0xff] }
 0x261   : > { %v2271_v41 = vstv %s5603_s29  ;;  %v1090_v59 = vadd.f32 %v7096_v7, %v1066_v3  ;;  %v1189_v4 = vrot.slane %v5635_v45, 4  ;;  %v1209_v31 = vadd.f32 %v1197_v13, %v1166_v32  ;;  %v7101_v13 = vld [vmem:[#allocation46_spill] sm:$0xff]  ;;  %s6062_s29 = sld [smem:[#allocation4 + $0x43]] }
 0x262   : > { %2247 = vrot.lane.b32.xlu2 %v2240_v53, %s4259_s14  ;;  %2245 = vrot.lane.b32.xlu1 %v2238_v18, %s4259_s14  ;;  %v1089_v53 = vadd.f32 %v7096_v7, %v1065_v44  ;;  %v7097_v18 = vrot.slane %v5430_v2, 4  ;;  %v1116_v23 = vadd.f32 %v7098_v39, %v1092_v51  ;;  %v1422_v8 = vadd.f32 %v7099_v1, %v1394_v60 }
 0x263   : > { %2243 = vrot.lane.b32.xlu0 %v2235_v46, %s4259_s14  ;;  %v1115_v46 = vadd.f32 %v7098_v39, %v1091_v42  ;;  %v1450_v2 = vsel %vm1442_vm7, %v6954_v26, %v1449_v27  ;;  %v2274_v45 = vmul.f32 %v2271_v41, %v5510_v62  ;;  %v2273_v3 = vmul.f32 %v2271_v41, %v5266_v28 }
 0x264   : > { %v5649_v47 = vpop.permute.xlu2 %1923  ;;  %v5651_v9 = vpop.permute.xlu1 %1837  ;;  %v1191_v6 = vsel %vm1187_vm6, %v6955_v36, %v7097_v18  ;;  %v1113_v44 = vadd.f32 %v7100_v49, %v1089_v53  ;;  %v1114_v37 = vadd.f32 %v7100_v49, %v1090_v59  ;;  %v7102_v42 = vrot.slane %v5571_v0, 1  ;;  %v7103_v53 = vld [vmem:[#allocation47_spill] sm:$0xff]  ;;  %v7104_v0 = vld [vmem:[#allocation49_spill] sm:$0xff]  ;;  %v7110_v36 = vld [vmem:[#allocation52_spill] sm:$0xff] }
 0x265   : > { %v5664_v22 = vpop.permute.xlu0 %1835  ;;  %v1139_v32 = vadd.f32 %v7101_v13, %v1115_v46  ;;  %v2272_v60 = vmul.f32 %v2271_v41, %v5446_v57  ;;  %v1260_v7 = vadd.f32 %v7069_v52, %v1209_v31  ;;  %v1140_v27 = vadd.f32 %v7101_v13, %v1116_v23  ;;  %v7107_v13 = vld [vmem:[#allocation50_spill] sm:$0xff] }
 0x266   : > { %v2242_v51 = vsel %vm462_vm1, %v7102_v42, %v2241_v17  ;;  %v1137_v18 = vadd.f32 %v7103_v53, %v1113_v44  ;;  %v1503_v39 = vsel %vm294_vm3, %v5251_v35, %v5204_v56  ;;  %v5688_v26 = vstv %s5638_s3  ;;  %s6095_s3 = sld [smem:[#allocation4 + $0x44]] }
 0x267   : > { %v1138_v59 = vadd.f32 %v7103_v53, %v1114_v37  ;;  %v1163_v46 = vadd.f32 %v7104_v0, %v1139_v32  ;;  %v1463_v49 = vadd.f32 %v1450_v2, %v1422_v8  ;;  %v7105_v52 = vrot.slane %v5567_v25, 1 }
 0x268   : > { %v1164_v41 = vadd.f32 %v7104_v0, %v1140_v27  ;;  %v1554_v35 = vsel %vm336_vm4, %v5277_v10, %v5234_v16  ;;  %v2281_v31 = vrot.slane %v2274_v45, 1  ;;  %v2279_v23 = vrot.slane %v2273_v3, 1 }
 0x269   : > { %v1311_v44 = vadd.f32 %v7073_v21, %v1260_v7  ;;  %v1514_v37 = vadd.f32 %v1503_v39, %v1463_v49  ;;  %v2278_v2 = vrot.slane %v2272_v60, 1  ;;  %v2299_v25 = vstv %s5654_s6  ;;  %v4110_v21 = vld [vmem:[#allocation2 + $0x50] sm:$0x3]  ;;  %s6130_s6 = sld [smem:[#allocation4 + $0x45]] }
 0x26a   : > { %2253 = vrot.lane.b32.xlu2 %v2241_v17, %s4259_s14  ;;  %2251 = vrot.lane.b32.xlu1 %v7105_v52, %s4259_s14  ;;  %v1162_v32 = vadd.f32 %v7107_v13, %v1138_v59  ;;  %v7108_v42 = vrot.slane %v5580_v19, 4  ;;  %v5715_v45 = vmul.f32 %v5210_v40, %v5478_v63  ;;  %v1435_v3 = vmul.f32 %v4110_v21, %v5478_v63 }
 0x26b   : > { %2249 = vrot.lane.b32.xlu0 %v2242_v51, %s4259_s14  ;;  %v5722_v60 = vmul.f32 %v5346_v33, %v5688_v26  ;;  %v1161_v7 = vadd.f32 %v7107_v13, %v1137_v18  ;;  %v1339_v53 = vadd.f32 %v7084_v43, %v1311_v44  ;;  %v1565_v19 = vadd.f32 %v1554_v35, %v1514_v37  ;;  %v7111_v18 = vld [vmem:[#allocation53_spill] sm:$0xff]  ;;  %v7113_v37 = vld [vmem:[#allocation76_spill] sm:$0xff] }
 0x26c   : > { %v5702_v8 = vpop.permute.xlu2 %1972  ;;  %v5704_v17 = vpop.permute.xlu1 %1865  ;;  %v1193_v10 = vsel %vm1187_vm6, %v1189_v4, %v7108_v42  ;;  %v1206_v27 = vadd.f32 %v1191_v6, %v1163_v46  ;;  %v2282_v39 = vsel %vm462_vm1, %v2279_v23, %v2281_v31  ;;  %v2302_v59 = vmul.f32 %v2299_v25, %v5510_v62 }
 0x26d   : > { %7106 = vst [vmem:[#allocation15_spill] sm:$0xff] %v5702_v8  ;;  %v5718_v51 = vpop.permute.xlu0 %1863  ;;  %v2301_v0 = vmul.f32 %v2299_v25, %v5266_v28  ;;  %v1207_v49 = vadd.f32 %v1193_v10, %v1164_v41  ;;  %v1367_v52 = vadd.f32 %v7087_v14, %v1339_v53  ;;  %v2280_v42 = vsel %vm462_vm1, %v2278_v2, %v2279_v23  ;;  %v7114_v23 = vld [vmem:[#allocation56_spill] sm:$0xff]  ;;  %v7115_v2 = vld [vmem:[#allocation42_spill] sm:$0xff] }
 0x26e   : > { %7109 = vst [vmem:[#allocation16_spill] sm:$0xff] %v5718_v51  ;;  %v2300_v33 = vmul.f32 %v2299_v25, %v5446_v57  ;;  %v1205_v21 = vadd.f32 %v1189_v4, %v1162_v32  ;;  %v1246_v43 = vsel %vm294_vm3, %v7111_v18, %v7110_v36  ;;  %v6956_v6 = vrot.slane %v5715_v45, 5  ;;  %v7120_v18 = vld [vmem:[#allocation48_spill] sm:$0xff] }
 0x26f   : > { %v1451_v46 = vrot.slane %v1435_v3, 5  ;;  %v7112_v35 = vrot.slane %v5607_v11, 4  ;;  %v1395_v41 = vadd.f32 %v7094_v38, %v1367_v52  ;;  %v1593_v14 = vadd.f32 %v7113_v37, %v1565_v19  ;;  %v4111_v19 = vld [vmem:[#allocation2 + $0x18] sm:$0xfc] }
 0x270   : > { %v1256_v4 = vadd.f32 %v7110_v36, %v1205_v21  ;;  %v1247_v25 = vsel %vm294_vm3, %v7115_v2, %v7114_v23  ;;  %v2309_v13 = vrot.slane %v2302_v59, 1  ;;  %v2307_v11 = vrot.slane %v2301_v0, 1  ;;  %v4112_v59 = vld [vmem:[#allocation2 + $0x20] sm:$0xfc] }
 0x271   : > { %v1204_v44 = vadd.f32 %v7112_v35, %v1161_v7  ;;  %v1423_v38 = vadd.f32 %v7099_v1, %v1395_v41  ;;  %v2306_v3 = vrot.slane %v2300_v33, 1  ;;  %v2327_v7 = vstv %s5707_s7  ;;  %v7118_v33 = vld [vmem:[#allocation59_spill] sm:$0xff]  ;;  %s3954_s7 = sld [smem:[#allocation4 + $0x47]] }
 0x272   : > { %2287 = vrot.lane.b32.xlu2 %v2281_v31, %s4260_s19  ;;  %2285 = vrot.lane.b32.xlu1 %v2282_v39, %s4260_s19  ;;  %v1258_v36 = vadd.f32 %v7114_v23, %v1207_v49  ;;  %v1452_v53 = vsel %vm1442_vm7, %v6956_v6, %v1451_v46  ;;  %v5760_v39 = vmul.f32 %v4111_v19, %v5478_v63  ;;  %v7119_v49 = vld [vmem:[#allocation62_spill] sm:$0xff] }
 0x273   : > { %2283 = vrot.lane.b32.xlu0 %v2280_v42, %s4260_s19  ;;  %v1255_v32 = vadd.f32 %v1246_v43, %v1204_v44  ;;  %v5763_v0 = vmul.f32 %v4112_v59, %v5478_v63  ;;  %v1257_v52 = vadd.f32 %v1247_v25, %v1206_v27  ;;  %v7117_v42 = vld [vmem:[#allocation58_spill] sm:$0xff]  ;;  %v1298_v43 = vsel %vm336_vm4, %v7120_v18, %v7119_v49 }
 0x274   : > { %v5750_v10 = vpop.permute.xlu2 %1978  ;;  %v5752_v31 = vpop.permute.xlu1 %1893  ;;  %v1297_v21 = vsel %vm336_vm4, %v7118_v33, %v7117_v42  ;;  %v7121_v46 = vld [vmem:[#allocation78_spill] sm:$0xff]  ;;  %v2310_v23 = vsel %vm462_vm1, %v2307_v11, %v2309_v13  ;;  %v2330_v63 = vmul.f32 %v2327_v7, %v5510_v62  ;;  %v2329_v2 = vmul.f32 %v2327_v7, %v5266_v28 }
 0x275   : > { %v5765_v1 = vpop.permute.xlu0 %1891  ;;  %v1621_v35 = vadd.f32 %v7121_v46, %v1593_v14  ;;  %v4113_v44 = vld [vmem:[#allocation2 + $0x48] sm:$0x7]  ;;  %v1307_v27 = vadd.f32 %v7117_v42, %v1256_v4  ;;  %v1464_v25 = vadd.f32 %v1452_v53, %v1423_v38  ;;  %v2308_v19 = vsel %vm462_vm1, %v2306_v3, %v2307_v11 }
 0x276   : > { %7116 = vst [vmem:[#allocation18_spill] sm:$0xff] %v5765_v1  ;;  %v1689_v41 = vmul.f32 %v4113_v44, %v5688_v26  ;;  %v2328_v59 = vmul.f32 %v2327_v7, %v5446_v57  ;;  %v1306_v33 = vadd.f32 %v1297_v21, %v1255_v32  ;;  %v1309_v14 = vadd.f32 %v7119_v49, %v1258_v36  ;;  %v7122_v1 = vld [vmem:[#allocation81_spill] sm:$0xff]  ;;  %v7123_v7 = vld [vmem:[#allocation64_spill] sm:$0xff] }
 0x277   : > { %v1443_v18 = vrot.slane %v5760_v39, 5  ;;  %v1444_v44 = vrot.slane %v5763_v0, 5  ;;  %v1308_v6 = vadd.f32 %v1298_v43, %v1257_v52  ;;  %v1515_v8 = vadd.f32 %v5204_v56, %v1464_v25  ;;  %v7125_v25 = vld [vmem:[#allocation67_spill] sm:$0xff] }
 0x278   : > { %v1649_v51 = vadd.f32 %v7122_v1, %v1621_v35  ;;  %v1700_v4 = vrot.slane %v5722_v60, 6  ;;  %v1704_v11 = vrot.slane %v1689_v41, 6  ;;  %v2337_v32 = vrot.slane %v2330_v63, 1 }
 0x279   : > { %v2335_v38 = vrot.slane %v2329_v2, 1  ;;  %v2355_v3 = vstv %s5747_s20  ;;  %v1336_v36 = vadd.f32 %v7123_v7, %v1308_v6  ;;  %v1337_v53 = vadd.f32 %v7123_v7, %v1309_v14  ;;  %v4114_v6 = vld [vmem:[#allocation2 + $0x50] sm:$0x7]  ;;  %s3955_s20 = sld [smem:[#allocation4 + $0x48]] }
 0x27a   : > { %2315 = vrot.lane.b32.xlu2 %v2309_v13, %s4261_s25  ;;  %2313 = vrot.lane.b32.xlu1 %v2310_v23, %s4261_s25  ;;  %v1566_v56 = vadd.f32 %v5234_v16, %v1515_v8  ;;  %v2334_v21 = vrot.slane %v2328_v59, 1  ;;  %v7124_v13 = vld [vmem:[#allocation65_spill] sm:$0xff]  ;;  %v5804_v35 = vmul.f32 %v5210_v40, %v5688_v26  ;;  %v1690_v41 = vmul.f32 %v4114_v6, %v5688_v26 }
 0x27b   : > { %2311 = vrot.lane.b32.xlu0 %v2308_v19, %s4261_s25  ;;  %v1334_v49 = vadd.f32 %v7124_v13, %v1306_v33  ;;  %v1335_v43 = vadd.f32 %v7124_v13, %v1307_v27  ;;  %v1677_v8 = vadd.f32 %v5302_v30, %v1649_v51  ;;  %v2358_v63 = vmul.f32 %v2355_v3, %v5510_v62  ;;  %v7126_v33 = vld [vmem:[#allocation68_spill] sm:$0xff] }
 0x27c   : > { %v5794_v52 = vpop.permute.xlu2 %2013  ;;  %v5796_v42 = vpop.permute.xlu1 %1921  ;;  %v1594_v16 = vadd.f32 %v7113_v37, %v1566_v56  ;;  %v2357_v2 = vmul.f32 %v2355_v3, %v5266_v28  ;;  %v1364_v19 = vadd.f32 %v7125_v25, %v1336_v36  ;;  %v1365_v27 = vadd.f32 %v7125_v25, %v1337_v53  ;;  %v5846_v25 = vld [vmem:[#allocation3 + $0x8] sm:$0x80] }
 0x27d   : > { %v5807_v23 = vpop.permute.xlu0 %1919  ;;  %v1705_v40 = vsel %vm1697_vm8, %v1700_v4, %v1704_v11  ;;  %v2338_v59 = vsel %vm462_vm1, %v2335_v38, %v2337_v32  ;;  %v1362_v14 = vadd.f32 %v7126_v33, %v1334_v49  ;;  %v2336_v51 = vsel %vm462_vm1, %v2334_v21, %v2335_v38  ;;  %v7128_v49 = vld [vmem:[#allocation69_spill] sm:$0xff] }
 0x27e   : > { %v1622_v37 = vadd.f32 %v7121_v46, %v1594_v16  ;;  %v2356_v7 = vmul.f32 %v2355_v3, %v5446_v57  ;;  %v1363_v56 = vadd.f32 %v7126_v33, %v1335_v43  ;;  %v1702_v36 = vrot.slane %v5804_v35, 6  ;;  %v7127_v57 = vld [vmem:[#allocation70_spill] sm:$0xff] }
 0x27f   : > { %v1706_v13 = vrot.slane %v1690_v41, 6  ;;  %v1758_v53 = vsel %vm294_vm3, %v5500_v50, %v5360_v12  ;;  %v1718_v6 = vadd.f32 %v1705_v40, %v1677_v8  ;;  %v2365_v46 = vrot.slane %v2358_v63, 1  ;;  %v5843_v63 = vld [vmem:[#allocation3 + $0x30] sm:$0x7f] }
 0x280   : > { %v1650_v11 = vadd.f32 %v7122_v1, %v1622_v37  ;;  %v2363_v38 = vrot.slane %v2357_v2, 1  ;;  %v1390_v3 = vadd.f32 %v7127_v57, %v1362_v14  ;;  %v1391_v21 = vadd.f32 %v7127_v57, %v1363_v56  ;;  %v5856_v37 = vld [vmem:[#allocation3] sm:$0x80] }
 0x281   : > { %v1393_v43 = vadd.f32 %v7128_v49, %v1365_v27  ;;  %v1809_v50 = vsel %vm336_vm4, %v5601_v54, %v5437_v15  ;;  %v1769_v41 = vadd.f32 %v1758_v53, %v1718_v6  ;;  %v2362_v8 = vrot.slane %v2356_v7, 1  ;;  %v7129_v27 = vld [vmem:[#allocation73_spill] sm:$0xff]  ;;  %v7130_v54 = vld [vmem:[#allocation72_spill] sm:$0xff] }
 0x282   : > { %2343 = vrot.lane.b32.xlu2 %v2337_v32, %s4262_s30  ;;  %2341 = vrot.lane.b32.xlu1 %v2338_v59, %s4262_s30  ;;  %v1678_v1 = vadd.f32 %v5302_v30, %v1650_v11  ;;  %v2423_v2 = vstv %s5798_s28  ;;  %v1418_v40 = vadd.f32 %v7129_v27, %v1390_v3  ;;  %v1419_v59 = vadd.f32 %v7129_v27, %v1391_v21  ;;  %v7134_v27 = vld [vmem:[#allocation75_spill] sm:$0xff]  ;;  %s3946_s28 = sld [smem:[#allocation4 + $0x3f]] }
 0x283   : > { %2339 = vrot.lane.b32.xlu0 %v2336_v51, %s4262_s30  ;;  %v1421_v33 = vadd.f32 %v7130_v54, %v1393_v43  ;;  %v1707_v30 = vsel %vm1697_vm8, %v1702_v36, %v1706_v13  ;;  %v1392_v51 = vadd.f32 %v7128_v49, %v1364_v19  ;;  %v7131_v7 = vrot.slane %v5715_v45, 5 }
 0x284   : > { %v5839_v32 = vpop.permute.xlu2 %2019  ;;  %v5841_v16 = vpop.permute.xlu1 %1970  ;;  %v1820_v53 = vadd.f32 %v1809_v50, %v1769_v41  ;;  %v2366_v11 = vsel %vm462_vm1, %v2363_v38, %v2365_v46  ;;  %v2426_v6 = vmul.f32 %v2423_v2, %v5245_v61  ;;  %v5867_v57 = vmul.f32 %v2423_v2, %v5843_v63 }
 0x285   : > { %v5854_v14 = vpop.permute.xlu0 %1968  ;;  %v1448_v56 = vsel %vm1442_vm7, %v1444_v44, %v7131_v7  ;;  %v2425_v13 = vmul.f32 %v2423_v2, %v5846_v25  ;;  %v5871_v3 = vmul.f32 %v2423_v2, %v5266_v28  ;;  %v7132_v19 = vrot.slane %v5554_v55, 5  ;;  %v7133_v55 = vld [vmem:[#allocation74_spill] sm:$0xff] }
 0x286   : > { %v1719_v21 = vadd.f32 %v1707_v30, %v1678_v1  ;;  %v2364_v49 = vsel %vm462_vm1, %v2362_v8, %v2363_v38  ;;  %v2424_v43 = vmul.f32 %v2423_v2, %v5856_v37  ;;  %v1459_v61 = vadd.f32 %v1443_v18, %v1418_v40  ;;  %v7135_v8 = vld [vmem:[#allocation77_spill] sm:$0xff]  ;;  %v7136_v40 = vld [vmem:[#allocation66_spill] sm:$0xff] }
 0x287   : > { %v1446_v45 = vsel %vm1442_vm7, %v1443_v18, %v7132_v19  ;;  %v1460_v50 = vadd.f32 %v1444_v44, %v1419_v59  ;;  %v1420_v28 = vadd.f32 %v7130_v54, %v1392_v51  ;;  %v1462_v41 = vadd.f32 %v1448_v56, %v1421_v33  ;;  %v7137_v54 = vld [vmem:[#allocation79_spill] sm:$0xff] }
 0x288   : > { %v1501_v7 = vsel %vm294_vm3, %v7134_v27, %v7133_v55  ;;  %v1770_v1 = vadd.f32 %v5360_v12, %v1719_v21  ;;  %v1848_v38 = vadd.f32 %v5498_v24, %v1820_v53  ;;  %v2437_v39 = vrot.slane %v2426_v6, 2  ;;  %v7138_v12 = vld [vmem:[#allocation80_spill] sm:$0xff]  ;;  %v7139_v27 = vld [vmem:[#allocation82_spill] sm:$0xff] }
 0x289   : > { %v2442_v0 = vrot.slane %v5867_v57, 2  ;;  %v2439_v18 = vrot.slane %v2425_v13, 2  ;;  %v2440_v44 = vrot.slane %v5871_v3, 2  ;;  %v1502_v59 = vsel %vm294_vm3, %v7136_v40, %v7135_v8  ;;  %v4115_v13 = vld [vmem:[#allocation2 + $0x18] sm:$0xf8] }
 0x28a   : > { %2371 = vrot.lane.b32.xlu2 %v2365_v46, %s4263_s27  ;;  %2369 = vrot.lane.b32.xlu1 %v2366_v11, %s4263_s27  ;;  %v1552_v33 = vsel %vm336_vm4, %v7138_v12, %v7137_v54  ;;  %v1821_v46 = vadd.f32 %v5437_v15, %v1770_v1  ;;  %v2436_v56 = vrot.slane %v2424_v43, 2  ;;  %v1461_v53 = vadd.f32 %v1446_v45, %v1420_v28  ;;  %v7140_v1 = vld [vmem:[#allocation71_spill] sm:$0xff] }
 0x28b   : > { %2367 = vrot.lane.b32.xlu0 %v2364_v49, %s4263_s27  ;;  %v1510_v11 = vadd.f32 %v1501_v7, %v1459_v61  ;;  %v1511_v6 = vadd.f32 %v7133_v55, %v1460_v50  ;;  %v5912_v19 = vmul.f32 %v4115_v13, %v5688_v26  ;;  %v5916_v49 = vld [vmem:[#allocation3 + $0x38] sm:$0x7f]  ;;  %v1513_v15 = vadd.f32 %v7135_v8, %v1462_v41  ;;  %v4116_v41 = vld [vmem:[#allocation2 + $0x20] sm:$0xf8] }
 0x28c   : > { %v5904_v30 = vpop.permute.xlu2 %2048  ;;  %v5906_v51 = vpop.permute.xlu1 %1976  ;;  %v1553_v43 = vsel %vm336_vm4, %v7140_v1, %v7139_v27  ;;  %v1849_v45 = vadd.f32 %v5498_v24, %v1821_v46  ;;  %v1876_v61 = vadd.f32 %v5547_v20, %v1848_v38  ;;  %v1512_v50 = vadd.f32 %v1502_v59, %v1461_v53  ;;  %v4117_v53 = vld [vmem:[#allocation3 + $0x38] sm:$0x1f] }
 0x28d   : > { %v5914_v21 = vpop.permute.xlu0 %1974  ;;  %v1561_v28 = vadd.f32 %v1552_v33, %v1510_v11  ;;  %v2443_v55 = vsel %vm717_vm2, %v2437_v39, %v2442_v0  ;;  %v2441_v7 = vsel %vm717_vm2, %v2439_v18, %v2440_v44  ;;  %v5931_v8 = vmul.f32 %v4116_v41, %v5688_v26 }
 0x28e   : > { %v1877_v40 = vadd.f32 %v5547_v20, %v1849_v45  ;;  %v2438_v24 = vsel %vm717_vm2, %v2436_v56, %v2437_v39  ;;  %v2429_v38 = vmul.f32 %v2423_v2, %v5916_v49  ;;  %v1563_v59 = vadd.f32 %v1553_v43, %v1512_v50 }
 0x28f   : > { %v1564_v12 = vadd.f32 %v7139_v27, %v1513_v15  ;;  %v1698_v33 = vrot.slane %v5912_v19, 6  ;;  %v5939_v46 = vstv %s5885_s16  ;;  %v1904_v26 = vadd.f32 %v5599_v29, %v1876_v61  ;;  %s6237_s16 = sld [smem:[#allocation4 + $0x49]] }
 0x290   : > { %v1905_v18 = vadd.f32 %v5599_v29, %v1877_v40  ;;  %v1562_v20 = vadd.f32 %v7137_v54, %v1511_v6  ;;  %v1589_v2 = vadd.f32 %v5307_v48, %v1561_v28  ;;  %v1591_v39 = vadd.f32 %v5304_v58, %v1563_v59  ;;  %v5980_v40 = vld [vmem:[#allocation3 + $0x20] sm:$0xff] }
 0x291   : > { %v1592_v56 = vadd.f32 %v5304_v58, %v1564_v12  ;;  %v1947_v11 = vmul.f32 %v4117_v53, %v5939_v46  ;;  %v2444_v27 = vrot.slane %v2429_v38, 2  ;;  %v2474_v1 = vstv %s5908_s17  ;;  %s3957_s17 = sld [smem:[#allocation4 + $0x4a]] }
 0x292   : > { %2450 = vrot.lane.b32.xlu2 %v2443_v55, %s4258_s5  ;;  %2448 = vrot.lane.b32.xlu1 %v2441_v7, %s4258_s5  ;;  %v1933_v13 = vadd.f32 %v5649_v47, %v1905_v18  ;;  %v1590_v54 = vadd.f32 %v5307_v48, %v1562_v20  ;;  %v1619_v6 = vadd.f32 %v5324_v34, %v1591_v39  ;;  %v1699_v43 = vrot.slane %v5931_v8, 6  ;;  %v4118_v55 = vld [vmem:[#allocation3 + $0x30] sm:$0x1f]  ;;  %v5973_v7 = vld [vmem:[#allocation3 + $0x18] sm:$0xff] }
 0x293   : > { %2446 = vrot.lane.b32.xlu0 %v2438_v24, %s4258_s5  ;;  %v1701_v58 = vsel %vm1697_vm8, %v1698_v33, %v1700_v4  ;;  %v1617_v61 = vadd.f32 %v5328_v5, %v1589_v2  ;;  %v1620_v50 = vadd.f32 %v5324_v34, %v1592_v56  ;;  %v1932_v28 = vadd.f32 %v5649_v47, %v1904_v26  ;;  %v7141_v34 = vld [vmem:[#allocation84_spill] sm:$0xff]  ;;  %v7142_v26 = vld [vmem:[#allocation85_spill] sm:$0xff]  ;;  %v7143_v56 = vld [vmem:[#allocation87_spill] sm:$0xff] }
 0x294   : > { %v5954_v29 = vpop.permute.xlu2 %2071  ;;  %v5956_v15 = vpop.permute.xlu1 %2011  ;;  %v1946_v48 = vmul.f32 %v4118_v55, %v5939_v46  ;;  %v2477_v60 = vmul.f32 %v5973_v7, %v2474_v1  ;;  %v5977_v41 = vmul.f32 %v2474_v1, %v5843_v63  ;;  %v2476_v4 = vmul.f32 %v2474_v1, %v5846_v25 }
 0x295   : > { %v5967_v45 = vpop.permute.xlu0 %2009  ;;  %v5983_v24 = vmul.f32 %v5980_v40, %v2474_v1  ;;  %v1648_v47 = vadd.f32 %v7141_v34, %v1620_v50  ;;  %v1953_v38 = vadd.f32 %v1947_v11, %v1933_v13  ;;  %v2445_v59 = vsel %vm717_vm2, %v2440_v44, %v2444_v27 }
 0x296   : > { %v2475_v12 = vmul.f32 %v2474_v1, %v5856_v37  ;;  %v1618_v18 = vadd.f32 %v5328_v5, %v1590_v54  ;;  %v1645_v20 = vadd.f32 %v7142_v26, %v1617_v61  ;;  %v1647_v2 = vadd.f32 %v7141_v34, %v1619_v6  ;;  %v7144_v61 = vld [vmem:[#allocation88_spill] sm:$0xff] }
 0x297   : > { %v1982_v39 = vsel %vm294_vm3, %v5906_v51, %v5750_v10  ;;  %v1676_v53 = vadd.f32 %v7143_v56, %v1648_v47  ;;  %v5998_v50 = vstv %s5941_s24  ;;  %v1994_v3 = vadd.f32 %v5750_v10, %v1953_v38  ;;  %s3958_s24 = sld [smem:[#allocation4 + $0x4b]] }
 0x298   : > { %v1952_v11 = vadd.f32 %v1946_v48, %v1932_v28  ;;  %v2488_v5 = vrot.slane %v2477_v60, 2  ;;  %v2493_v44 = vrot.slane %v5977_v41, 2  ;;  %v2490_v13 = vrot.slane %v2476_v4, 2 }
 0x299   : > { %v2491_v51 = vrot.slane %v5983_v24, 2  ;;  %v1646_v54 = vadd.f32 %v7142_v26, %v1618_v18  ;;  %v1703_v10 = vsel %vm1697_vm8, %v1699_v43, %v1702_v36  ;;  %v1673_v28 = vadd.f32 %v7144_v61, %v1645_v20  ;;  %v7145_v36 = vld [vmem:[#allocation90_spill] sm:$0xff]  ;;  %v7146_v18 = vld [vmem:[#allocation13_spill] sm:$0xff]  ;;  %v7147_v26 = vld [vmem:[#allocation83_spill] sm:$0xff] }
 0x29a   : > { %2456 = vrot.lane.b32.xlu2 %v2444_v27, %s4258_s5  ;;  %2454 = vrot.lane.b32.xlu1 %v2442_v0, %s4258_s5  ;;  %v1993_v27 = vadd.f32 %v1982_v39, %v1952_v11  ;;  %v2487_v0 = vrot.slane %v2475_v12, 2  ;;  %v1675_v55 = vadd.f32 %v7143_v56, %v1647_v2  ;;  %v2035_v48 = vadd.f32 %v5839_v32, %v1994_v3 }
 0x29b   : > { %2452 = vrot.lane.b32.xlu0 %v2445_v59, %s4258_s5  ;;  %v1674_v4 = vadd.f32 %v7144_v61, %v1646_v54  ;;  %v6026_v24 = vmul.f32 %v5998_v50, %v7145_v36  ;;  %v6030_v34 = vmul.f32 %v5998_v50, %v5510_v62  ;;  %v1717_v38 = vadd.f32 %v1703_v10, %v1676_v53  ;;  %v7149_v54 = vld [vmem:[#allocation17_spill] sm:$0xff] }
 0x29c   : > { %v2095_v6 = vpop.permute.xlu2 %2094  ;;  %v2018_v57 = vpop.permute.xlu1 %2017  ;;  %v2058_v59 = vadd.f32 %v5904_v30, %v2035_v48  ;;  %v2494_v12 = vsel %vm717_vm2, %v2488_v5, %v2493_v44  ;;  %v1757_v20 = vsel %vm294_vm3, %v7147_v26, %v7146_v18  ;;  %v2489_v39 = vsel %vm717_vm2, %v2487_v0, %v2488_v5 }
 0x29d   : > { %v6019_v60 = vpop.permute.xlu0 %2015  ;;  %v2023_v35 = vsel %vm336_vm4, %v2018_v57, %v5839_v32  ;;  %v2492_v32 = vsel %vm717_vm2, %v2490_v13, %v2491_v51  ;;  %v2480_v62 = vmul.f32 %v2474_v1, %v5916_v49  ;;  %v1714_v56 = vadd.f32 %v1698_v33, %v1673_v28  ;;  %v7148_v13 = vld [vmem:[#allocation89_spill] sm:$0xff]  ;;  %v7151_v57 = vld [vmem:[#allocation86_spill] sm:$0xff] }
 0x29e   : > { %v2034_v47 = vadd.f32 %v2023_v35, %v1993_v27  ;;  %v1716_v53 = vadd.f32 %v1701_v58, %v1675_v55  ;;  %v1768_v3 = vadd.f32 %v7146_v18, %v1717_v38  ;;  %v2081_v11 = vadd.f32 %v5954_v29, %v2058_v59  ;;  %v7150_v27 = vld [vmem:[#allocation34_spill] sm:$0xff] }
 0x29f   : > { %v1756_v10 = vsel %vm294_vm3, %v7149_v54, %v7148_v13  ;;  %v2154_v58 = vrot.slane %v6030_v34, 1  ;;  %v2495_v55 = vrot.slane %v2480_v62, 2  ;;  %v2525_v48 = vstv %s6014_s26  ;;  %s6276_s26 = sld [smem:[#allocation4 + $0x4c]] }
 0x2a0   : > { %v2057_v2 = vadd.f32 %v5904_v30, %v2034_v47  ;;  %v1808_v30 = vsel %vm336_vm4, %v7151_v57, %v7150_v27  ;;  %v1767_v19 = vadd.f32 %v1757_v20, %v1716_v53  ;;  %v1819_v33 = vadd.f32 %v7150_v27, %v1768_v3 }
 0x2a1   : > { %v2104_v1 = vadd.f32 %v2095_v6, %v2081_v11  ;;  %v1715_v35 = vadd.f32 %v1699_v43, %v1674_v4  ;;  %v1765_v59 = vadd.f32 %v1756_v10, %v1714_v56  ;;  %v2528_v8 = vmul.f32 %v2525_v48, %v5916_v49 }
 0x2a2   : > { %v2080_v5 = vadd.f32 %v5954_v29, %v2057_v2  ;;  %2501 = vrot.lane.b32.xlu2 %v2494_v12, %s4259_s14  ;;  %2499 = vrot.lane.b32.xlu1 %v2492_v32, %s4259_s14  ;;  %v2152_v29 = vrot.slane %v6026_v24, 1  ;;  %v1818_v36 = vadd.f32 %v1808_v30, %v1767_v19  ;;  %v7152_v12 = vld [vmem:[#allocation20_spill] sm:$0xff]  ;;  %v7153_v32 = vld [vmem:[#allocation14_spill] sm:$0xff]  ;;  %v1847_v18 = vadd.f32 %v5651_v9, %v1819_v33 }
 0x2a3   : > { %2497 = vrot.lane.b32.xlu0 %v2489_v39, %s4259_s14  ;;  %v2527_v43 = vmul.f32 %v5980_v40, %v2525_v48  ;;  %v2496_v39 = vsel %vm717_vm2, %v2491_v51, %v2495_v55  ;;  %v2526_v62 = vmul.f32 %v2525_v48, %v5846_v25  ;;  %v1766_v3 = vadd.f32 %v7148_v13, %v1715_v35 }
 0x2a4   : > { %v2118_v0 = vpop.permute.xlu2 %2117  ;;  %v2103_v61 = vadd.f32 %v2095_v6, %v2080_v5  ;;  %v6059_v28 = vpop.permute.xlu1 %2046  ;;  %v1807_v6 = vsel %vm336_vm4, %v7153_v32, %v7152_v12  ;;  %v1846_v20 = vadd.f32 %v5651_v9, %v1818_v36  ;;  %v1875_v4 = vadd.f32 %v5704_v17, %v1847_v18  ;;  %v7154_v5 = vld [vmem:[#allocation16_spill] sm:$0xff]  ;;  %v4121_v18 = vld [vmem:[#allocation3] sm:$0xe0] }
 0x2a5   : > { %v2127_v47 = vadd.f32 %v2118_v0, %v2104_v1  ;;  %v6067_v38 = vpop.permute.xlu0 %2044  ;;  %v1816_v53 = vadd.f32 %v1807_v6, %v1765_v59  ;;  %v2535_v10 = vrot.slane %v2528_v8, 2  ;;  %v2533_v27 = vrot.slane %v2527_v43, 2  ;;  %v7156_v59 = vld [vmem:[#allocation15_spill] sm:$0xff] }
 0x2a6   : > { %v2126_v26 = vadd.f32 %v2118_v0, %v2103_v61  ;;  %v1874_v9 = vadd.f32 %v5704_v17, %v1846_v20  ;;  %v1903_v11 = vadd.f32 %v5752_v31, %v1875_v4  ;;  %v1945_v17 = vmul.f32 %v5980_v40, %v5939_v46  ;;  %v7155_v61 = vld [vmem:[#allocation18_spill] sm:$0xff] }
 0x2a7   : > { %v2167_v2 = vadd.f32 %v2154_v58, %v2127_v47  ;;  %v1844_v51 = vadd.f32 %v5664_v22, %v1816_v53  ;;  %v2532_v41 = vrot.slane %v2526_v62, 2  ;;  %v1817_v0 = vadd.f32 %v7152_v12, %v1766_v3 }
 0x2a8   : > { %v6083_v56 = vadd.f32 %v2152_v29, %v2126_v26  ;;  %v1902_v54 = vadd.f32 %v5752_v31, %v1874_v9  ;;  %v1931_v13 = vadd.f32 %v5796_v42, %v1903_v11  ;;  %v1944_v31 = vmul.f32 %v5973_v7, %v5939_v46 }
 0x2a9   : > { %v1872_v19 = vadd.f32 %v7154_v5, %v1844_v51  ;;  %v2536_v48 = vsel %vm717_vm2, %v2533_v27, %v2535_v10  ;;  %v1981_v32 = vsel %vm294_vm3, %v7156_v59, %v5914_v21  ;;  %v1942_v12 = vmul.f32 %v4121_v18, %v5939_v46 }
 0x2aa   : > { %2507 = vrot.lane.b32.xlu2 %v2495_v55, %s4259_s14  ;;  %2505 = vrot.lane.b32.xlu1 %v2493_v44, %s4259_s14  ;;  %v2553_v44 = vstv %s6062_s29  ;;  %v1930_v33 = vadd.f32 %v5796_v42, %v1902_v54  ;;  %v1951_v47 = vadd.f32 %v1945_v17, %v1931_v13  ;;  %v2534_v42 = vsel %vm717_vm2, %v2532_v41, %v2533_v27  ;;  %s3961_s29 = sld [smem:[#allocation4 + $0x4e]] }
 0x2ab   : > { %2503 = vrot.lane.b32.xlu0 %v2496_v39, %s4259_s14  ;;  %v1900_v55 = vadd.f32 %v7155_v61, %v1872_v19  ;;  %v2556_v35 = vmul.f32 %v2553_v44, %v5916_v49  ;;  %v2555_v36 = vmul.f32 %v5980_v40, %v2553_v44  ;;  %v2554_v6 = vmul.f32 %v2553_v44, %v5846_v25 }
 0x2ac   : > { %v6100_v57 = vpop.permute.xlu2 %2196  ;;  %v2070_v30 = vpop.permute.xlu1 %2069  ;;  %v1950_v20 = vadd.f32 %v1944_v31, %v1930_v33  ;;  %v1845_v8 = vadd.f32 %v5664_v22, %v1817_v0  ;;  %v1992_v43 = vadd.f32 %v5914_v21, %v1951_v47  ;;  %v2022_v4 = vsel %vm336_vm4, %v5794_v52, %v6019_v60 }
 0x2ad   : > { %v6107_v1 = vpop.permute.xlu0 %2067  ;;  %v1928_v26 = vadd.f32 %v5807_v23, %v1900_v55  ;;  %v2563_v62 = vrot.slane %v2556_v35, 2  ;;  %v2561_v53 = vrot.slane %v2555_v36, 2  ;;  %v2581_v9 = vstv %s6095_s3  ;;  %v4122_v35 = vld [vmem:[#allocation3 + $0x8] sm:$0xe0]  ;;  %s3962_s3 = sld [smem:[#allocation4 + $0x4f]] }
 0x2ae   : > { %v1991_v39 = vadd.f32 %v1981_v32, %v1950_v20  ;;  %v1980_v22 = vsel %vm294_vm3, %v5854_v14, %v5841_v16  ;;  %v2560_v52 = vrot.slane %v2554_v6, 2  ;;  %v6139_v11 = vmul.f32 %v5980_v40, %v5998_v50  ;;  %v4123_v6 = vld [vmem:[#allocation3] sm:$0xc0] }
 0x2af   : > { %v2136_v51 = vmul.f32 %v5973_v7, %v5998_v50  ;;  %v1948_v54 = vadd.f32 %v1942_v12, %v1928_v26  ;;  %v2033_v27 = vadd.f32 %v6019_v60, %v1992_v43  ;;  %v1873_v14 = vadd.f32 %v7154_v5, %v1845_v8 }
 0x2b0   : > { %v2021_v41 = vsel %vm336_vm4, %v5967_v45, %v5956_v15  ;;  %v2584_v44 = vmul.f32 %v2581_v9, %v5916_v49  ;;  %v2583_v19 = vmul.f32 %v5980_v40, %v2581_v9  ;;  %v2562_v0 = vsel %vm717_vm2, %v2560_v52, %v2561_v53 }
 0x2b1   : > { %v1989_v31 = vadd.f32 %v1980_v22, %v1948_v54  ;;  %v2056_v60 = vadd.f32 %v6059_v28, %v2033_v27  ;;  %v2150_v55 = vrot.slane %v6139_v11, 1  ;;  %v2582_v5 = vmul.f32 %v2581_v9, %v5846_v25 }
 0x2b2   : > { %2541 = vrot.lane.b32.xlu2 %v2535_v10, %s4260_s19  ;;  %2539 = vrot.lane.b32.xlu1 %v2536_v48, %s4260_s19  ;;  %v2032_v10 = vadd.f32 %v2022_v4, %v1991_v39  ;;  %v2147_v48 = vrot.slane %v2136_v51, 1  ;;  %v1943_v45 = vmul.f32 %v4122_v35, %v5939_v46  ;;  %v1901_v32 = vadd.f32 %v7155_v61, %v1873_v14 }
 0x2b3   : > { %2537 = vrot.lane.b32.xlu0 %v2534_v42, %s4260_s19  ;;  %v2030_v36 = vadd.f32 %v2021_v41, %v1989_v31  ;;  %v2079_v59 = vadd.f32 %v2070_v30, %v2056_v60  ;;  %v2589_v42 = vrot.slane %v2583_v19, 2  ;;  %v2134_v18 = vmul.f32 %v4123_v6, %v5998_v50 }
 0x2b4   : > { %v6135_v21 = vpop.permute.xlu2 %2202  ;;  %v2093_v3 = vpop.permute.xlu1 %2092  ;;  %v2055_v33 = vadd.f32 %v6059_v28, %v2032_v10  ;;  %v2591_v28 = vrot.slane %v2584_v44, 2  ;;  %v2609_v46 = vstv %s6130_s6  ;;  %v2155_v61 = vsel %vm462_vm1, %v2150_v55, %v2154_v58  ;;  %s3963_s6 = sld [smem:[#allocation4 + $0x50]] }
 0x2b5   : > { %v6145_v17 = vadd.f32 %v6135_v21, %v2167_v2  ;;  %v6147_v13 = vpop.permute.xlu0 %2090  ;;  %v2564_v2 = vsel %vm717_vm2, %v2561_v53, %v2563_v62  ;;  %v2053_v12 = vadd.f32 %v6067_v38, %v2030_v36  ;;  %v2102_v20 = vadd.f32 %v2093_v3, %v2079_v59 }
 0x2b6   : > { %v2078_v47 = vadd.f32 %v2070_v30, %v2055_v33  ;;  %v1929_v30 = vadd.f32 %v5807_v23, %v1901_v32  ;;  %v2588_v4 = vrot.slane %v2582_v5, 2  ;;  %v2153_v39 = vsel %vm462_vm1, %v2147_v48, %v2152_v29 }
 0x2b7   : > { %v2592_v22 = vsel %vm717_vm2, %v2589_v42, %v2591_v28  ;;  %v2612_v34 = vmul.f32 %v2609_v46, %v5916_v49  ;;  %v2611_v51 = vmul.f32 %v5980_v40, %v2609_v46  ;;  %v2610_v10 = vmul.f32 %v2609_v46, %v5846_v25 }
 0x2b8   : > { %v2101_v26 = vadd.f32 %v2093_v3, %v2078_v47  ;;  %v2146_v3 = vrot.slane %v2134_v18, 1  ;;  %v1949_v24 = vadd.f32 %v1943_v45, %v1929_v30  ;;  %v2590_v29 = vsel %vm717_vm2, %v2588_v4, %v2589_v42 }
 0x2b9   : > { %v2619_v44 = vrot.slane %v2612_v34, 2  ;;  %v2617_v19 = vrot.slane %v2611_v51, 2  ;;  %v2667_v5 = vstv %s3954_s7  ;;  %s3953_s7 = sld [smem:[#allocation4 + $0x46]] }
 0x2ba   : > { %2569 = vrot.lane.b32.xlu2 %v2563_v62, %s4261_s25  ;;  %2567 = vrot.lane.b32.xlu1 %v2564_v2, %s4261_s25  ;;  %v2076_v62 = vadd.f32 %v6107_v1, %v2053_v12  ;;  %v1990_v14 = vadd.f32 %v5841_v16, %v1949_v24  ;;  %v2148_v41 = vsel %vm462_vm1, %v2146_v3, %v2147_v48  ;;  %v2616_v2 = vrot.slane %v2610_v10, 2  ;;  %v4124_v16 = vld [vmem:[#allocation3 + $0x8] sm:$0xc0] }
 0x2bb   : > { %2565 = vrot.lane.b32.xlu0 %v2562_v0, %s4261_s25  ;;  %v6195_v0 = vld [vmem:[#allocation3 + $0x30] sm:$0xff]  ;;  %v2135_v35 = vmul.f32 %v4124_v16, %v5998_v50  ;;  %v2620_v32 = vsel %vm717_vm2, %v2617_v19, %v2619_v44 }
 0x2bc   : > { %v6170_v8 = vpop.permute.xlu2 %2247  ;;  %v2116_v43 = vpop.permute.xlu1 %2115  ;;  %v2099_v52 = vadd.f32 %v6147_v13, %v2076_v62  ;;  %v2031_v31 = vadd.f32 %v5956_v15, %v1990_v14  ;;  %v2670_v42 = vmul.f32 %v2667_v5, %v6195_v0  ;;  %v2618_v6 = vsel %vm717_vm2, %v2616_v2, %v2617_v19 }
 0x2bd   : > { %v2114_v53 = vpop.permute.xlu0 %2113  ;;  %v2124_v9 = vadd.f32 %v2116_v43, %v2101_v26  ;;  %v2125_v23 = vadd.f32 %v2116_v43, %v2102_v20  ;;  %v2149_v18 = vrot.slane %v2135_v35, 1  ;;  %v6235_v19 = vstv %s3946_s28  ;;  %s3965_s28 = sld [smem:[#allocation4 + $0x52]] }
 0x2be   : > { %v2122_v27 = vadd.f32 %v2114_v53, %v2099_v52  ;;  %v2054_v47 = vadd.f32 %v6067_v38, %v2031_v31  ;;  %v2669_v38 = vmul.f32 %v5980_v40, %v2667_v5  ;;  %v2678_v26 = vrot.slane %v2670_v42, 3 }
 0x2bf   : > { %v2165_v58 = vadd.f32 %v2155_v61, %v2125_v23  ;;  %v2164_v54 = vadd.f32 %v2153_v39, %v2124_v9  ;;  %v6217_v39 = vld [vmem:[#allocation3 + $0x38] sm:$0xff]  ;;  %v2710_v52 = vstv %s3955_s20  ;;  %s3964_s20 = sld [smem:[#allocation4 + $0x51]] }
 0x2c0   : > { %v2162_v36 = vadd.f32 %v2148_v41, %v2122_v27  ;;  %v2077_v50 = vadd.f32 %v6107_v1, %v2054_v47  ;;  %v2151_v1 = vsel %vm462_vm1, %v2149_v18, %v2150_v55  ;;  %v2677_v23 = vrot.slane %v2669_v38, 3 }
 0x2c1   : > { %v2671_v55 = vmul.f32 %v2667_v5, %v6217_v39  ;;  %v2713_v10 = vmul.f32 %v2710_v52, %v6195_v0  ;;  %v2712_v14 = vmul.f32 %v5980_v40, %v2710_v52  ;;  %v6245_v47 = vmul.f32 %v6235_v19, %v5916_v49 }
 0x2c2   : > { %2597 = vrot.lane.b32.xlu2 %v2591_v28, %s4262_s30  ;;  %2595 = vrot.lane.b32.xlu1 %v2592_v22, %s4262_s30  ;;  %v2668_v28 = vmul.f32 %v5973_v7, %v2667_v5  ;;  %v2753_v18 = vstv %s6237_s16  ;;  %s3966_s16 = sld [smem:[#allocation4 + $0x53]] }
 0x2c3   : > { %2593 = vrot.lane.b32.xlu0 %v2590_v29, %s4262_s30  ;;  %v2680_v34 = vrot.slane %v2671_v55, 3  ;;  %v2711_v29 = vmul.f32 %v5973_v7, %v2710_v52 }
 0x2c4   : > { %v6193_v33 = vpop.permute.xlu2 %2253  ;;  %v2195_v60 = vpop.permute.xlu1 %2194  ;;  %v2676_v12 = vrot.slane %v2668_v28, 3  ;;  %v2714_v28 = vmul.f32 %v2710_v52, %v6217_v39 }
 0x2c5   : > { %v2269_v45 = vadd.f32 %v6193_v33, %v6145_v17  ;;  %v2193_v48 = vpop.permute.xlu0 %2192  ;;  %v2100_v17 = vadd.f32 %v6147_v13, %v2077_v50  ;;  %v2681_v27 = vsel %vm966_vm5, %v2677_v23, %v2680_v34  ;;  %v2719_v41 = vrot.slane %v2711_v29, 3 }
 0x2c6   : > { %v2204_v59 = vsel %vm294_vm3, %v2193_v48, %v2195_v60  ;;  %v2679_v11 = vsel %vm966_vm5, %v2676_v12, %v2678_v26  ;;  %v2723_v49 = vrot.slane %v2714_v28, 3  ;;  %v2801_v29 = vstv %s3958_s24  ;;  %s3969_s24 = sld [smem:[#allocation4 + $0x56]] }
 0x2c7   : > { %v2213_v15 = vadd.f32 %v2204_v59, %v2162_v36  ;;  %v2123_v30 = vadd.f32 %v2114_v53, %v2100_v17  ;;  %v2720_v36 = vrot.slane %v2712_v14, 3 }
 0x2c9   : > { %v2163_v53 = vadd.f32 %v2151_v1, %v2123_v30 }
 0x2ca   : > { %2625 = vrot.lane.b32.xlu2 %v2619_v44, %s4263_s27  ;;  %2623 = vrot.lane.b32.xlu1 %v2620_v32, %s4263_s27  ;;  %v2721_v44 = vrot.slane %v2713_v10, 3 }
 0x2cb   : > { %2621 = vrot.lane.b32.xlu0 %v2618_v6, %s4263_s27 }
 0x2cc   : > { %v2288_v20 = vpop.permute.xlu2 %2287  ;;  %v2201_v46 = vpop.permute.xlu1 %2200 }
 0x2cd   : > { %v2297_v61 = vadd.f32 %v2288_v20, %v2269_v45  ;;  %v2199_v43 = vpop.permute.xlu0 %2198  ;;  %v2206_v4 = vsel %vm294_vm3, %v2201_v46, %v6135_v21  ;;  %v2214_v21 = vadd.f32 %v2195_v60, %v2163_v53 }
 0x2ce   : > { %v2205_v13 = vsel %vm294_vm3, %v6100_v57, %v2199_v43  ;;  %v2216_v62 = vadd.f32 %v2199_v43, %v2165_v58  ;;  %v2217_v9 = vadd.f32 %v2206_v4, %v6083_v56  ;;  %v2754_v43 = vmul.f32 %v5980_v40, %v2753_v18 }
 0x2cf   : > { %v2215_v22 = vadd.f32 %v2205_v13, %v2164_v54  ;;  %v2724_v4 = vsel %vm966_vm5, %v2720_v36, %v2723_v49 }
 0x2d2   : > { %2686 = vrot.lane.b32.xlu2 %v2679_v11, %s4258_s5  ;;  %2684 = vrot.lane.b32.xlu1 %v2677_v23, %s4258_s5 }
 0x2d3   : > { %2682 = vrot.lane.b32.xlu0 %v2676_v12, %s4258_s5 }
 0x2d4   : > { %v2316_v3 = vpop.permute.xlu2 %2315  ;;  %v2246_v57 = vpop.permute.xlu1 %2245 }
 0x2d5   : > { %v2325_v56 = vadd.f32 %v2316_v3, %v2297_v61  ;;  %v2244_v58 = vpop.permute.xlu0 %2243  ;;  %v2265_v51 = vadd.f32 %v2246_v57, %v2214_v21  ;;  %v2755_v61 = vmul.f32 %v2753_v18, %v6217_v39 }
 0x2d6   : > { %v2255_v54 = vsel %vm336_vm4, %v2244_v58, %v2246_v57 }
 0x2d7   : > { %v2264_v24 = vadd.f32 %v2255_v54, %v2213_v15  ;;  %v2722_v15 = vsel %vm966_vm5, %v2719_v41, %v2721_v44  ;;  %v2759_v13 = vrot.slane %v2755_v61, 3  ;;  %v2392_v61 = vmul.f32 %v6235_v19, %v5843_v63 }
 0x2da   : > { %2692 = vrot.lane.b32.xlu2 %v2680_v34, %s4258_s5  ;;  %2690 = vrot.lane.b32.xlu1 %v2678_v26, %s4258_s5 }
 0x2db   : > { %2688 = vrot.lane.b32.xlu0 %v2681_v27, %s4258_s5 }
 0x2dc   : > { %v2344_v31 = vpop.permute.xlu2 %2343  ;;  %v2252_v60 = vpop.permute.xlu1 %2251 }
 0x2dd   : > { %v2353_v2 = vadd.f32 %v2344_v31, %v2325_v56  ;;  %v2250_v5 = vpop.permute.xlu0 %2249  ;;  %v2257_v16 = vsel %vm336_vm4, %v2252_v60, %v6193_v33 }
 0x2de   : > { %v2256_v35 = vsel %vm336_vm4, %v6170_v8, %v2250_v5  ;;  %v2267_v45 = vadd.f32 %v2250_v5, %v2216_v62  ;;  %v2268_v48 = vadd.f32 %v2257_v16, %v2217_v9  ;;  %v2408_v8 = vrot.slane %v6245_v47, 2 }
 0x2df   : > { %v2266_v59 = vadd.f32 %v2256_v35, %v2215_v22  ;;  %v2758_v62 = vrot.slane %v2754_v43, 3  ;;  %v2777_v22 = vstv %s3957_s17  ;;  %v2802_v5 = vmul.f32 %v5980_v40, %v2801_v29  ;;  %s3968_s17 = sld [smem:[#allocation4 + $0x55]] }
 0x2e0   : > { %v2296_v32 = vadd.f32 %v2288_v20, %v2268_v48  ;;  %v2779_v34 = vmul.f32 %v2777_v22, %v6217_v39  ;;  %v2778_v52 = vmul.f32 %v5980_v40, %v2777_v22  ;;  %v2389_v16 = vmul.f32 %v6235_v19, %v5846_v25 }
 0x2e1   : > { %v2760_v57 = vsel %vm966_vm5, %v2758_v62, %v2759_v13  ;;  %v2390_v48 = vmul.f32 %v5973_v7, %v6235_v19 }
 0x2e2   : > { %2729 = vrot.lane.b32.xlu2 %v2722_v15, %s4259_s14  ;;  %2727 = vrot.lane.b32.xlu1 %v2720_v36, %s4259_s14  ;;  %v2324_v33 = vadd.f32 %v2316_v3, %v2296_v32  ;;  %v2783_v56 = vrot.slane %v2779_v34, 3  ;;  %v2782_v58 = vrot.slane %v2778_v52, 3  ;;  %v2403_v32 = vrot.slane %v2389_v16, 2  ;;  %v6319_v52 = vld [vmem:[#allocation3 + $0x38] sm:$0xff] }
 0x2e3   : > { %2725 = vrot.lane.b32.xlu0 %v2719_v41, %s4259_s14 }
 0x2e4   : > { %v2372_v42 = vpop.permute.xlu2 %2371  ;;  %v2352_v6 = vadd.f32 %v2344_v31, %v2324_v33  ;;  %v2286_v50 = vpop.permute.xlu1 %2285  ;;  %v2784_v60 = vsel %vm966_vm5, %v2782_v58, %v2783_v56  ;;  %v2825_v33 = vstv %s6276_s26  ;;  %s3970_s26 = sld [smem:[#allocation4 + $0x57]] }
 0x2e5   : > { %v2381_v38 = vadd.f32 %v2372_v42, %v2353_v2  ;;  %v2284_v17 = vpop.permute.xlu0 %2283  ;;  %v2294_v12 = vadd.f32 %v2286_v50, %v2266_v59  ;;  %v2295_v26 = vadd.f32 %v2286_v50, %v2267_v45  ;;  %v2803_v2 = vmul.f32 %v2801_v29, %v6217_v39 }
 0x2e6   : > { %v6254_v20 = vadd.f32 %v2372_v42, %v2352_v6  ;;  %v2292_v46 = vadd.f32 %v2284_v17, %v2264_v24  ;;  %v2293_v1 = vadd.f32 %v2284_v17, %v2265_v51  ;;  %v2391_v24 = vmul.f32 %v5980_v40, %v6235_v19 }
 0x2e7   : > { %v2421_v30 = vadd.f32 %v2408_v8, %v2381_v38  ;;  %v2388_v45 = vmul.f32 %v6235_v19, %v5856_v37  ;;  %v2807_v36 = vrot.slane %v2803_v2, 3  ;;  %v2806_v59 = vrot.slane %v2802_v5, 3 }
 0x2e8   : > { %v2404_v35 = vrot.slane %v2391_v24, 2  ;;  %v6325_v24 = vld [vmem:[#allocation3 + $0x50] sm:$0x1] }
 0x2e9   : > { %v2400_v50 = vrot.slane %v2388_v45, 2  ;;  %v2808_v17 = vsel %vm966_vm5, %v2806_v59, %v2807_v36 }
 0x2ea   : > { %2735 = vrot.lane.b32.xlu2 %v2723_v49, %s4259_s14  ;;  %2733 = vrot.lane.b32.xlu1 %v2721_v44, %s4259_s14  ;;  %v2409_v25 = vsel %vm717_vm2, %v2404_v35, %v2408_v8  ;;  %v2401_v49 = vrot.slane %v2390_v48, 2  ;;  %v2405_v47 = vsel %vm717_vm2, %v2403_v32, %v2404_v35 }
 0x2eb   : > { %2731 = vrot.lane.b32.xlu0 %v2724_v4, %s4259_s14 }
 0x2ec   : > { %v6264_v9 = vpop.permute.xlu2 %2450  ;;  %v2314_v23 = vpop.permute.xlu1 %2313  ;;  %v2402_v8 = vsel %vm717_vm2, %v2400_v50, %v2401_v49 }
 0x2ed   : > { %v2312_v11 = vpop.permute.xlu0 %2311  ;;  %v2322_v55 = vadd.f32 %v2314_v23, %v2294_v12  ;;  %v2323_v53 = vadd.f32 %v2314_v23, %v2295_v26  ;;  %v2827_v12 = vmul.f32 %v2825_v33, %v6217_v39  ;;  %v2826_v26 = vmul.f32 %v5980_v40, %v2825_v33  ;;  %v6309_v40 = vld [vmem:[#allocation3 + $0x18] sm:$0xfe] }
 0x2ee   : > { %v2320_v21 = vadd.f32 %v2312_v11, %v2292_v46  ;;  %v2321_v3 = vadd.f32 %v2312_v11, %v2293_v1  ;;  %v2942_v33 = vstv %s3962_s3  ;;  %s3971_s3 = sld [smem:[#allocation4 + $0x58]] }
 0x2ef   : > { %v2831_v1 = vrot.slane %v2827_v12, 3 }
 0x2f2   : > { %2765 = vrot.lane.b32.xlu2 %v2759_v13, %s4260_s19  ;;  %2763 = vrot.lane.b32.xlu1 %v2760_v57, %s4260_s19  ;;  %v2891_v13 = vstv %s3961_s29  ;;  %v2406_v57 = vrot.slane %v2392_v61, 2  ;;  %s3960_s29 = sld [smem:[#allocation4 + $0x4d]] }
 0x2f3   : > { %2761 = vrot.lane.b32.xlu0 %v2758_v62, %s4260_s19  ;;  %v2892_v63 = vmul.f32 %v2891_v13, %v6309_v40  ;;  %v2894_v19 = vmul.f32 %v2891_v13, %v6195_v0  ;;  %v2895_v5 = vmul.f32 %v2891_v13, %v6319_v52 }
 0x2f4   : > { %v6272_v51 = vpop.permute.xlu2 %2456  ;;  %v2342_v54 = vpop.permute.xlu1 %2341  ;;  %v2420_v29 = vadd.f32 %v2406_v57, %v6254_v20  ;;  %v2897_v20 = vmul.f32 %v2891_v13, %v6325_v24 }
 0x2f5   : > { %v2472_v10 = vadd.f32 %v6272_v51, %v2421_v30  ;;  %v2340_v27 = vpop.permute.xlu0 %2339  ;;  %v2350_v14 = vadd.f32 %v2342_v54, %v2322_v55  ;;  %v2351_v41 = vadd.f32 %v2342_v54, %v2323_v53  ;;  %v2830_v30 = vrot.slane %v2826_v26, 3  ;;  %v6312_v55 = vld [vmem:[#allocation3 + $0x20] sm:$0xfe] }
 0x2f6   : > { %v2348_v44 = vadd.f32 %v2340_v27, %v2320_v21  ;;  %v2349_v31 = vadd.f32 %v2340_v27, %v2321_v3  ;;  %v2893_v34 = vmul.f32 %v2891_v13, %v6312_v55  ;;  %v2906_v54 = vrot.slane %v2894_v19, 4 }
 0x2f7   : > { %v2832_v3 = vsel %vm966_vm5, %v2830_v30, %v2831_v1  ;;  %v2908_v32 = vrot.slane %v2895_v5, 4  ;;  %v2944_v26 = vmul.f32 %v2942_v33, %v6312_v55 }
 0x2fa   : > { %2789 = vrot.lane.b32.xlu2 %v2783_v56, %s4261_s25  ;;  %2787 = vrot.lane.b32.xlu1 %v2784_v60, %s4261_s25  ;;  %v2407_v56 = vsel %vm717_vm2, %v2401_v49, %v2406_v57 }
 0x2fb   : > { %2785 = vrot.lane.b32.xlu0 %v2782_v58, %s4261_s25  ;;  %v2904_v58 = vrot.slane %v2892_v63, 4 }
 0x2fc   : > { %v6291_v15 = vpop.permute.xlu2 %2501  ;;  %v2370_v28 = vpop.permute.xlu1 %2369 }
 0x2fd   : > { %v2368_v42 = vpop.permute.xlu0 %2367  ;;  %v2378_v6 = vadd.f32 %v2370_v28, %v2350_v14  ;;  %v2379_v37 = vadd.f32 %v2370_v28, %v2351_v41  ;;  %v2905_v14 = vrot.slane %v2893_v34, 4  ;;  %v6328_v41 = vld [vmem:[#allocation3 + $0x48] sm:$0x1] }
 0x2fe   : > { %v2376_v7 = vadd.f32 %v2368_v42, %v2348_v44  ;;  %v2377_v18 = vadd.f32 %v2368_v42, %v2349_v31  ;;  %v2947_v63 = vmul.f32 %v2942_v33, %v6328_v41 }
 0x2ff   : > { %v2419_v38 = vadd.f32 %v2409_v25, %v2379_v37  ;;  %v2418_v44 = vadd.f32 %v2407_v56, %v2378_v6  ;;  %v2909_v12 = vsel %vm1187_vm6, %v2905_v14, %v2908_v32 }
 0x300   : > { %v2417_v46 = vadd.f32 %v2405_v47, %v2377_v18  ;;  %v2416_v62 = vadd.f32 %v2402_v8, %v2376_v7 }
 0x302   : > { %2813 = vrot.lane.b32.xlu2 %v2807_v36, %s4262_s30  ;;  %2811 = vrot.lane.b32.xlu1 %v2808_v17, %s4262_s30  ;;  %v2907_v36 = vsel %vm1187_vm6, %v2904_v58, %v2906_v54  ;;  %v2945_v17 = vmul.f32 %v2942_v33, %v6195_v0 }
 0x303   : > { %2809 = vrot.lane.b32.xlu0 %v2806_v59, %s4262_s30  ;;  %v2896_v59 = vmul.f32 %v2891_v13, %v6328_v41  ;;  %v2956_v13 = vrot.slane %v2944_v26, 4 }
 0x304   : > { %v6307_v43 = vpop.permute.xlu2 %2507  ;;  %v2449_v4 = vpop.permute.xlu1 %2448  ;;  %v2957_v8 = vrot.slane %v2945_v17, 4 }
 0x305   : > { %v2523_v23 = vadd.f32 %v6307_v43, %v2472_v10  ;;  %v2447_v22 = vpop.permute.xlu0 %2446  ;;  %v2468_v11 = vadd.f32 %v2449_v4, %v2417_v46  ;;  %v2910_v25 = vrot.slane %v2896_v59, 4 }
 0x306   : > { %v2458_v53 = vsel %vm294_vm3, %v2447_v22, %v2449_v4 }
 0x307   : > { %v2467_v21 = vadd.f32 %v2458_v53, %v2416_v62  ;;  %v2911_v18 = vsel %vm1187_vm6, %v2906_v54, %v2910_v25  ;;  %v2946_v62 = vmul.f32 %v2942_v33, %v6319_v52  ;;  %v2948_v53 = vmul.f32 %v2942_v33, %v6325_v24 }
 0x309   : > { %v2959_v57 = vrot.slane %v2946_v62, 4  ;;  %v2963_v34 = vrot.slane %v2948_v53, 4 }
 0x30a   : > { %2837 = vrot.lane.b32.xlu2 %v2831_v1, %s4263_s27  ;;  %2835 = vrot.lane.b32.xlu1 %v2832_v3, %s4263_s27 }
 0x30b   : > { %2833 = vrot.lane.b32.xlu0 %v2830_v30, %s4263_s27 }
 0x30c   : > { %v2542_v10 = vpop.permute.xlu2 %2541  ;;  %v2455_v27 = vpop.permute.xlu1 %2454 }
 0x30d   : > { %v2551_v31 = vadd.f32 %v2542_v10, %v2523_v23  ;;  %v2453_v60 = vpop.permute.xlu0 %2452  ;;  %v2460_v2 = vsel %vm294_vm3, %v2455_v27, %v6272_v51  ;;  %v2912_v51 = vrot.slane %v2897_v20, 4  ;;  %v6362_v27 = vstv %s3953_s7  ;;  %s3973_s7 = sld [smem:[#allocation4 + $0x5a]] }
 0x30e   : > { %v2459_v16 = vsel %vm294_vm3, %v6264_v9, %v2453_v60  ;;  %v2470_v35 = vadd.f32 %v2453_v60, %v2419_v38  ;;  %v2471_v45 = vadd.f32 %v2460_v2, %v2420_v29  ;;  %v2943_v38 = vmul.f32 %v2942_v33, %v6309_v40 }
 0x30f   : > { %v2469_v48 = vadd.f32 %v2459_v16, %v2418_v44  ;;  %v2913_v49 = vsel %vm1187_vm6, %v2908_v32, %v2912_v51  ;;  %v2993_v29 = vstv %s3963_s6  ;;  %v2964_v16 = vsel %vm1187_vm6, %v2959_v57, %v2963_v34  ;;  %s3972_s6 = sld [smem:[#allocation4 + $0x59]] }
 0x310   : > { %v2955_v47 = vrot.slane %v2943_v38, 4  ;;  %v2996_v20 = vmul.f32 %v2993_v29, %v6325_v24  ;;  %v6376_v59 = vmul.f32 %v6362_v27, %v6217_v39 }
 0x312   : > { %2918 = vrot.lane.b32.xlu2 %v2907_v36, %s4258_s5  ;;  %2916 = vrot.lane.b32.xlu1 %v2905_v14, %s4258_s5  ;;  %v2958_v3 = vsel %vm1187_vm6, %v2955_v47, %v2957_v8  ;;  %v2960_v36 = vsel %vm1187_vm6, %v2956_v13, %v2959_v57  ;;  %v3003_v51 = vrot.slane %v2996_v20, 4  ;;  %v2652_v17 = vrot.slane %v6376_v59, 3 }
 0x313   : > { %2914 = vrot.lane.b32.xlu0 %v2904_v58, %s4258_s5 }
 0x314   : > { %v2570_v28 = vpop.permute.xlu2 %2569  ;;  %v2500_v9 = vpop.permute.xlu1 %2499 }
 0x315   : > { %v2579_v42 = vadd.f32 %v2570_v28, %v2551_v31  ;;  %v2498_v6 = vpop.permute.xlu0 %2497  ;;  %v2519_v37 = vadd.f32 %v2500_v9, %v2468_v11 }
 0x316   : > { %v2509_v50 = vsel %vm336_vm4, %v2498_v6, %v2500_v9 }
 0x317   : > { %v2518_v7 = vadd.f32 %v2509_v50, %v2467_v21 }
 0x31a   : > { %2924 = vrot.lane.b32.xlu2 %v2913_v49, %s4258_s5  ;;  %2922 = vrot.lane.b32.xlu1 %v2911_v18, %s4258_s5 }
 0x31b   : > { %2920 = vrot.lane.b32.xlu0 %v2909_v12, %s4258_s5 }
 0x31c   : > { %v2598_v46 = vpop.permute.xlu2 %2597  ;;  %v2506_v1 = vpop.permute.xlu1 %2505 }
 0x31d   : > { %v2607_v30 = vadd.f32 %v2598_v46, %v2579_v42  ;;  %v2504_v61 = vpop.permute.xlu0 %2503  ;;  %v2511_v4 = vsel %vm336_vm4, %v2506_v1, %v6307_v43 }
 0x31e   : > { %v2510_v23 = vsel %vm336_vm4, %v6291_v15, %v2504_v61  ;;  %v2521_v22 = vadd.f32 %v2504_v61, %v2470_v35  ;;  %v2522_v11 = vadd.f32 %v2511_v4, %v2471_v45  ;;  %v2961_v15 = vrot.slane %v2947_v63, 4 }
 0x31f   : > { %v2520_v21 = vadd.f32 %v2510_v23, %v2469_v48  ;;  %v2995_v45 = vmul.f32 %v2993_v29, %v6319_v52  ;;  %v2994_v48 = vmul.f32 %v2993_v29, %v6312_v55  ;;  %v3049_v61 = vstv %s3965_s28  ;;  %s3976_s28 = sld [smem:[#allocation4 + $0x5d]] }
 0x320   : > { %v2550_v19 = vadd.f32 %v2542_v10, %v2522_v11  ;;  %v2962_v35 = vsel %vm1187_vm6, %v2957_v8, %v2961_v15  ;;  %v3052_v63 = vmul.f32 %v3049_v61, %v6325_v24 }
 0x321   : > { %v3001_v32 = vrot.slane %v2995_v45, 4  ;;  %v3000_v25 = vrot.slane %v2994_v48, 4 }
 0x322   : > { %2969 = vrot.lane.b32.xlu2 %v2958_v3, %s4259_s14  ;;  %2967 = vrot.lane.b32.xlu1 %v2956_v13, %s4259_s14  ;;  %v2578_v43 = vadd.f32 %v2570_v28, %v2550_v19  ;;  %v3021_v28 = vstv %s3964_s20  ;;  %v3051_v3 = vmul.f32 %v3049_v61, %v6319_v52  ;;  %v3050_v19 = vmul.f32 %v3049_v61, %v6312_v55  ;;  %s3975_s20 = sld [smem:[#allocation4 + $0x5c]] }
 0x323   : > { %2965 = vrot.lane.b32.xlu0 %v2955_v47, %s4259_s14  ;;  %v3024_v39 = vmul.f32 %v3021_v28, %v6325_v24  ;;  %v3004_v18 = vsel %vm1187_vm6, %v3001_v32, %v3003_v51  ;;  %v3002_v38 = vsel %vm1187_vm6, %v3000_v25, %v3001_v32  ;;  %v3022_v12 = vmul.f32 %v3021_v28, %v6312_v55 }
 0x324   : > { %v2626_v56 = vpop.permute.xlu2 %2625  ;;  %v2606_v58 = vadd.f32 %v2598_v46, %v2578_v43  ;;  %v2540_v54 = vpop.permute.xlu1 %2539  ;;  %v4125_v43 = vld [vmem:[#allocation3 + $0x20] sm:$0xff]  ;;  %v3057_v34 = vrot.slane %v3051_v3, 4  ;;  %v3059_v15 = vrot.slane %v3052_v63, 4 }
 0x325   : > { %v2635_v14 = vadd.f32 %v2626_v56, %v2607_v30  ;;  %v2538_v44 = vpop.permute.xlu0 %2537  ;;  %v2548_v10 = vadd.f32 %v2540_v54, %v2520_v21  ;;  %v2549_v31 = vadd.f32 %v2540_v54, %v2521_v22  ;;  %v3031_v47 = vrot.slane %v3024_v39, 4 }
 0x326   : > { %v6364_v60 = vadd.f32 %v2626_v56, %v2606_v58  ;;  %v2546_v2 = vadd.f32 %v2538_v44, %v2518_v7  ;;  %v2547_v5 = vadd.f32 %v2538_v44, %v2519_v37  ;;  %v3023_v7 = vmul.f32 %v3021_v28, %v6319_v52 }
 0x327   : > { %v2665_v8 = vadd.f32 %v2652_v17, %v2635_v14  ;;  %v3028_v46 = vrot.slane %v3022_v12, 4  ;;  %v2641_v57 = vmul.f32 %v4125_v43, %v6362_v27  ;;  %v3056_v56 = vrot.slane %v3050_v19, 4  ;;  %v4126_v14 = vld [vmem:[#allocation3 + $0x18] sm:$0xff]  ;;  %v6440_v43 = vld [vmem:[#allocation3 + $0x48] sm:$0x3] }
 0x328   : > { %v3029_v26 = vrot.slane %v3023_v7, 4  ;;  %v3077_v58 = vstv %s3966_s16  ;;  %v2640_v44 = vmul.f32 %v4126_v14, %v6362_v27  ;;  %v3060_v20 = vsel %vm1187_vm6, %v3057_v34, %v3059_v15  ;;  %s3977_s16 = sld [smem:[#allocation4 + $0x5e]] }
 0x329   : > { %v3080_v45 = vmul.f32 %v3077_v58, %v6325_v24  ;;  %v3058_v48 = vsel %vm1187_vm6, %v3056_v56, %v3057_v34  ;;  %v3078_v32 = vmul.f32 %v3077_v58, %v6312_v55  ;;  %v3145_v7 = vstv %s3968_s17  ;;  %s3967_s17 = sld [smem:[#allocation4 + $0x54]] }
 0x32a   : > { %2975 = vrot.lane.b32.xlu2 %v2964_v16, %s4259_s14  ;;  %2973 = vrot.lane.b32.xlu1 %v2962_v35, %s4259_s14  ;;  %v3032_v53 = vsel %vm1187_vm6, %v3029_v26, %v3031_v47  ;;  %v3030_v21 = vsel %vm1187_vm6, %v3028_v46, %v3029_v26  ;;  %v3079_v35 = vmul.f32 %v3077_v58, %v6319_v52  ;;  %v2648_v51 = vrot.slane %v2640_v44, 3  ;;  %v6422_v26 = vld [vmem:[#allocation3 + $0x20] sm:$0xfc] }
 0x32b   : > { %2971 = vrot.lane.b32.xlu0 %v2960_v36, %s4259_s14  ;;  %v2649_v36 = vrot.slane %v2641_v57, 3  ;;  %v3087_v28 = vrot.slane %v3080_v45, 4  ;;  %v3148_v61 = vmul.f32 %v3145_v7, %v6195_v0 }
 0x32c   : > { %v6379_v9 = vpop.permute.xlu2 %2686  ;;  %v2568_v33 = vpop.permute.xlu1 %2567 }
 0x32d   : > { %v2566_v42 = vpop.permute.xlu0 %2565  ;;  %v2576_v6 = vadd.f32 %v2568_v33, %v2548_v10  ;;  %v2577_v37 = vadd.f32 %v2568_v33, %v2549_v31 }
 0x32e   : > { %v2574_v50 = vadd.f32 %v2566_v42, %v2546_v2  ;;  %v2575_v49 = vadd.f32 %v2566_v42, %v2547_v5  ;;  %v3084_v42 = vrot.slane %v3078_v32, 4 }
 0x332   : > { %3009 = vrot.lane.b32.xlu2 %v3004_v18, %s4260_s19  ;;  %3007 = vrot.lane.b32.xlu1 %v3002_v38, %s4260_s19 }
 0x333   : > { %3005 = vrot.lane.b32.xlu0 %v3000_v25, %s4260_s19  ;;  %v3085_v25 = vrot.slane %v3079_v35, 4  ;;  %v3196_v35 = vstv %s3969_s24  ;;  %s3979_s24 = sld [smem:[#allocation4 + $0x60]] }
 0x334   : > { %v6392_v1 = vpop.permute.xlu2 %2692  ;;  %v2596_v30 = vpop.permute.xlu1 %2595 }
 0x335   : > { %v2708_v4 = vadd.f32 %v6392_v1, %v2665_v8  ;;  %v2594_v13 = vpop.permute.xlu0 %2593  ;;  %v2604_v62 = vadd.f32 %v2596_v30, %v2576_v6  ;;  %v2605_v23 = vadd.f32 %v2596_v30, %v2577_v37  ;;  %v2642_v6 = vmul.f32 %v6362_v27, %v6195_v0 }
 0x336   : > { %v2602_v22 = vadd.f32 %v2594_v13, %v2574_v50  ;;  %v2603_v11 = vadd.f32 %v2594_v13, %v2575_v49  ;;  %v6419_v49 = vld [vmem:[#allocation3 + $0x18] sm:$0xfc]  ;;  %v3088_v8 = vsel %vm1187_vm6, %v3085_v25, %v3087_v28  ;;  %v3086_v27 = vsel %vm1187_vm6, %v3084_v42, %v3085_v25 }
 0x337   : > { %v3146_v30 = vmul.f32 %v3145_v7, %v6419_v49  ;;  %v2650_v13 = vrot.slane %v2642_v6, 3  ;;  %v3197_v28 = vmul.f32 %v3196_v35, %v6419_v49  ;;  %v3198_v6 = vmul.f32 %v3196_v35, %v6422_v26 }
 0x33a   : > { %3037 = vrot.lane.b32.xlu2 %v3032_v53, %s4261_s25  ;;  %3035 = vrot.lane.b32.xlu1 %v3030_v21, %s4261_s25  ;;  %v6437_v53 = vld [vmem:[#allocation3 + $0x50] sm:$0x3]  ;;  %v2664_v21 = vadd.f32 %v2650_v13, %v6364_v60 }
 0x33b   : > { %3033 = vrot.lane.b32.xlu0 %v3028_v46, %s4261_s25  ;;  %v3151_v14 = vmul.f32 %v3145_v7, %v6437_v53 }
 0x33c   : > { %v6404_v54 = vpop.permute.xlu2 %2729  ;;  %v2624_v29 = vpop.permute.xlu1 %2623 }
 0x33d   : > { %v2622_v10 = vpop.permute.xlu0 %2621  ;;  %v2632_v31 = vadd.f32 %v2624_v29, %v2604_v62  ;;  %v2633_v2 = vadd.f32 %v2624_v29, %v2605_v23  ;;  %v3147_v62 = vmul.f32 %v3145_v7, %v6422_v26  ;;  %v2651_v23 = vsel %vm966_vm5, %v2648_v51, %v2650_v13 }
 0x33e   : > { %v2630_v5 = vadd.f32 %v2622_v10, %v2602_v22  ;;  %v2631_v16 = vadd.f32 %v2622_v10, %v2603_v11  ;;  %v3158_v22 = vrot.slane %v3146_v30, 5  ;;  %v3160_v11 = vrot.slane %v3148_v61, 5 }
 0x33f   : > { %v3159_v59 = vrot.slane %v3147_v62, 5  ;;  %v3202_v61 = vmul.f32 %v3196_v35, %v6437_v53 }
 0x340   : > { %v2661_v33 = vadd.f32 %v2649_v36, %v2631_v16  ;;  %v2660_v39 = vadd.f32 %v2648_v51, %v2630_v5  ;;  %v3161_v10 = vsel %vm1442_vm7, %v3158_v22, %v3160_v11 }
 0x342   : > { %3065 = vrot.lane.b32.xlu2 %v3060_v20, %s4262_s30  ;;  %3063 = vrot.lane.b32.xlu1 %v3058_v48, %s4262_s30 }
 0x343   : > { %3061 = vrot.lane.b32.xlu0 %v3056_v56, %s4262_s30  ;;  %v3149_v56 = vmul.f32 %v3145_v7, %v6319_v52 }
 0x344   : > { %v6417_v37 = vpop.permute.xlu2 %2735  ;;  %v2685_v50 = vpop.permute.xlu1 %2684 }
 0x345   : > { %v2751_v18 = vadd.f32 %v6417_v37, %v2708_v4  ;;  %v2683_v38 = vpop.permute.xlu0 %2682  ;;  %v2704_v12 = vadd.f32 %v2685_v50, %v2661_v33  ;;  %v2653_v4 = vsel %vm966_vm5, %v2649_v36, %v2652_v17  ;;  %v2662_v17 = vadd.f32 %v2651_v23, %v2632_v31 }
 0x346   : > { %v2694_v47 = vsel %vm294_vm3, %v2683_v38, %v2685_v50  ;;  %v2663_v63 = vadd.f32 %v2653_v4, %v2633_v2  ;;  %v3150_v2 = vmul.f32 %v3145_v7, %v6440_v43  ;;  %v3162_v31 = vrot.slane %v3149_v56, 5 }
 0x347   : > { %v2703_v46 = vadd.f32 %v2694_v47, %v2660_v39  ;;  %v3199_v33 = vmul.f32 %v3196_v35, %v6195_v0  ;;  %v3209_v50 = vrot.slane %v3197_v28, 5  ;;  %v3210_v47 = vrot.slane %v3198_v6, 5 }
 0x348   : > { %v3164_v5 = vrot.slane %v3150_v2, 5  ;;  %v3201_v4 = vmul.f32 %v3196_v35, %v6440_v43 }
 0x349   : > { %v3211_v7 = vrot.slane %v3199_v33, 5 }
 0x34a   : > { %3093 = vrot.lane.b32.xlu2 %v3088_v8, %s4263_s27  ;;  %3091 = vrot.lane.b32.xlu1 %v3086_v27, %s4263_s27  ;;  %v3165_v25 = vsel %vm1442_vm7, %v3160_v11, %v3164_v5  ;;  %v3200_v8 = vmul.f32 %v3196_v35, %v6319_v52  ;;  %v3217_v11 = vrot.slane %v3202_v61, 5 }
 0x34b   : > { %3089 = vrot.lane.b32.xlu0 %v3084_v42, %s4263_s27  ;;  %v3163_v42 = vsel %vm1442_vm7, %v3159_v59, %v3162_v31  ;;  %v3212_v62 = vsel %vm1442_vm7, %v3209_v50, %v3211_v7 }
 0x34c   : > { %v2766_v3 = vpop.permute.xlu2 %2765  ;;  %v2691_v19 = vpop.permute.xlu1 %2690 }
 0x34d   : > { %v2775_v57 = vadd.f32 %v2766_v3, %v2751_v18  ;;  %v2689_v34 = vpop.permute.xlu0 %2688  ;;  %v2696_v15 = vsel %vm294_vm3, %v2691_v19, %v6392_v1  ;;  %v3166_v1 = vrot.slane %v3151_v14, 5 }
 0x34e   : > { %v2695_v58 = vsel %vm294_vm3, %v6379_v9, %v2689_v34  ;;  %v2706_v29 = vadd.f32 %v2689_v34, %v2663_v63  ;;  %v2707_v60 = vadd.f32 %v2696_v15, %v2664_v21 }
 0x34f   : > { %v2705_v44 = vadd.f32 %v2695_v58, %v2662_v17  ;;  %v3167_v32 = vsel %vm1442_vm7, %v3162_v31, %v3166_v1  ;;  %v6474_v17 = vstv %s3960_s29 }
 0x350   : > { %v6486_v1 = vmul.f32 %v6474_v17, %v6319_v52  ;;  %v2861_v5 = vmul.f32 %v6474_v17, %v6325_v24 }
 0x352   : > { %3172 = vrot.lane.b32.xlu2 %v3161_v10, %s4258_s5  ;;  %3170 = vrot.lane.b32.xlu1 %v3159_v59, %s4258_s5  ;;  %v3247_v59 = vstv %s3970_s26 }
 0x353   : > { %3168 = vrot.lane.b32.xlu0 %v3158_v22, %s4258_s5  ;;  %v3213_v22 = vrot.slane %v3200_v8, 5  ;;  %v3250_v10 = vmul.f32 %v3247_v59, %v6437_v53  ;;  %v3248_v2 = vmul.f32 %v3247_v59, %v6422_v26 }
 0x354   : > { %v2790_v16 = vpop.permute.xlu2 %2789  ;;  %v2728_v9 = vpop.permute.xlu1 %2727 }
 0x355   : > { %v2799_v45 = vadd.f32 %v2790_v16, %v2775_v57  ;;  %v2726_v20 = vpop.permute.xlu0 %2725  ;;  %v2747_v48 = vadd.f32 %v2728_v9, %v2704_v12  ;;  %v3214_v31 = vsel %vm1442_vm7, %v3210_v47, %v3213_v22  ;;  %v3254_v35 = vrot.slane %v3248_v2, 5 }
 0x356   : > { %v2737_v36 = vsel %vm336_vm4, %v2726_v20, %v2728_v9  ;;  %v3257_v9 = vrot.slane %v3250_v10, 5 }
 0x357   : > { %v2746_v51 = vadd.f32 %v2737_v36, %v2703_v46  ;;  %v2872_v36 = vrot.slane %v6486_v1, 4 }
 0x35a   : > { %3178 = vrot.lane.b32.xlu2 %v3167_v32, %s4258_s5  ;;  %3176 = vrot.lane.b32.xlu1 %v3165_v25, %s4258_s5  ;;  %v2876_v32 = vrot.slane %v2861_v5, 4 }
 0x35b   : > { %3174 = vrot.lane.b32.xlu0 %v3163_v42, %s4258_s5 }
 0x35c   : > { %v2814_v39 = vpop.permute.xlu2 %2813  ;;  %v2734_v18 = vpop.permute.xlu1 %2733 }
 0x35d   : > { %v2823_v38 = vadd.f32 %v2814_v39, %v2799_v45  ;;  %v2732_v12 = vpop.permute.xlu0 %2731  ;;  %v2739_v0 = vsel %vm336_vm4, %v2734_v18, %v6417_v37  ;;  %v3275_v45 = vstv %s3971_s3  ;;  %v2877_v18 = vsel %vm1187_vm6, %v2872_v36, %v2876_v32 }
 0x35e   : > { %v2738_v46 = vsel %vm336_vm4, %v6404_v54, %v2732_v12  ;;  %v2749_v27 = vadd.f32 %v2732_v12, %v2706_v29  ;;  %v2750_v30 = vadd.f32 %v2739_v0, %v2707_v60  ;;  %v3215_v54 = vrot.slane %v3201_v4, 5 }
 0x35f   : > { %v2748_v13 = vadd.f32 %v2738_v46, %v2705_v44  ;;  %v3218_v60 = vsel %vm1442_vm7, %v3213_v22, %v3217_v11  ;;  %v3249_v44 = vmul.f32 %v3247_v59, %v6319_v52  ;;  %v3277_v42 = vmul.f32 %v3275_v45, %v6319_v52 }
 0x360   : > { %v2774_v23 = vadd.f32 %v2766_v3, %v2750_v30  ;;  %v3216_v14 = vsel %vm1442_vm7, %v3211_v7, %v3215_v54  ;;  %v3278_v6 = vmul.f32 %v3275_v45, %v6437_v53 }
 0x362   : > { %3223 = vrot.lane.b32.xlu2 %v3212_v62, %s4259_s14  ;;  %3221 = vrot.lane.b32.xlu1 %v3210_v47, %s4259_s14  ;;  %v2798_v37 = vadd.f32 %v2790_v16, %v2774_v23  ;;  %v3255_v16 = vrot.slane %v3249_v44, 5  ;;  %v3285_v12 = vrot.slane %v3278_v6, 5  ;;  %v6540_v6 = vld [vmem:[#allocation3 + $0x18] sm:$0xf8] }
 0x363   : > { %3219 = vrot.lane.b32.xlu0 %v3209_v50, %s4259_s14 }
 0x364   : > { %v2838_v21 = vpop.permute.xlu2 %2837  ;;  %v2822_v63 = vadd.f32 %v2814_v39, %v2798_v37  ;;  %v2764_v19 = vpop.permute.xlu1 %2763  ;;  %v3258_v50 = vsel %vm1442_vm7, %v3255_v16, %v3257_v9  ;;  %v3256_v7 = vsel %vm1442_vm7, %v3254_v35, %v3255_v16  ;;  %v3276_v39 = vmul.f32 %v3275_v45, %v6422_v26 }
 0x365   : > { %v2847_v57 = vadd.f32 %v2838_v21, %v2823_v38  ;;  %v2762_v34 = vpop.permute.xlu0 %2761  ;;  %v2772_v3 = vadd.f32 %v2764_v19, %v2748_v13  ;;  %v2773_v15 = vadd.f32 %v2764_v19, %v2749_v27  ;;  %v3283_v38 = vrot.slane %v3277_v42, 5 }
 0x366   : > { %v6476_v56 = vadd.f32 %v2838_v21, %v2822_v63  ;;  %v2770_v58 = vadd.f32 %v2762_v34, %v2746_v51  ;;  %v2771_v29 = vadd.f32 %v2762_v34, %v2747_v48  ;;  %v3282_v47 = vrot.slane %v3276_v39, 5 }
 0x367   : > { %v2889_v0 = vadd.f32 %v2877_v18, %v2847_v57  ;;  %v3303_v27 = vstv %s3972_s6  ;;  %v3286_v37 = vsel %vm1442_vm7, %v3283_v38, %v3285_v12  ;;  %v2857_v63 = vmul.f32 %v6474_v17, %v6312_v55  ;;  %s3772_s6 = scalar_lea.sflag [#allocation6], %s4384_s4 }
 0x368   : > { %v3284_v22 = vsel %vm1442_vm7, %v3282_v47, %v3283_v38  ;;  %v3305_v11 = vmul.f32 %v3303_v27, %v6319_v52  ;;  %v3306_v54 = vmul.f32 %v3303_v27, %v6437_v53  ;;  %v3304_v21 = vmul.f32 %v3303_v27, %v6422_v26  ;;  %v6543_v38 = vld [vmem:[#allocation3 + $0x20] sm:$0xf8] }
 0x369   : > { %v3331_v34 = vstv %s3973_s7  ;;  %v2869_v16 = vrot.slane %v2857_v63, 4  ;;  %v2860_v45 = vmul.f32 %v6474_v17, %v6328_v41 }
 0x36a   : > { %3229 = vrot.lane.b32.xlu2 %v3218_v60, %s4259_s14  ;;  %3227 = vrot.lane.b32.xlu1 %v3216_v14, %s4259_s14  ;;  %v3311_v19 = vrot.slane %v3305_v11, 5  ;;  %v3313_v59 = vrot.slane %v3306_v54, 5  ;;  %v3310_v57 = vrot.slane %v3304_v21, 5  ;;  %v3333_v55 = vmul.f32 %v3331_v34, %v6319_v52 }
 0x36b   : > { %3225 = vrot.lane.b32.xlu0 %v3214_v31, %s4259_s14  ;;  %v3334_v2 = vmul.f32 %v3331_v34, %v6437_v53  ;;  %v3332_v9 = vmul.f32 %v3331_v34, %v6422_v26 }
 0x36c   : > { %v6493_v20 = vpop.permute.xlu2 %2918  ;;  %v2788_v48 = vpop.permute.xlu1 %2787  ;;  %v3314_v31 = vsel %vm1442_vm7, %v3311_v19, %v3313_v59  ;;  %v3312_v5 = vsel %vm1442_vm7, %v3310_v57, %v3311_v19  ;;  %v3339_v32 = vrot.slane %v3333_v55, 5  ;;  %v6562_v19 = vld [vmem:[#allocation3 + $0x48] sm:$0x7] }
 0x36d   : > { %v2786_v51 = vpop.permute.xlu0 %2785  ;;  %v2796_v25 = vadd.f32 %v2788_v48, %v2772_v3  ;;  %v2797_v24 = vadd.f32 %v2788_v48, %v2773_v15 }
 0x36e   : > { %v2794_v28 = vadd.f32 %v2786_v51, %v2770_v58  ;;  %v2795_v33 = vadd.f32 %v2786_v51, %v2771_v29  ;;  %v2856_v58 = vmul.f32 %v6474_v17, %v6309_v40  ;;  %v3341_v51 = vrot.slane %v3334_v2, 5 }
 0x370   : > { %v2868_v48 = vrot.slane %v2856_v58, 4 }
 0x372   : > { %3263 = vrot.lane.b32.xlu2 %v3258_v50, %s4260_s19  ;;  %3261 = vrot.lane.b32.xlu1 %v3256_v7, %s4260_s19  ;;  %v3399_v50 = vstv %s3975_s20  ;;  %v2874_v7 = vrot.slane %v2860_v45, 4 }
 0x373   : > { %3259 = vrot.lane.b32.xlu0 %v3254_v35, %s4260_s19  ;;  %v6529_v35 = vld [vmem:[#allocation3 + $0x30] sm:$0xff]  ;;  %v3400_v27 = vmul.f32 %v3399_v50, %v6540_v6  ;;  %v3404_v55 = vmul.f32 %v3399_v50, %v6562_v19 }
 0x374   : > { %v6507_v8 = vpop.permute.xlu2 %2924  ;;  %v2812_v46 = vpop.permute.xlu1 %2811  ;;  %v2858_v40 = vmul.f32 %v6529_v35, %v6474_v17 }
 0x375   : > { %v2940_v30 = vadd.f32 %v6507_v8, %v2889_v0  ;;  %v2810_v61 = vpop.permute.xlu0 %2809  ;;  %v2820_v13 = vadd.f32 %v2812_v46, %v2796_v25  ;;  %v2821_v62 = vadd.f32 %v2812_v46, %v2797_v24  ;;  %v3338_v24 = vrot.slane %v3332_v9, 5 }
 0x376   : > { %v2818_v4 = vadd.f32 %v2810_v61, %v2794_v28  ;;  %v2819_v23 = vadd.f32 %v2810_v61, %v2795_v33  ;;  %v2870_v28 = vrot.slane %v2858_v40, 4  ;;  %v3342_v0 = vsel %vm1442_vm7, %v3339_v32, %v3341_v51 }
 0x377   : > { %v3340_v46 = vsel %vm1442_vm7, %v3338_v24, %v3339_v32  ;;  %v3402_v61 = vmul.f32 %v6529_v35, %v3399_v50  ;;  %v3418_v2 = vrot.slane %v3404_v55, 6 }
 0x37a   : > { %3291 = vrot.lane.b32.xlu2 %v3286_v37, %s4261_s25  ;;  %3289 = vrot.lane.b32.xlu1 %v3284_v22, %s4261_s25  ;;  %v3414_v37 = vrot.slane %v3402_v61, 6  ;;  %v6559_v22 = vld [vmem:[#allocation3 + $0x50] sm:$0x7] }
 0x37b   : > { %3287 = vrot.lane.b32.xlu0 %v3282_v47, %s4261_s25 }
 0x37c   : > { %v6520_v3 = vpop.permute.xlu2 %2969  ;;  %v2836_v15 = vpop.permute.xlu1 %2835  ;;  %v3419_v51 = vsel %vm1697_vm8, %v3414_v37, %v3418_v2 }
 0x37d   : > { %v2834_v29 = vpop.permute.xlu0 %2833  ;;  %v2844_v60 = vadd.f32 %v2836_v15, %v2820_v13  ;;  %v2845_v14 = vadd.f32 %v2836_v15, %v2821_v62  ;;  %v3401_v13 = vmul.f32 %v3399_v50, %v6543_v38  ;;  %v2875_v62 = vsel %vm1187_vm6, %v2870_v28, %v2874_v7 }
 0x37e   : > { %v2842_v44 = vadd.f32 %v2834_v29, %v2818_v4  ;;  %v2843_v10 = vadd.f32 %v2834_v29, %v2819_v23  ;;  %v2871_v4 = vsel %vm1187_vm6, %v2868_v48, %v2870_v28  ;;  %v3412_v23 = vrot.slane %v3400_v27, 6 }
 0x37f   : > { %v2888_v11 = vadd.f32 %v2875_v62, %v6476_v56  ;;  %v3413_v1 = vrot.slane %v3401_v13, 6  ;;  %v3403_v15 = vmul.f32 %v3399_v50, %v6319_v52 }
 0x380   : > { %v2885_v25 = vadd.f32 %v2869_v16, %v2843_v10  ;;  %v2884_v41 = vadd.f32 %v2868_v48, %v2842_v44  ;;  %v3415_v10 = vsel %vm1697_vm8, %v3412_v23, %v3414_v37 }
 0x382   : > { %3319 = vrot.lane.b32.xlu2 %v3314_v31, %s4262_s30  ;;  %3317 = vrot.lane.b32.xlu1 %v3312_v5, %s4262_s30  ;;  %v3450_v5 = vstv %s3976_s28 }
 0x383   : > { %3315 = vrot.lane.b32.xlu0 %v3310_v57, %s4262_s30  ;;  %v3456_v13 = vmul.f32 %v3450_v5, %v6559_v22 }
 0x384   : > { %v6538_v33 = vpop.permute.xlu2 %2975  ;;  %v2917_v42 = vpop.permute.xlu1 %2916 }
 0x385   : > { %v2991_v17 = vadd.f32 %v6538_v33, %v2940_v30  ;;  %v2915_v39 = vpop.permute.xlu0 %2914  ;;  %v2936_v18 = vadd.f32 %v2917_v42, %v2885_v25  ;;  %v2873_v30 = vsel %vm1187_vm6, %v2869_v16, %v2872_v36  ;;  %v2886_v36 = vadd.f32 %v2871_v4, %v2844_v60 }
 0x386   : > { %v2926_v12 = vsel %vm294_vm3, %v2915_v39, %v2917_v42  ;;  %v2887_v21 = vadd.f32 %v2873_v30, %v2845_v14  ;;  %v3405_v14 = vmul.f32 %v3399_v50, %v6559_v22  ;;  %v3416_v60 = vrot.slane %v3403_v15, 6 }
 0x387   : > { %v2935_v47 = vadd.f32 %v2926_v12, %v2884_v41  ;;  %v3451_v25 = vmul.f32 %v3450_v5, %v6540_v6  ;;  %v3452_v42 = vmul.f32 %v3450_v5, %v6543_v38  ;;  %v3455_v4 = vmul.f32 %v3450_v5, %v6562_v19 }
 0x388   : > { %v3417_v28 = vsel %vm1697_vm8, %v3413_v1, %v3416_v60 }
 0x389   : > { %v3463_v50 = vrot.slane %v3451_v25, 6 }
 0x38a   : > { %3347 = vrot.lane.b32.xlu2 %v3342_v0, %s4263_s27  ;;  %3345 = vrot.lane.b32.xlu1 %v3340_v46, %s4263_s27  ;;  %v3464_v0 = vrot.slane %v3452_v42, 6 }
 0x38b   : > { %3343 = vrot.lane.b32.xlu0 %v3338_v24, %s4263_s27  ;;  %v3453_v24 = vmul.f32 %v6529_v35, %v3450_v5 }
 0x38c   : > { %v3010_v54 = vpop.permute.xlu2 %3009  ;;  %v2923_v63 = vpop.permute.xlu1 %2922 }
 0x38d   : > { %v3019_v59 = vadd.f32 %v3010_v54, %v2991_v17  ;;  %v2921_v57 = vpop.permute.xlu0 %2920  ;;  %v2928_v34 = vsel %vm294_vm3, %v2923_v63, %v6507_v8  ;;  %v3420_v8 = vrot.slane %v3405_v14, 6  ;;  %v3465_v7 = vrot.slane %v3453_v24, 6 }
 0x38e   : > { %v2927_v58 = vsel %vm294_vm3, %v6493_v20, %v2921_v57  ;;  %v2938_v29 = vadd.f32 %v2921_v57, %v2887_v21  ;;  %v2939_v56 = vadd.f32 %v2928_v34, %v2888_v11  ;;  %v3471_v11 = vrot.slane %v3456_v13, 6 }
 0x38f   : > { %v2937_v44 = vadd.f32 %v2927_v58, %v2886_v36  ;;  %v3421_v48 = vsel %vm1697_vm8, %v3416_v60, %v3420_v8  ;;  %v3466_v30 = vsel %vm1697_vm8, %v3463_v50, %v3465_v7  ;;  %v3501_v36 = vstv %s3977_s16  ;;  %s4202_s16 = scalar_lea.hbm %s6887_s2, 128 }
 0x390   : > { %v3504_v55 = vmul.f32 %v3501_v36, %v6559_v22  ;;  %v3502_v60 = vmul.f32 %v3501_v36, %v6543_v38 }
 0x392   : > { %3426 = vrot.lane.b32.xlu2 %v3415_v10, %s4258_s5  ;;  %3424 = vrot.lane.b32.xlu1 %v3413_v1, %s4258_s5  ;;  %v3503_v10 = vmul.f32 %v3501_v36, %v6319_v52 }
 0x393   : > { %3422 = vrot.lane.b32.xlu0 %v3412_v23, %s4258_s5 }
 0x394   : > { %v3038_v31 = vpop.permute.xlu2 %3037  ;;  %v2968_v20 = vpop.permute.xlu1 %2967 }
 0x395   : > { %v3047_v16 = vadd.f32 %v3038_v31, %v3019_v59  ;;  %v2966_v9 = vpop.permute.xlu0 %2965  ;;  %v2987_v40 = vadd.f32 %v2968_v20, %v2936_v18  ;;  %v6596_v59 = vstv %s3967_s17 }
 0x396   : > { %v2977_v45 = vsel %vm336_vm4, %v2966_v9, %v2968_v20  ;;  %v6608_v2 = vmul.f32 %v6596_v59, %v6319_v52  ;;  %v3509_v20 = vrot.slane %v3503_v10, 6 }
 0x397   : > { %v2986_v32 = vadd.f32 %v2977_v45, %v2935_v47  ;;  %v3454_v47 = vmul.f32 %v3450_v5, %v6319_v52  ;;  %v3511_v5 = vrot.slane %v3504_v55, 6 }
 0x399   : > { %v3467_v37 = vrot.slane %v3454_v47, 6  ;;  %v3557_v47 = vstv %s3979_s24 }
 0x39a   : > { %3432 = vrot.lane.b32.xlu2 %v3421_v48, %s4258_s5  ;;  %3430 = vrot.lane.b32.xlu1 %v3419_v51, %s4258_s5  ;;  %v3126_v48 = vrot.slane %v6608_v2, 5 }
 0x39b   : > { %3428 = vrot.lane.b32.xlu0 %v3417_v28, %s4258_s5  ;;  %s3978_s5 = sld [smem:[#allocation4 + $0x5f]]  ;;  %v3472_v14 = vsel %vm1697_vm8, %v3467_v37, %v3471_v11  ;;  %v3468_v8 = vsel %vm1697_vm8, %v3464_v0, %v3467_v37  ;;  %v3560_v11 = vmul.f32 %v3557_v47, %v6559_v22 }
 0x39c   : > { %v3066_v41 = vpop.permute.xlu2 %3065  ;;  %v2974_v17 = vpop.permute.xlu1 %2973 }
 0x39d   : > { %v3075_v39 = vadd.f32 %v3066_v41, %v3047_v16  ;;  %v2972_v18 = vpop.permute.xlu0 %2971  ;;  %v2979_v12 = vsel %vm336_vm4, %v2974_v17, %v6538_v33  ;;  %v3508_v16 = vrot.slane %v3502_v60, 6  ;;  %v3567_v36 = vrot.slane %v3560_v11, 6 }
 0x39e   : > { %v2978_v46 = vsel %vm336_vm4, %v6520_v3, %v2972_v18  ;;  %v2989_v27 = vadd.f32 %v2972_v18, %v2938_v29  ;;  %v2990_v61 = vadd.f32 %v2979_v12, %v2939_v56  ;;  %v3469_v3 = vrot.slane %v3455_v4, 6 }
 0x39f   : > { %v2988_v62 = vadd.f32 %v2978_v46, %v2937_v44 }
 0x3a0   : > { %v3018_v23 = vadd.f32 %v3010_v54, %v2990_v61  ;;  %v3470_v44 = vsel %vm1697_vm8, %v3465_v7, %v3469_v3  ;;  %v3510_v7 = vsel %vm1697_vm8, %v3508_v16, %v3509_v20 }
 0x3a1   : > { %v3529_v9 = vstv %s3978_s5 }
 0x3a2   : > { %3477 = vrot.lane.b32.xlu2 %v3466_v30, %s4259_s14  ;;  %3475 = vrot.lane.b32.xlu1 %v3464_v0, %s4259_s14  ;;  %v3046_v33 = vadd.f32 %v3038_v31, %v3018_v23  ;;  %v3115_v31 = vmul.f32 %v6596_v59, %v6437_v53  ;;  %v3531_v42 = vmul.f32 %v3529_v9, %v6319_v52 }
 0x3a3   : > { %3473 = vrot.lane.b32.xlu0 %v3463_v50, %s4259_s14  ;;  %v3512_v50 = vsel %vm1697_vm8, %v3509_v20, %v3511_v5  ;;  %v3530_v17 = vmul.f32 %v3529_v9, %v6543_v38 }
 0x3a4   : > { %v3094_v21 = vpop.permute.xlu2 %3093  ;;  %v3074_v63 = vadd.f32 %v3066_v41, %v3046_v33  ;;  %v3008_v1 = vpop.permute.xlu1 %3007  ;;  %v3532_v41 = vmul.f32 %v3529_v9, %v6559_v22  ;;  %v3537_v18 = vrot.slane %v3531_v42, 6  ;;  %v6632_v33 = vld [vmem:[#allocation3 + $0x38] sm:$0xff]  ;;  %v3112_v9 = vmul.f32 %v6529_v35, %v6596_v59 }
 0x3a5   : > { %v3103_v57 = vadd.f32 %v3094_v21, %v3075_v39  ;;  %v3006_v34 = vpop.permute.xlu0 %3005  ;;  %v3016_v54 = vadd.f32 %v3008_v1, %v2988_v62  ;;  %v3017_v15 = vadd.f32 %v3008_v1, %v2989_v27  ;;  %v3536_v0 = vrot.slane %v3530_v17, 6 }
 0x3a6   : > { %v6598_v58 = vadd.f32 %v3094_v21, %v3074_v63  ;;  %v3014_v29 = vadd.f32 %v3006_v34, %v2986_v32  ;;  %v3015_v56 = vadd.f32 %v3006_v34, %v2987_v40  ;;  %v3130_v32 = vrot.slane %v3115_v31, 5 }
 0x3a7   : > { %v3539_v12 = vrot.slane %v3532_v41, 6  ;;  %v3559_v37 = vmul.f32 %v6632_v33, %v3557_v47  ;;  %v3538_v21 = vsel %vm1697_vm8, %v3536_v0, %v3537_v18  ;;  %v3558_v63 = vmul.f32 %v3557_v47, %v6543_v38 }
 0x3a8   : > { %v3131_v39 = vsel %vm1442_vm7, %v3126_v48, %v3130_v32 }
 0x3a9   : > { %v3143_v52 = vadd.f32 %v3131_v39, %v3103_v57  ;;  %v3540_v3 = vsel %vm1697_vm8, %v3537_v18, %v3539_v12  ;;  %v3565_v1 = vrot.slane %v3559_v37, 6  ;;  %v3111_v57 = vmul.f32 %v6596_v59, %v6422_v26 }
 0x3aa   : > { %3483 = vrot.lane.b32.xlu2 %v3472_v14, %s4259_s14  ;;  %3481 = vrot.lane.b32.xlu1 %v3470_v44, %s4259_s14  ;;  %v3564_v34 = vrot.slane %v3558_v63, 6 }
 0x3ab   : > { %3479 = vrot.lane.b32.xlu0 %v3468_v8, %s4259_s14  ;;  %s3980_s14 = sld [smem:[#allocation4 + $0x61]]  ;;  %v3568_v8 = vsel %vm1697_vm8, %v3565_v1, %v3567_v36  ;;  %v3123_v31 = vrot.slane %v3111_v57, 5 }
 0x3ac   : > { %v6615_v40 = vpop.permute.xlu2 %3172  ;;  %v3036_v45 = vpop.permute.xlu1 %3035  ;;  %v3566_v26 = vsel %vm1697_vm8, %v3564_v34, %v3565_v1 }
 0x3ad   : > { %v3034_v51 = vpop.permute.xlu0 %3033  ;;  %v3044_v25 = vadd.f32 %v3036_v45, %v3016_v54  ;;  %v3045_v53 = vadd.f32 %v3036_v45, %v3017_v15 }
 0x3ae   : > { %v3042_v24 = vadd.f32 %v3034_v51, %v3014_v29  ;;  %v3043_v28 = vadd.f32 %v3034_v51, %v3015_v56  ;;  %v3110_v56 = vmul.f32 %v6596_v59, %v6419_v49  ;;  %v3114_v49 = vmul.f32 %v6596_v59, %v6440_v43 }
 0x3b0   : > { %v3122_v45 = vrot.slane %v3110_v56, 5 }
 0x3b1   : > { %v3585_v29 = vstv %s3980_s14 }
 0x3b2   : > { %3517 = vrot.lane.b32.xlu2 %v3512_v50, %s4260_s19  ;;  %3515 = vrot.lane.b32.xlu1 %v3510_v7, %s4260_s19  ;;  %v3587_v20 = vmul.f32 %v6632_v33, %v3585_v29  ;;  %v3588_v5 = vmul.f32 %v3585_v29, %v6559_v22  ;;  %v3128_v50 = vrot.slane %v3114_v49, 5 }
 0x3b3   : > { %3513 = vrot.lane.b32.xlu0 %v3508_v16, %s4260_s19  ;;  %v3586_v16 = vmul.f32 %v3585_v29, %v6543_v38  ;;  %s3974_s19 = sld [smem:[#allocation4 + $0x5b]] }
 0x3b4   : > { %v6629_v46 = vpop.permute.xlu2 %3178  ;;  %v3064_v27 = vpop.permute.xlu1 %3063  ;;  %v3593_v51 = vrot.slane %v3587_v20, 6 }
 0x3b5   : > { %v3194_v61 = vadd.f32 %v6629_v46, %v3143_v52  ;;  %v3062_v13 = vpop.permute.xlu0 %3061  ;;  %v3072_v62 = vadd.f32 %v3064_v27, %v3044_v25  ;;  %v3073_v30 = vadd.f32 %v3064_v27, %v3045_v53  ;;  %v3595_v25 = vrot.slane %v3588_v5, 6 }
 0x3b6   : > { %v3070_v4 = vadd.f32 %v3062_v13, %v3042_v24  ;;  %v3071_v23 = vadd.f32 %v3062_v13, %v3043_v28  ;;  %v3592_v53 = vrot.slane %v3586_v16, 6  ;;  %v3124_v24 = vrot.slane %v3112_v9, 5 }
 0x3b7   : > { %v3596_v18 = vsel %vm1697_vm8, %v3593_v51, %v3595_v25 }
 0x3b8   : > { %v3594_v52 = vsel %vm1697_vm8, %v3592_v53, %v3593_v51  ;;  %v3129_v12 = vsel %vm1442_vm7, %v3124_v24, %v3128_v50  ;;  %v3125_v47 = vsel %vm1442_vm7, %v3122_v45, %v3124_v24 }
 0x3b9   : > { %v3142_v27 = vadd.f32 %v3129_v12, %v6598_v58 }
 0x3ba   : > { %3545 = vrot.lane.b32.xlu2 %v3540_v3, %s4261_s25  ;;  %3543 = vrot.lane.b32.xlu1 %v3538_v21, %s4261_s25 }
 0x3bb   : > { %3541 = vrot.lane.b32.xlu0 %v3536_v0, %s4261_s25  ;;  %v3127_v0 = vsel %vm1442_vm7, %v3123_v31, %v3126_v48  ;;  %s4264_s25 = smov 3  }
 0x3bc   : > { %v6644_v54 = vpop.permute.xlu2 %3223  ;;  %v3092_v15 = vpop.permute.xlu1 %3091 }
 0x3bd   : > { %v3090_v14 = vpop.permute.xlu0 %3089  ;;  %v3100_v44 = vadd.f32 %v3092_v15, %v3072_v62  ;;  %v3101_v10 = vadd.f32 %v3092_v15, %v3073_v30 }
 0x3be   : > { %v3098_v55 = vadd.f32 %v3090_v14, %v3070_v4  ;;  %v3099_v60 = vadd.f32 %v3090_v14, %v3071_v23 }
 0x3bf   : > { %v3141_v13 = vadd.f32 %v3127_v0, %v3101_v10  ;;  %v3140_v30 = vadd.f32 %v3125_v47, %v3100_v44 }
 0x3c0   : > { %v3139_v32 = vadd.f32 %v3123_v31, %v3099_v60  ;;  %v3138_v7 = vadd.f32 %v3122_v45, %v3098_v55 }
 0x3c2   : > { %3573 = vrot.lane.b32.xlu2 %v3568_v8, %s4262_s30  ;;  %3571 = vrot.lane.b32.xlu1 %v3566_v26, %s4262_s30 }
 0x3c3   : > { %3569 = vrot.lane.b32.xlu0 %v3564_v34, %s4262_s30  ;;  %s3993_s30 = sshll.u32 %s4303_s13, 6  ;;  %s3784_s13 = sshll.u32 %s4394_s23, 4  ;;  %s3785_s13 = int_to_ptr.vmem [resolvable:$true] %s3784_s13 }
 0x3c4   : > { %v3230_v28 = vpop.permute.xlu2 %3229  ;;  %v3171_v42 = vpop.permute.xlu1 %3170  ;;  %s3783_s29 = scalar_lea.hbm %s6887_s2, %s3993_s30 }
 0x3c5   : > { %v3245_v41 = vadd.f32 %v3230_v28, %v3194_v61  ;;  %v3169_v17 = vpop.permute.xlu0 %3168  ;;  %v3190_v39 = vadd.f32 %v3171_v42, %v3139_v32  ;;  %s3786_s3 = sshll.u32 %s3783_s29, 4  ;;  %s3787_s3 = int_to_ptr.hbm [resolvable:$true] %s3786_s3 }
 0x3c6   : > { %v3180_v43 = vsel %vm294_vm3, %v3169_v17, %v3171_v42  ;;  %s4196_s7 = sshra.s32 %s3787_s3, 4  ;;  %s4197_s7 = int_to_ptr.hbm [resolvable:$true] %s4196_s7 }
 0x3c7   : > { %v3189_v59 = vadd.f32 %v3180_v43, %v3138_v7  ;;  %s4198_s20 = scalar_lea.hbm %s4197_s7, 64  ;;  %p4203_p0 = scmp.lt.s32.totalorder %s4197_s7, %s6887_s2 }
 0x3c8   : > { %p4199_p6 = scmp.ne.s32.totalorder %s4197_s7, %s4198_s20  ;;  %p4204_p8 = scmp.lt.s32.totalorder %s4202_s16, %s4198_s20 }
 0x3ca   : > { %3601 = vrot.lane.b32.xlu2 %v3596_v18, %s4263_s27  ;;  %3599 = vrot.lane.b32.xlu1 %v3594_v52, %s4263_s27  ;;  %p4200_p13 = pnand %p4199_p6, %p4334_p11  ;;  %p4205_p5 = por %p4204_p8, %p4203_p0 }
 0x3cb   : > { %3597 = vrot.lane.b32.xlu0 %v3592_v53, %s4263_s27 }
 0x3cc   : > { %v3264_v61 = vpop.permute.xlu2 %3263  ;;  %v3177_v62 = vpop.permute.xlu1 %3176  ;;  %p4201_p1 = pneg %p4200_p13 }
 0x3cd   : > { %v3273_v4 = vadd.f32 %v3264_v61, %v3245_v41  ;;  %v3175_v23 = vpop.permute.xlu0 %3174  ;;  %v3182_v2 = vsel %vm294_vm3, %v3177_v62, %v6629_v46 }
 0x3ce   : > { %v3181_v48 = vsel %vm294_vm3, %v6615_v40, %v3175_v23  ;;  %v3192_v37 = vadd.f32 %v3175_v23, %v3141_v13  ;;  %v3193_v11 = vadd.f32 %v3182_v2, %v3142_v27  ;;  %p4206_p9 = pnand %p4205_p5, %p4201_p1 }
 0x3cf   : > { %v3191_v3 = vadd.f32 %v3181_v48, %v3140_v30 }
 0x3d4   : > { %v3292_v21 = vpop.permute.xlu2 %3291  ;;  %v3222_v63 = vpop.permute.xlu1 %3221 }
 0x3d5   : > { %v3301_v1 = vadd.f32 %v3292_v21, %v3273_v4  ;;  %v3220_v36 = vpop.permute.xlu0 %3219  ;;  %v3241_v58 = vadd.f32 %v3222_v63, %v3190_v39  ;;  %v3363_v39 = vstv %s3974_s19 }
 0x3d6   : > { %v3231_v57 = vsel %vm336_vm4, %v3220_v36, %v3222_v63  ;;  %v3367_v12 = vmul.f32 %v6632_v33, %v3363_v39  ;;  %v3369_v0 = vmul.f32 %v3363_v39, %v6559_v22  ;;  %v3366_v47 = vmul.f32 %v6529_v35, %v3363_v39 }
 0x3d7   : > { %v3240_v34 = vadd.f32 %v3231_v57, %v3189_v59  ;;  %v3368_v27 = vmul.f32 %v3363_v39, %v6562_v19 }
 0x3d8   : > { %v3380_v13 = vrot.slane %v3367_v12, 6  ;;  %v3384_v62 = vrot.slane %v3369_v0, 6  ;;  %v3378_v30 = vrot.slane %v3366_v47, 6 }
 0x3d9   : > { %v3382_v4 = vrot.slane %v3368_v27, 6 }
 0x3db   : > { %v3383_v33 = vsel %vm1697_vm8, %v3378_v30, %v3382_v4 }
 0x3dc   : > { %v3320_v15 = vpop.permute.xlu2 %3319  ;;  %v3228_v29 = vpop.permute.xlu1 %3227 }
 0x3dd   : > { %v3329_v56 = vadd.f32 %v3320_v15, %v3301_v1  ;;  %v3226_v14 = vpop.permute.xlu0 %3225  ;;  %v3233_v46 = vsel %vm336_vm4, %v3228_v29, %v3230_v28 }
 0x3de   : > { %v3232_v40 = vsel %vm336_vm4, %v6644_v54, %v3226_v14  ;;  %v3243_v44 = vadd.f32 %v3226_v14, %v3192_v37  ;;  %v3244_v10 = vadd.f32 %v3233_v46, %v3193_v11 }
 0x3df   : > { %v3242_v55 = vadd.f32 %v3232_v40, %v3191_v3  ;;  %v3385_v3 = vsel %vm1697_vm8, %v3380_v13, %v3384_v62 }
 0x3e0   : > { %v3272_v60 = vadd.f32 %v3264_v61, %v3244_v10 }
 0x3e2   : > { %v3300_v52 = vadd.f32 %v3292_v21, %v3272_v60  ;;  %v3364_v60 = vmul.f32 %v3363_v39, %v6540_v6 }
 0x3e4   : > { %v3348_v8 = vpop.permute.xlu2 %3347  ;;  %v3262_v31 = vpop.permute.xlu1 %3261  ;;  %v3328_v61 = vadd.f32 %v3320_v15, %v3300_v52 }
 0x3e5   : > { %v3260_v26 = vpop.permute.xlu0 %3259  ;;  %v6680_v20 = vadd.f32 %v3262_v31, %v3242_v55  ;;  %v3271_v5 = vadd.f32 %v3262_v31, %v3243_v44  ;;  %v3357_v48 = vadd.f32 %v3348_v8, %v3329_v56 }
 0x3e6   : > { %v6682_v16 = vadd.f32 %v3260_v26, %v3240_v34  ;;  %v3269_v9 = vadd.f32 %v3260_v26, %v3241_v58  ;;  %v3356_v11 = vadd.f32 %v3348_v8, %v3328_v61  ;;  %v3365_v26 = vmul.f32 %v3363_v39, %v6543_v38 }
 0x3e7   : > { %v3397_v22 = vadd.f32 %v3385_v3, %v3357_v48 }
 0x3e8   : > { %v3396_v21 = vadd.f32 %v3383_v33, %v3356_v11  ;;  %v3377_v12 = vrot.slane %v3365_v26, 6 }
 0x3ea   : > { %v3381_v61 = vsel %vm1697_vm8, %v3377_v12, %v3380_v13 }
 0x3ec   : > { %v6684_v49 = vpop.permute.xlu2 %3426  ;;  %v3290_v45 = vpop.permute.xlu1 %3289 }
 0x3ed   : > { %v6686_v32 = vpop.permute.xlu0 %3287  ;;  %v6688_v51 = vadd.f32 %v3290_v45, %v3271_v5 }
 0x3ee   : > { %v6691_v54 = vadd.f32 %v6686_v32, %v3269_v9 }
 0x3f4   : > { %v3433_v25 = vpop.permute.xlu2 %3432  ;;  %v6693_v53 = vpop.permute.xlu1 %3317 }
 0x3f5   : > { %v6695_v24 = vpop.permute.xlu0 %3315  ;;  %v3448_v19 = vadd.f32 %v3433_v25, %v3397_v22  ;;  %v3327_v6 = vadd.f32 %v6693_v53, %v6688_v51 }
 0x3f6   : > { %v3325_v38 = vadd.f32 %v6695_v24, %v6691_v54 }
 0x3fc   : > { %v6697_v28 = vpop.permute.xlu2 %3477  ;;  %v6699_v42 = vpop.permute.xlu1 %3345 }
 0x3fd   : > { %v6701_v50 = vpop.permute.xlu0 %3343  ;;  %v3355_v47 = vadd.f32 %v6699_v42, %v3327_v6 }
 0x3fe   : > { %v3353_v27 = vadd.f32 %v6701_v50, %v3325_v38 }
 0x404   : > { %v3484_v7 = vpop.permute.xlu2 %3483  ;;  %v6703_v41 = vpop.permute.xlu1 %3424 }
 0x405   : > { %v6705_v17 = vpop.permute.xlu0 %3422  ;;  %v3499_v58 = vadd.f32 %v3484_v7, %v3448_v19 }
 0x40c   : > { %v3518_v43 = vpop.permute.xlu2 %3517  ;;  %v3431_v59 = vpop.permute.xlu1 %3430 }
 0x40d   : > { %v6707_v18 = vpop.permute.xlu0 %3428  ;;  %v3436_v35 = vsel %vm294_vm3, %v3431_v59, %v3433_v25  ;;  %v3527_v29 = vadd.f32 %v3518_v43, %v3499_v58  ;;  %v3298_v25 = vadd.f32 %v3290_v45, %v6680_v20  ;;  %v3376_v59 = vrot.slane %v3364_v60, 6 }
 0x40e   : > { %v3447_v63 = vadd.f32 %v3436_v35, %v3396_v21  ;;  %v3435_v54 = vsel %vm294_vm3, %v6684_v49, %v6707_v18 }
 0x40f   : > { %v3326_v52 = vadd.f32 %v6693_v53, %v3298_v25  ;;  %v3379_v39 = vsel %vm1697_vm8, %v3376_v59, %v3378_v30  ;;  %v3395_v30 = vadd.f32 %v3381_v61, %v3355_v47 }
 0x411   : > { %v3354_v20 = vadd.f32 %v6699_v42, %v3326_v52  ;;  %v3446_v11 = vadd.f32 %v6707_v18, %v3395_v30 }
 0x413   : > { %v3394_v62 = vadd.f32 %v3379_v39, %v3354_v20 }
 0x414   : > { %v3546_v23 = vpop.permute.xlu2 %3545  ;;  %v6713_v2 = vpop.permute.xlu1 %3475 }
 0x415   : > { %v3474_v37 = vpop.permute.xlu0 %3473  ;;  %v3555_v14 = vadd.f32 %v3546_v23, %v3527_v29  ;;  %v3445_v48 = vadd.f32 %v3435_v54, %v3394_v62 }
 0x416   : > { %v3485_v49 = vsel %vm336_vm4, %v3474_v37, %v6713_v2 }
 0x41c   : > { %v3574_v1 = vpop.permute.xlu2 %3573  ;;  %v3482_v36 = vpop.permute.xlu1 %3481 }
 0x41d   : > { %v3480_v57 = vpop.permute.xlu0 %3479  ;;  %v3487_v34 = vsel %vm336_vm4, %v3482_v36, %v3484_v7  ;;  %v3583_v40 = vadd.f32 %v3574_v1, %v3555_v14 }
 0x41e   : > { %v3498_v15 = vadd.f32 %v3487_v34, %v3447_v63  ;;  %v3486_v13 = vsel %vm336_vm4, %v6697_v28, %v3480_v57  ;;  %v3497_v35 = vadd.f32 %v3480_v57, %v3446_v11 }
 0x41f   : > { %v3496_v22 = vadd.f32 %v3486_v13, %v3445_v48 }
 0x420   : > { %v3526_v56 = vadd.f32 %v3518_v43, %v3498_v15  ;;  %v3296_v43 = vadd.f32 %v6686_v32, %v6682_v16 }
 0x422   : > { %v3554_v46 = vadd.f32 %v3546_v23, %v3526_v56  ;;  %v3324_v0 = vadd.f32 %v6695_v24, %v3296_v43  ;;  %v3434_v24 = vsel %vm294_vm3, %v6705_v17, %v6703_v41 }
 0x424   : > { %v3602_v44 = vpop.permute.xlu2 %3601  ;;  %v3582_v10 = vadd.f32 %v3574_v1, %v3554_v46  ;;  %v3516_v55 = vpop.permute.xlu1 %3515  ;;  %v3352_v32 = vadd.f32 %v6701_v50, %v3324_v0  ;;  %v3393_v50 = vadd.f32 %v3377_v12, %v3353_v27 }
 0x425   : > { %v3611_v8 = vadd.f32 %v3602_v44, %v3583_v40  ;;  %v3514_v31 = vpop.permute.xlu0 %3513  ;;  %v3524_v63 = vadd.f32 %v3516_v55, %v3496_v22  ;;  %v3525_v1 = vadd.f32 %v3516_v55, %v3497_v35 }
 0x426   : > { %v3610_v5 = vadd.f32 %v3602_v44, %v3582_v10  ;;  %v3392_v23 = vadd.f32 %v3376_v59, %v3352_v32  ;;  %v3444_v17 = vadd.f32 %v6703_v41, %v3393_v50 }
 0x427   : > { %v3986_v9 = vmul.f32 -1.442695, %v3611_v8 }
 0x428   : > { %v3985_v7 = vmul.f32 -1.442695, %v3610_v5  ;;  %v3443_v3 = vadd.f32 %v3434_v24, %v3392_v23  ;;  %v3495_v28 = vadd.f32 %v6713_v2, %v3444_v17 }
 0x429   : > { %4063 = vpow2.f32 %v3986_v9 }
 0x42a   : > { %4065 = vpow2.f32 %v3985_v7  ;;  %v3494_v19 = vadd.f32 %v3485_v49, %v3443_v3  ;;  %v3523_v36 = vadd.f32 %v3514_v31, %v3495_v28 }
 0x42c   : > { %v3544_v45 = vpop.permute.xlu1 %3543  ;;  %v3522_v18 = vadd.f32 %v3514_v31, %v3494_v19 }
 0x42d   : > { %v3542_v16 = vpop.permute.xlu0 %3541  ;;  %v3552_v37 = vadd.f32 %v3544_v45, %v3524_v63  ;;  %v3553_v34 = vadd.f32 %v3544_v45, %v3525_v1 }
 0x42e   : > { %v3550_v15 = vadd.f32 %v3542_v16, %v3522_v18  ;;  %v3551_v29 = vadd.f32 %v3542_v16, %v3523_v36 }
 0x42f   : > { %v4064_v51 = vpop.eup %4063 }
 0x430   : > { %v4066_v53 = vpop.eup %4065  ;;  %v6744_v4 = vadd.f32 1.0, %v4064_v51 }
 0x431   : > { %v6742_v42 = vadd.f32 1.0, %v4066_v53 }
 0x432   : > { %v3722_v62 = vand.u32 2147483648, %v6744_v4  ;;  %vm3716_vm13 = vweird.f32 %v6744_v4  ;;  %v3720_v24 = vand.u32 2147483647, %v6744_v4 }
 0x433   : > { %4067 = vrcp.f32 %v6742_v42  ;;  %v3707_v20 = vand.u32 2147483648, %v6742_v42  ;;  %vm3701_vm10 = vweird.f32 %v6742_v42  ;;  %v3705_v47 = vand.u32 2147483647, %v6742_v42 }
 0x434   : > { %v3572_v33 = vpop.permute.xlu1 %3571  ;;  %4069 = vrcp.f32 %v6744_v4  ;;  %v3723_v13 = vor.u32 1.1754944e-38, %v3722_v62  ;;  %vm3721_vm1 = vcmp.eq.f32.partialorder %v3720_v24, 8.507059e+37  ;;  %v4130_v62 = vld [vmem:[%s4388_s8 + $0x10] sm:$0xff]  ;;  %v4131_v24 = vld [vmem:[%s4388_s8 + $0x20] sm:$0xff] }
 0x435   : > { %v3570_v21 = vpop.permute.xlu0 %3569  ;;  %v3580_v57 = vadd.f32 %v3572_v33, %v3552_v37  ;;  %v3581_v14 = vadd.f32 %v3572_v33, %v3553_v34  ;;  %v3708_v54 = vor.u32 1.1754944e-38, %v3707_v20  ;;  %vm3706_vm14 = vcmp.eq.f32.partialorder %v3705_v47, 8.507059e+37 }
 0x436   : > { %v3578_v46 = vadd.f32 %v3570_v21, %v3550_v15  ;;  %v3579_v40 = vadd.f32 %v3570_v21, %v3551_v29 }
 0x439   : > { %v4068_v58 = vpop.eup %4067 }
 0x43a   : > { %v6755_v56 = vpop.eup %4069  ;;  %v3697_v41 = vmul.f32 %v4068_v58, %v6742_v42  ;;  %vm3702_vm9 = vweird.f32 %v4068_v58 }
 0x43b   : > { %v3712_v55 = vmul.f32 %v6755_v56, %v6744_v4  ;;  %vm6768_vm11 = vmor %vm3701_vm10, %vm3702_vm9  ;;  %vm3717_vm12 = vweird.f32 %v6755_v56 }
 0x43c   : > { %v3600_v44 = vpop.permute.xlu1 %3599  ;;  %v3698_v26 = vsub.f32 1.0, %v3697_v41  ;;  %vm3718_vm15 = vmor %vm3716_vm13, %vm3717_vm12 }
 0x43d   : > { %v3598_v10 = vpop.permute.xlu0 %3597  ;;  %v3608_v2 = vadd.f32 %v3600_v44, %v3580_v57  ;;  %v3609_v60 = vadd.f32 %v3600_v44, %v3581_v14  ;;  %v3713_v59 = vsub.f32 1.0, %v3712_v55 }
 0x43e   : > { %v3606_v8 = vadd.f32 %v3598_v10, %v3578_v46  ;;  %v3607_v31 = vadd.f32 %v3598_v10, %v3579_v40  ;;  %v3699_v43 = vmul.f32 %v4068_v58, %v3698_v26 }
 0x43f   : > { %v3983_v5 = vmul.f32 -1.442695, %v3608_v2  ;;  %v3984_v7 = vmul.f32 -1.442695, %v3609_v60  ;;  %v3714_v52 = vmul.f32 %v6755_v56, %v3713_v59 }
 0x440   : > { %v3981_v9 = vmul.f32 -1.442695, %v3606_v8  ;;  %v3982_v25 = vmul.f32 -1.442695, %v3607_v31  ;;  %v3700_v6 = vadd.f32 %v4068_v58, %v3699_v43 }
 0x441   : > { %4071 = vpow2.f32 %v3983_v5  ;;  %v3715_v61 = vadd.f32 %v6755_v56, %v3714_v52 }
 0x442   : > { %4073 = vpow2.f32 %v3981_v9  ;;  %v3704_v53 = vsel %vm6768_vm11, %v4068_v58, %v3700_v6 }
 0x443   : > { %4075 = vpow2.f32 %v3982_v25  ;;  %v6784_v42 = vsel %vm3706_vm14, %v3708_v54, %v3704_v53  ;;  %v3719_v23 = vsel %vm3718_vm15, %v6755_v56, %v3715_v61 }
 0x444   : > { %4077 = vpow2.f32 %v3984_v7  ;;  %v3738_v17 = vrot.slane %v6784_v42, 5  ;;  %v6790_v33 = vsel %vm3721_vm1, %v3723_v13, %v3719_v23  ;;  %v4132_v42 = vld [vmem:[%s4388_s8 + $0x30] sm:$0xff] }
 0x447   : > { %v4072_v12 = vpop.eup %4071 }
 0x448   : > { %v4074_v0 = vpop.eup %4073  ;;  %v3632_v38 = vadd.f32 1.0, %v4072_v12 }
 0x449   : > { %v4076_v45 = vpop.eup %4075  ;;  %v6762_v39 = vadd.f32 1.0, %v4074_v0 }
 0x44a   : > { %v4078_v16 = vpop.eup %4077  ;;  %v6766_v32 = vadd.f32 1.0, %v4076_v45  ;;  %4079 = vrcp.f32 %v3632_v38  ;;  %v3675_v30 = vand.u32 2147483647, %v3632_v38  ;;  %v3677_v50 = vand.u32 2147483648, %v3632_v38 }
 0x44b   : > { %4081 = vrcp.f32 %v6762_v39  ;;  %v6775_v51 = vadd.f32 1.0, %v4078_v16  ;;  %v3645_v11 = vand.u32 2147483647, %v6762_v39  ;;  %v3647_v4 = vand.u32 2147483648, %v6762_v39 }
 0x44c   : > { %4083 = vrcp.f32 %v6766_v32  ;;  %vm3671_vm2 = vweird.f32 %v3632_v38  ;;  %vm6793_vm3 = vcmp.eq.f32.partialorder %v3675_v30, 8.507059e+37  ;;  %vm3641_vm4 = vweird.f32 %v6762_v39 }
 0x44d   : > { %4085 = vrcp.f32 %v6775_v51  ;;  %v3678_v1 = vor.u32 1.1754944e-38, %v3677_v50  ;;  %vm3656_vm5 = vweird.f32 %v6766_v32  ;;  %vm6801_vm6 = vcmp.eq.f32.partialorder %v3645_v11, 8.507059e+37  ;;  %v4133_v11 = vld [vmem:[%s4388_s8 + $0x8] sm:$0xff] }
 0x44e   : > { %v3660_v37 = vand.u32 2147483647, %v6766_v32  ;;  %v3648_v29 = vor.u32 1.1754944e-38, %v3647_v4  ;;  %v3662_v57 = vand.u32 2147483648, %v6766_v32  ;;  %v3692_v40 = vand.u32 2147483648, %v6775_v51  ;;  %v4135_v4 = vld [vmem:[%s4388_s8 + $0x28] sm:$0xff] }
 0x44f   : > { %v3690_v2 = vand.u32 2147483647, %v6775_v51  ;;  %vm3686_vm15 = vweird.f32 %v6775_v51 }
 0x450   : > { %v4080_v48 = vpop.eup %4079  ;;  %vm3661_vm14 = vcmp.eq.f32.partialorder %v3660_v37, 8.507059e+37  ;;  %v3663_v26 = vor.u32 1.1754944e-38, %v3662_v57  ;;  %v3693_v59 = vor.u32 1.1754944e-38, %v3692_v40 }
 0x451   : > { %v4082_v49 = vpop.eup %4081  ;;  %v3667_v3 = vmul.f32 %v4080_v48, %v3632_v38  ;;  %vm3672_vm8 = vweird.f32 %v4080_v48 }
 0x452   : > { %v4084_v22 = vpop.eup %4083  ;;  %v3637_v35 = vmul.f32 %v4082_v49, %v6762_v39  ;;  %vm3642_vm9 = vweird.f32 %v4082_v49  ;;  %vm3673_vm11 = vmor %vm3671_vm2, %vm3672_vm8  ;;  %v3740_v39 = vrot.slane %v6790_v33, 5 }
 0x453   : > { %v4086_v19 = vpop.eup %4085  ;;  %v3652_v28 = vmul.f32 %v4084_v22, %v6766_v32  ;;  %v3668_v63 = vsub.f32 1.0, %v3667_v3  ;;  %vm3657_vm10 = vweird.f32 %v4084_v22  ;;  %vm3643_vm13 = vmor %vm3641_vm4, %vm3642_vm9  ;;  %vm3691_vm4 = vcmp.eq.f32.partialorder %v3690_v2, 8.507059e+37  ;;  %v4134_v3 = vld [vmem:[%s4388_s8 + $0x18] sm:$0xff] }
 0x454   : > { %v3638_v18 = vsub.f32 1.0, %v3637_v35  ;;  %v3682_v36 = vmul.f32 %v4086_v19, %v6775_v51  ;;  %vm3687_vm12 = vweird.f32 %v4086_v19  ;;  %vm3658_vm1 = vmor %vm3656_vm5, %vm3657_vm10  ;;  %v4129_v51 = vld [vmem:[%s4388_s8] sm:$0xff] }
 0x455   : > { %v3653_v34 = vsub.f32 1.0, %v3652_v28  ;;  %v3669_v15 = vmul.f32 %v4080_v48, %v3668_v63  ;;  %vm3688_vm2 = vmor %vm3686_vm15, %vm3687_vm12 }
 0x456   : > { %v3683_v56 = vsub.f32 1.0, %v3682_v36  ;;  %v3639_v41 = vmul.f32 %v4082_v49, %v3638_v18 }
 0x457   : > { %v3670_v14 = vadd.f32 %v4080_v48, %v3669_v15  ;;  %v3654_v46 = vmul.f32 %v4084_v22, %v3653_v34 }
 0x458   : > { %v3640_v44 = vadd.f32 %v4082_v49, %v3639_v41  ;;  %v3684_v10 = vmul.f32 %v4086_v19, %v3683_v56 }
 0x459   : > { %v3674_v60 = vsel %vm3673_vm11, %v4080_v48, %v3670_v14  ;;  %v3655_v55 = vadd.f32 %v4084_v22, %v3654_v46 }
 0x45a   : > { %v3679_v8 = vsel %vm6793_vm3, %v3678_v1, %v3674_v60  ;;  %v3644_v31 = vsel %vm3643_vm13, %v4082_v49, %v3640_v44  ;;  %v3685_v5 = vadd.f32 %v4086_v19, %v3684_v10  ;;  %vm3750_vm3 = vcmask 23552  }
 0x45b   : > { %v3733_v9 = vrot.slane %v3679_v8, 5  ;;  %v3649_v25 = vsel %vm6801_vm6, %v3648_v29, %v3644_v31  ;;  %v3659_v7 = vsel %vm3658_vm1, %v4084_v22, %v3655_v55  ;;  %v4136_v22 = vld [vmem:[%s4388_s8 + $0x38] sm:$0xff] }
 0x45c   : > { %v3732_v43 = vrot.slane %v3649_v25, 5  ;;  %v3664_v52 = vsel %vm3661_vm14, %v3663_v26, %v3659_v7  ;;  %v3689_v12 = vsel %vm3688_vm2, %v4086_v19, %v3685_v5 }
 0x45d   : > { %v3739_v6 = vsel %vm1442_vm7, %v3733_v9, %v3738_v17  ;;  %v3694_v0 = vsel %vm3691_vm4, %v3693_v59, %v3689_v12  ;;  %v3735_v38 = vrot.slane %v3664_v52, 5 }
 0x45e   : > { %3746 = vrot.lane.b32.xlu2 %v3739_v6, %s4264_s25  ;;  %v3734_v20 = vsel %vm1442_vm7, %v3732_v43, %v3733_v9  ;;  %v3736_v45 = vrot.slane %v3694_v0, 5 }
 0x45f   : > { %3742 = vrot.lane.b32.xlu0 %v3734_v20, %s4264_s25 }
 0x460   : > { %v3737_v47 = vsel %vm1442_vm7, %v3735_v38, %v3736_v45  ;;  %v3741_v16 = vsel %vm1442_vm7, %v3736_v45, %v3740_v39 }
 0x461   : > { %3744 = vrot.lane.b32.xlu1 %v3737_v47, %s4264_s25 }
 0x467   : > { %3748 = vrot.lane.b32.xlu0 %v3741_v16, %s4264_s25 }
 0x4b8   : > { %v3747_v50 = vpop.permute.xlu2 %3746 }
 0x4d1   : > { %v3743_v32 = vpop.permute.xlu0 %3742 }
 0x4d3   : > { %v3745_v27 = vpop.permute.xlu1 %3744 }
 0x4d4   : > { %v3751_v61 = vsel %vm3750_vm3, %v3743_v32, %v3745_v27 }
 0x4d5   : > { %v3755_v53 = vmul.f32 %v4129_v51, %v3751_v61  ;;  %v3757_v54 = vmul.f32 %v4130_v62, %v3751_v61  ;;  %v3759_v30 = vmul.f32 %v4131_v24, %v3751_v61  ;;  %v3761_v23 = vmul.f32 %v4132_v42, %v3751_v61 }
 0x4d7   : > { %3763 = vst.msk [vmem:[%s4394_s23] sm:$0xff] %vm215_vm0, %v3755_v53 }
 0x4d8   : > { %3765 = vst.msk [vmem:[%s4394_s23 + $0x10] sm:$0xff] %vm215_vm0, %v3757_v54 }
 0x4d9   : > { %3767 = vst.msk [vmem:[%s4394_s23 + $0x20] sm:$0xff] %vm215_vm0, %v3759_v30  ;;  %v3749_v13 = vpop.permute.xlu0 %3748 }
 0x4da   : > { %3769 = vst.msk [vmem:[%s4394_s23 + $0x30] sm:$0xff] %vm215_vm0, %v3761_v23  ;;  %v3752_v48 = vsel %vm3750_vm3, %v3747_v50, %v3749_v13 }
 0x4db   : > { %v3756_v49 = vmul.f32 %v4133_v11, %v3752_v48  ;;  %v3758_v17 = vmul.f32 %v4134_v3, %v3752_v48  ;;  %v3760_v33 = vmul.f32 %v4135_v4, %v3752_v48  ;;  %v3762_v35 = vmul.f32 %v4136_v22, %v3752_v48 }
 0x4dd   : > { %3764 = vst.msk [vmem:[%s4394_s23 + $0x8] sm:$0xff] %vm215_vm0, %v3756_v49 }
 0x4de   : > { %3766 = vst.msk [vmem:[%s4394_s23 + $0x18] sm:$0xff] %vm215_vm0, %v3758_v17 }
 0x4df   : > { %3768 = vst.msk [vmem:[%s4394_s23 + $0x28] sm:$0xff] %vm215_vm0, %v3760_v33 }
 0x4e0   : > { %3770 = vst.msk [vmem:[%s4394_s23 + $0x38] sm:$0xff] %vm215_vm0, %v3762_v35 }
 0x4e1   : > { %4209 = shalt.err (!%p4206_p9)
}
 0x4e2   : > { %s4265_s4 = smov 128   ;;  %s4266_s23 = smov 8  }
 0x4e3   : > { %4000 = dma.vmem_to_hbm [thread:$0]  (%p4334_p11), %s3785_s13, 1024, %s3787_s3, %s3772_s6, %s4265_s4, %s4265_s4, %s4266_s23  }
 0x4e4 PF: > { %s3801_s24 = sand.u32 1, %s4240_s9   ;;  %p7163_p10 = scmp.ge.s32.totalorder %s4252_s12, 2 }
 0x4e5   : > { %s3802_s14 = scalar_lea.sflag [#allocation6], %s3801_s24 }
 0x4e6   : > { %p4011_p2 = pnand %p7163_p10, %p4338_p12 }
 0x4e8   : > { %p4012_p7 = pneg %p4011_p2 }
 0x4ea   : > { %4235 = dma.done.wait (%p4012_p7), %s3802_s14, 1024  }
 0x4eb   : > { %4237 = vsyncadd (%p4012_p7), %s3802_s14, 4294966272  ;;  %p16_p3 = scmp.ge.s32.totalorder %s4307_s15, 4   ;;  %s7164_s9 = smov %s4244_s10 }
 0x4ec   : > { %s7165_s10 = smov %s4248_s11  ;;  %s7166_s11 = smov %s4319_s18 }
 0x4ed   : > { %s7167_s12 = smov %s4307_s15  ;;  %18 = sbr.rel (!%p16_p3) target bundleno = 6 (0x6), region = 82 }
 0x4f2   :  { %3808 = vsyncpa [#allocation5], 1 }
 0x4f3   :  { %3810 = vsyncpa [#allocation5 + $0x1], 1 }
 0x4f4   :  { %3811 = vsyncpa [#allocation6], 1 }
 0x4f5   :  { %3813 = vsyncpa [#allocation6 + $0x1], 1 }
 0x4f6   :  { %3814 = vsyncpa [#allocation7], 1 }
 0x4f7   :  { %3816 = vsyncpa [#allocation7 + $0x1], 1 }

</bundles_post_ra>
